<compile_context>
chip_gen: v7x
topology: tpu7x:2x2x1
jax: 0.10.0
libtpu: 0.0.40
codegen_flags: <defaults>
</compile_context>

<pallas_src>
import math
from functools import partial

import jax
import jax.numpy as jnp
from jax import lax
from jax.experimental import pallas as pl
from jax.experimental.pallas import tpu as pltpu

# Large finite negative: exp() underflows to exactly 0 and avoids -inf - -inf NaNs.
_MASK_VALUE = -0.7 * float(jnp.finfo(jnp.float32).max)
_LANES = 128  # lane-replication width of the running max / denom scratch


def _pick_block(dim, target):
    """Largest divisor of `dim` that is a multiple of 8 and <= target (or `dim`)."""
    if dim <= target:
        return dim
    for b in range(target, 7, -1):
        if dim % b == 0 and b % 8 == 0:
            return b
    # TODO(synk): ragged / prime-ish S needs a masked tail path; falls back to full S.
    return dim


def _bf16_eup_ok():
    """bf16 EUP/VPU exists on v6e/v7x; v2-v5 have no bf16 transcendental path."""
    try:
        kind = jax.devices()[0].device_kind.lower()
    except Exception:
        return True
    return not any(f"v{n}" in kind for n in (2, 3, 4, 5))


def _flash_kernel(*refs, scale, causal, use_bias, heads_per_block, head_dim,
                  block_q, block_kv, n_kv, qk_dtype, exp_dtype, approx_recip):
    if use_bias:
        bias_ref, q_ref, k_ref, v_ref, o_ref, m_ref, l_ref, acc_ref = refs
    else:
        q_ref, k_ref, v_ref, o_ref, m_ref, l_ref, acc_ref = refs
        bias_ref = None

    G, D = heads_per_block, head_dim
    qi = pl.program_id(2)

    # Per-(b, head-group, q-tile) online-softmax state; the full kv reduction happens
    # inside this single grid step, so init/finalize are unconditional.
    m_ref[...] = jnp.full(m_ref.shape, _MASK_VALUE, dtype=m_ref.dtype)
    l_ref[...] = jnp.zeros(l_ref.shape, dtype=l_ref.dtype)
    acc_ref[...] = jnp.zeros(acc_ref.shape, dtype=acc_ref.dtype)

    # Hoist the per-head q tiles out of the kv loop: apply softmax scale in fp32,
    # then cast once to the MXU dtype.
    q_heads = []
    for g in range(G):
        qg = q_ref[0, :, g * D:(g + 1) * D].astype(jnp.float32) * scale
        q_heads.append(qg.astype(qk_dtype))

    def kv_step(ki, apply_mask):
        start = pl.multiple_of(ki * block_kv, block_kv)
        # Slice the resident K/V slabs (loaded once per (b, head-group) by BlockSpec).
        k_tile = k_ref[0, pl.ds(start, block_kv), :]
        v_tile = v_ref[0, pl.ds(start, block_kv), :]
        if use_bias:
            bias = bias_ref[0, :, pl.ds(start, block_kv)].astype(jnp.float32)  # (1, bkv)
        if apply_mask:
            rows = qi * block_q + lax.broadcasted_iota(
                jnp.int32, (block_q, block_kv), 0)
            cols = start + lax.broadcasted_iota(
                jnp.int32, (block_q, block_kv), 1)
            allowed = cols <= rows

        for g in range(G):
            sl = slice(g * D, (g + 1) * D)
            # NOTE(synk): for G > 1 (D < 128) the second head's slice starts mid-lane;
            # accepted per review item 10 (D=128 configs hit the clean G=1 path).
            kg = k_tile[:, sl].astype(qk_dtype)
            vg = v_tile[:, sl].astype(qk_dtype)

            # scores = q @ k^T : contract last dims directly, no transpose copy.
            s = lax.dot_general(q_heads[g], kg, (((1,), (1,)), ((), ())),
                                preferred_element_type=jnp.float32)
            if use_bias:
                s = s + bias
            if apply_mask:
                s = jnp.where(allowed, s, _MASK_VALUE)

            m_prev = m_ref[g]                              # (bq, 128) lane-replicated
            l_prev = l_ref[g]
            m_curr = jnp.max(s, axis=-1, keepdims=True)    # (bq, 1)
            m_next = jnp.maximum(m_prev, m_curr)           # (bq, 128)

            # bf16 exponentials on v6e/v7x (EUP bf16 ~2x); accumulation stays fp32.
            alpha = jnp.exp((m_prev - m_next).astype(exp_dtype)).astype(jnp.float32)
            p = jnp.exp((s - m_next[:, :1]).astype(exp_dtype))

            l_ref[g] = alpha * l_prev + jnp.sum(
                p.astype(jnp.float32), axis=-1, keepdims=True)
            m_ref[g] = m_next

            pv = lax.dot_general(p.astype(qk_dtype), vg, (((1,), (0,)), ((), ())),
                                 preferred_element_type=jnp.float32)
            alpha_d = alpha[:, :D] if D <= _LANES else alpha[:, :1]
            acc_ref[g] = acc_ref[g] * alpha_d + pv

    if causal:
        # Only lower-triangular kv tiles are iterated at all; tiles fully below the
        # diagonal run mask-free, the diagonal band runs with the mask.
        kv_nomask = (qi * block_q + 1) // block_kv
        kv_hi = ((qi + 1) * block_q + block_kv - 1) // block_kv
    else:
        kv_nomask = n_kv
        kv_hi = n_kv

    @pl.loop(0, kv_nomask)
    def _interior(ki):
        kv_step(ki, apply_mask=False)

    if causal:
        @pl.loop(kv_nomask, kv_hi)
        def _diagonal(ki):
            kv_step(ki, apply_mask=True)

    # Deferred normalization: one reciprocal per query row at the very end.
    outs = []
    for g in range(G):
        l = l_ref[g]
        l_d = l[:, :D] if D <= _LANES else l[:, :1]
        inv = pl.reciprocal(l_d, approx=approx_recip)
        outs.append((acc_ref[g] * inv).astype(o_ref.dtype))
    o_ref[0] = outs[0] if G == 1 else jnp.concatenate(outs, axis=-1)


def flash_self_attention(qkv, key_padding_mask=None, *, causal=False,
                         softmax_scale=None, block_q=None, block_kv=None,
                         qk_dtype=None):
    """JAX/Pallas equivalent of FlashSelfAttention.forward (dense path).

    qkv: (B, S, 3, H, D); returns (B, S, H, D).
    key_padding_mask: optional (B, S) bool, True = keep (additive 0/-10000 bias).
    qk_dtype: MXU dtype; defaults to bf16 (also for f32 inputs). Pass jnp.float32
              for a slow, high-precision path (validation only).
    """
    B, S, three, H, D = qkv.shape
    assert three == 3
    scale = float(softmax_scale) if softmax_scale is not None else 1.0 / math.sqrt(D)

    # Pack G heads per grid step so the lane block (G*D) is a multiple of 128.
    G = None
    for g in range(1, H + 1):
        if H % g == 0 and (g * D) % 128 == 0:
            G = g
            break
    if G is None:
        # TODO(synk): pad head_dim to a multiple of 128 for exotic (H, D) configs.
        raise NotImplementedError(
            f"flash_self_attention requires H*D % 128 == 0 (got H={H}, D={D}).")
    n_hg = H // G

    bq = _pick_block(S, block_q or 512)
    bkv = _pick_block(S, block_kv or 512)
    n_q, n_kv = S // bq, S // bkv

    if qk_dtype is None:
        qk_dtype = jnp.bfloat16 if qkv.dtype == jnp.dtype(jnp.float32) else qkv.dtype
    fast = jnp.dtype(qk_dtype) != jnp.dtype(jnp.float32)
    exp_dtype = jnp.bfloat16 if (fast and _bf16_eup_ok()) else jnp.float32
    approx_recip = bool(fast)

    # Free, contiguous reshape: no HBM transpose passes for q/k/v or the output.
    qkv_flat = qkv.reshape(B, S, 3 * H * D)

    use_bias = key_padding_mask is not None
    operands, in_specs = [], []
    if use_bias:
        bias = jnp.where(key_padding_mask, 0.0, -10000.0).astype(jnp.float32)
        operands.append(bias.reshape(B, 1, S))
        in_specs.append(pl.BlockSpec((1, 1, S), lambda b, hg, qi: (b, 0, 0)))

    in_specs += [
        # q: one tile per grid step, lane block hg of component 0.
        pl.BlockSpec((1, bq, G * D), lambda b, hg, qi: (b, qi, hg)),
        # k / v: full resident slab for the head group; index_map is independent of
        # qi, so the HBM->VMEM DMA happens once per (b, head-group).
        pl.BlockSpec((1, S, G * D), lambda b, hg, qi: (b, 0, n_hg + hg)),
        pl.BlockSpec((1, S, G * D), lambda b, hg, qi: (b, 0, 2 * n_hg + hg)),
    ]
    operands += [qkv_flat, qkv_flat, qkv_flat]

    # Per-generation VMEM budget (v7x has 64 MiB vs 128 MiB on v5e/v6e).
    try:
        cap = int(pltpu.get_tpu_info().vmem_capacity_bytes)
    except Exception:
        cap = 64 * 1024 * 1024
    vmem_limit = max(48 * 1024 * 1024, min(int(0.9 * cap), 100 * 1024 * 1024))
    # TODO(synk): for very long S (resident double-buffered K/V > ~60% of VMEM) fall
    # back to streaming K/V through a kv grid axis instead of keeping them resident.

    kernel = partial(_flash_kernel, scale=scale, causal=causal, use_bias=use_bias,
                     heads_per_block=G, head_dim=D, block_q=bq, block_kv=bkv,
                     n_kv=n_kv, qk_dtype=qk_dtype, exp_dtype=exp_dtype,
                     approx_recip=approx_recip)

    out_flat = pl.pallas_call(
        kernel,
        out_shape=jax.ShapeDtypeStruct((B, S, H * D), qkv.dtype),
        grid_spec=pltpu.PrefetchScalarGridSpec(
            num_scalar_prefetch=0,
            grid=(B, n_hg, n_q),
            in_specs=in_specs,
            out_specs=pl.BlockSpec((1, bq, G * D), lambda b, hg, qi: (b, qi, hg)),
            scratch_shapes=[
                pltpu.VMEM((G, bq, _LANES), jnp.float32),  # running max (lane-replicated)
                pltpu.VMEM((G, bq, _LANES), jnp.float32),  # running denom
                pltpu.VMEM((G, bq, D), jnp.float32),       # output accumulator
            ],
        ),
        compiler_params=pltpu.CompilerParams(
            dimension_semantics=("parallel", "parallel", "parallel"),
            vmem_limit_bytes=vmem_limit,
        ),
    )(*operands)

    # TODO(synk): varlen path (cu_seqlens/max_seqlen) and training-mode attention
    # dropout are not implemented; this is the dense, dropout_p=0 forward.
    return out_flat.reshape(B, S, H, D)


def _reference(qkv, key_padding_mask=None, causal=False, softmax_scale=None):
    qkv = qkv.astype(jnp.float32)
    B, S, _, H, D = qkv.shape
    scale = softmax_scale if softmax_scale is not None else 1.0 / math.sqrt(D)
    q, k, v = qkv[:, :, 0], qkv[:, :, 1], qkv[:, :, 2]
    scores = jnp.einsum('bthd,bshd->bhts', q * scale, k,
                        precision=lax.Precision.HIGHEST)
    if key_padding_mask is not None:
        bias = jnp.where(key_padding_mask, 0.0, -10000.0)
        scores = scores + bias[:, None, None, :]
    if causal:
        keep = jnp.tril(jnp.ones((S, S), dtype=bool))
        scores = jnp.where(keep[None, None], scores, _MASK_VALUE)
    attn = jax.nn.softmax(scores, axis=-1)
    return jnp.einsum('bhts,bshd->bthd', attn, v, precision=lax.Precision.HIGHEST)


if __name__ == "__main__":
    key = jax.random.PRNGKey(0)
    B, S, H, D = 2, 256, 2, 64          # head_dim=64 -> 2 heads packed per grid step
    qkv = jax.random.normal(key, (B, S, 3, H, D), dtype=jnp.float32)
    key_padding_mask = jnp.arange(S)[None, :] < jnp.array([200, 256])[:, None]

    # 1) Strict fp32 path (qk_dtype=float32 -> exact exp / exact reciprocal): validates
    #    the online softmax, resident-KV slicing and causal loop bounds at 1e-4.
    out = flash_self_attention(qkv, key_padding_mask, causal=False,
                               block_q=128, block_kv=128, qk_dtype=jnp.float32)
    out = jax.block_until_ready(out)
    ref = _reference(qkv, key_padding_mask, causal=False)
    assert out.shape == (B, S, H, D)
    err = float(jnp.max(jnp.abs(out - ref)))
    assert err < 1e-4, err

    out_c = flash_self_attention(qkv, causal=True, block_q=128, block_kv=128,
                                 qk_dtype=jnp.float32)
    out_c = jax.block_until_ready(out_c)
    ref_c = _reference(qkv, causal=True)
    err = float(jnp.max(jnp.abs(out_c - ref_c)))
    assert err < 1e-4, err

    # 2) bf16 fast path (the dtype the PyTorch module actually accepts): bf16 MXU,
    #    bf16 exponentials on v6e/v7x, approx reciprocal, default (large) tiles.
    qkv_bf16 = qkv.astype(jnp.bfloat16)
    out_b = flash_self_attention(qkv_bf16, causal=True)
    out_b = jax.block_until_ready(out_b)
    ref_b = _reference(qkv_bf16, causal=True)
    err = float(jnp.max(jnp.abs(out_b.astype(jnp.float32) - ref_b)))
    assert err < 3e-2, err

    out_bp = flash_self_attention(qkv_bf16, key_padding_mask, causal=False)
    out_bp = jax.block_until_ready(out_bp)
    ref_bp = _reference(qkv_bf16, key_padding_mask, causal=False)
    err = float(jnp.max(jnp.abs(out_bp.astype(jnp.float32) - ref_bp)))
    assert err < 3e-2, err

    print("KERNEL_OK")
</pallas_src>

<mosaic_0001>
module attributes {stable_mosaic.version = 11 : i64} {
  func.func @_flash_kernel(%arg0: i32, %arg1: i32, %arg2: i32, %arg3: memref<1x1x256xf32, #tpu.memory_space<vmem>>, %arg4: memref<1x128x128xf32, #tpu.memory_space<vmem>>, %arg5: memref<1x256x128xf32, #tpu.memory_space<vmem>>, %arg6: memref<1x256x128xf32, #tpu.memory_space<vmem>>, %arg7: memref<1x128x128xf32, #tpu.memory_space<vmem>>, %arg8: memref<2x128x128xf32, #tpu.memory_space<vmem>>, %arg9: memref<2x128x128xf32, #tpu.memory_space<vmem>>, %arg10: memref<2x128x64xf32, #tpu.memory_space<vmem>>) attributes {dimension_semantics = [#tpu.dimension_semantics<parallel>, #tpu.dimension_semantics<parallel>, #tpu.dimension_semantics<parallel>], iteration_bounds = array<i64: 2, 1, 2>, scalar_prefetch = 0 : i64, scratch_operands = 3 : i64, tpu.core_type = #tpu.core_type<tc>, window_params = [{transform_indices = @transform_0, window_bounds = array<i64: 1, 1, 256>}, {transform_indices = @transform_1, window_bounds = array<i64: 1, 128, 128>}, {transform_indices = @transform_2, window_bounds = array<i64: 1, 256, 128>}, {transform_indices = @transform_3, window_bounds = array<i64: 1, 256, 128>}, {transform_indices = @transform_4, window_bounds = array<i64: 1, 128, 128>}]} {
    %cst = arith.constant -2.38197633E+38 : f32
    %0 = vector.broadcast %cst : f32 to vector<2x128x128xf32>
    %c0 = arith.constant 0 : index
    %c0_0 = arith.constant 0 : index
    %c0_1 = arith.constant 0 : index
    %1 = vector.load %arg8[%c0, %c0_0, %c0_1] : memref<2x128x128xf32, #tpu.memory_space<vmem>>, vector<2x128x128xf32>
    tpu.vector_store %arg8[%c0, %c0_0, %c0_1], %0 {strides = array<i32>} : memref<2x128x128xf32, #tpu.memory_space<vmem>>, vector<2x128x128xf32>,
    %cst_2 = arith.constant 0.000000e+00 : f32
    %2 = vector.broadcast %cst_2 : f32 to vector<2x128x128xf32>
    %c0_3 = arith.constant 0 : index
    %c0_4 = arith.constant 0 : index
    %c0_5 = arith.constant 0 : index
    %3 = vector.load %arg9[%c0_3, %c0_4, %c0_5] : memref<2x128x128xf32, #tpu.memory_space<vmem>>, vector<2x128x128xf32>
    tpu.vector_store %arg9[%c0_3, %c0_4, %c0_5], %2 {strides = array<i32>} : memref<2x128x128xf32, #tpu.memory_space<vmem>>, vector<2x128x128xf32>,
    %cst_6 = arith.constant 0.000000e+00 : f32
    %4 = vector.broadcast %cst_6 : f32 to vector<2x128x64xf32>
    %c0_7 = arith.constant 0 : index
    %c0_8 = arith.constant 0 : index
    %c0_9 = arith.constant 0 : index
    %5 = vector.load %arg10[%c0_7, %c0_8, %c0_9] : memref<2x128x64xf32, #tpu.memory_space<vmem>>, vector<2x128x64xf32>
    tpu.vector_store %arg10[%c0_7, %c0_8, %c0_9], %4 {strides = array<i32>} : memref<2x128x64xf32, #tpu.memory_space<vmem>>, vector<2x128x64xf32>,
    %c0_10 = arith.constant 0 : index
    %c0_11 = arith.constant 0 : index
    %c0_12 = arith.constant 0 : index
    %6 = vector.load %arg4[%c0_10, %c0_11, %c0_12] : memref<1x128x128xf32, #tpu.memory_space<vmem>>, vector<1x128x64xf32>
    %7 = vector.shape_cast %6 : vector<1x128x64xf32> to vector<128x64xf32>
    %cst_13 = arith.constant 1.250000e-01 : f32
    %8 = vector.broadcast %cst_13 : f32 to vector<128x64xf32>
    %9 = arith.mulf %7, %8 : vector<128x64xf32>
    %c0_14 = arith.constant 0 : index
    %c0_15 = arith.constant 0 : index
    %c64 = arith.constant 64 : index
    %10 = vector.load %arg4[%c0_14, %c0_15, %c64] : memref<1x128x128xf32, #tpu.memory_space<vmem>>, vector<1x128x64xf32>
    %11 = vector.shape_cast %10 : vector<1x128x64xf32> to vector<128x64xf32>
    %cst_16 = arith.constant 1.250000e-01 : f32
    %12 = vector.broadcast %cst_16 : f32 to vector<128x64xf32>
    %13 = arith.mulf %11, %12 : vector<128x64xf32>
    %c0_i32 = arith.constant 0 : i32
    %c2_i32 = arith.constant 2 : i32
    %14 = arith.addi %c0_i32, %c2_i32 : i32
    %c1_i32 = arith.constant 1 : i32
    scf.for %arg11 = %c0_i32 to %14 step %c1_i32  : i32 {
      %c1_i32_32 = arith.constant 1 : i32
      %33 = arith.muli %arg11, %c1_i32_32 : i32
      %c0_i32_33 = arith.constant 0 : i32
      %34 = arith.addi %c0_i32_33, %33 : i32
      %c128_i32 = arith.constant 128 : i32
      %35 = arith.muli %34, %c128_i32 : i32
      %36 = tpu.assume_multiple %35, 128 : i32
      %c0_34 = arith.constant 0 : index
      %37 = arith.index_cast %36 : i32 to index
      %c0_35 = arith.constant 0 : index
      %38 = vector.load %arg5[%c0_34, %37, %c0_35] : memref<1x256x128xf32, #tpu.memory_space<vmem>>, vector<1x128x128xf32>
      %39 = vector.shape_cast %38 : vector<1x128x128xf32> to vector<128x128xf32>
      %c0_36 = arith.constant 0 : index
      %40 = arith.index_cast %36 : i32 to index
      %c0_37 = arith.constant 0 : index
      %41 = vector.load %arg6[%c0_36, %40, %c0_37] : memref<1x256x128xf32, #tpu.memory_space<vmem>>, vector<1x128x128xf32>
      %42 = vector.shape_cast %41 : vector<1x128x128xf32> to vector<128x128xf32>
      %c0_38 = arith.constant 0 : index
      %c0_39 = arith.constant 0 : index
      %43 = arith.index_cast %36 : i32 to index
      %44 = vector.load %arg3[%c0_38, %c0_39, %43] : memref<1x1x256xf32, #tpu.memory_space<vmem>>, vector<1x1x128xf32>
      %45 = vector.shape_cast %44 : vector<1x1x128xf32> to vector<1x128xf32>
      %46 = vector.extract_strided_slice %39 {offsets = [0, 0], sizes = [128, 64], strides = [1, 1]} : vector<128x128xf32> to vector<128x64xf32>
      %47 = vector.extract_strided_slice %42 {offsets = [0, 0], sizes = [128, 64], strides = [1, 1]} : vector<128x128xf32> to vector<128x64xf32>
      %cst_40 = arith.constant dense<0.000000e+00> : vector<128x128xf32>
      %48 = tpu.matmul %9, %46, %cst_40 {dimension_numbers = #tpu.dot_dimension_numbers<[1], [1], [0], [0], [0, 0, 1, 0], [], []>} : vector<128x64xf32>, vector<128x64xf32>, vector<128x128xf32> -> vector<128x128xf32>
      %49 = vector.broadcast %45 : vector<1x128xf32> to vector<128x128xf32>
      %50 = arith.addf %48, %49 : vector<128x128xf32>
      %c0_41 = arith.constant 0 : index
      %c0_42 = arith.constant 0 : index
      %c0_43 = arith.constant 0 : index
      %51 = vector.load %arg8[%c0_41, %c0_42, %c0_43] : memref<2x128x128xf32, #tpu.memory_space<vmem>>, vector<1x128x128xf32>
      %52 = vector.shape_cast %51 : vector<1x128x128xf32> to vector<128x128xf32>
      %c0_44 = arith.constant 0 : index
      %c0_45 = arith.constant 0 : index
      %c0_46 = arith.constant 0 : index
      %53 = vector.load %arg9[%c0_44, %c0_45, %c0_46] : memref<2x128x128xf32, #tpu.memory_space<vmem>>, vector<1x128x128xf32>
      %54 = vector.shape_cast %53 : vector<1x128x128xf32> to vector<128x128xf32>
      %cst_47 = arith.constant dense<0xFF800000> : vector<128xf32>
      %55 = vector.multi_reduction <maximumf>, %50, %cst_47 [1] : vector<128x128xf32> to vector<128xf32>
      %56 = vector.shape_cast %55 : vector<128xf32> to vector<128x1xf32>
      %57 = vector.broadcast %56 : vector<128x1xf32> to vector<128x128xf32>
      %58 = arith.maximumf %52, %57 : vector<128x128xf32>
      %59 = arith.subf %52, %58 : vector<128x128xf32>
      %60 = math.exp %59 : vector<128x128xf32>
      %61 = vector.extract_strided_slice %58 {offsets = [0, 0], sizes = [128, 1], strides = [1, 1]} : vector<128x128xf32> to vector<128x1xf32>
      %62 = vector.broadcast %61 : vector<128x1xf32> to vector<128x128xf32>
      %63 = arith.subf %50, %62 : vector<128x128xf32>
      %64 = math.exp %63 : vector<128x128xf32>
      %65 = arith.mulf %60, %54 : vector<128x128xf32>
      %cst_48 = arith.constant dense<0.000000e+00> : vector<128xf32>
      %66 = vector.multi_reduction <add>, %64, %cst_48 [1] : vector<128x128xf32> to vector<128xf32>
      %67 = vector.shape_cast %66 : vector<128xf32> to vector<128x1xf32>
      %68 = vector.broadcast %67 : vector<128x1xf32> to vector<128x128xf32>
      %69 = arith.addf %65, %68 : vector<128x128xf32>
      %c0_49 = arith.constant 0 : index
      %c0_50 = arith.constant 0 : index
      %c0_51 = arith.constant 0 : index
      %70 = vector.load %arg9[%c0_49, %c0_50, %c0_51] : memref<2x128x128xf32, #tpu.memory_space<vmem>>, vector<1x128x128xf32>
      %71 = vector.shape_cast %70 : vector<1x128x128xf32> to vector<128x128xf32>
      %72 = vector.shape_cast %69 : vector<128x128xf32> to vector<1x128x128xf32>
      tpu.vector_store %arg9[%c0_49, %c0_50, %c0_51], %72 {strides = array<i32>} : memref<2x128x128xf32, #tpu.memory_space<vmem>>, vector<1x128x128xf32>,
      %c0_52 = arith.constant 0 : index
      %c0_53 = arith.constant 0 : index
      %c0_54 = arith.constant 0 : index
      %73 = vector.load %arg8[%c0_52, %c0_53, %c0_54] : memref<2x128x128xf32, #tpu.memory_space<vmem>>, vector<1x128x128xf32>
      %74 = vector.shape_cast %73 : vector<1x128x128xf32> to vector<128x128xf32>
      %75 = vector.shape_cast %58 : vector<128x128xf32> to vector<1x128x128xf32>
      tpu.vector_store %arg8[%c0_52, %c0_53, %c0_54], %75 {strides = array<i32>} : memref<2x128x128xf32, #tpu.memory_space<vmem>>, vector<1x128x128xf32>,
      %cst_55 = arith.constant dense<0.000000e+00> : vector<128x64xf32>
      %76 = tpu.matmul %64, %47, %cst_55 {dimension_numbers = #tpu.dot_dimension_numbers<[1], [0], [0], [1], [0, 0, 1, 1], [], []>} : vector<128x128xf32>, vector<128x64xf32>, vector<128x64xf32> -> vector<128x64xf32>
      %77 = vector.extract_strided_slice %60 {offsets = [0, 0], sizes = [128, 64], strides = [1, 1]} : vector<128x128xf32> to vector<128x64xf32>
      %c0_56 = arith.constant 0 : index
      %c0_57 = arith.constant 0 : index
      %c0_58 = arith.constant 0 : index
      %78 = vector.load %arg10[%c0_56, %c0_57, %c0_58] : memref<2x128x64xf32, #tpu.memory_space<vmem>>, vector<1x128x64xf32>
      %79 = vector.shape_cast %78 : vector<1x128x64xf32> to vector<128x64xf32>
      %80 = arith.mulf %79, %77 : vector<128x64xf32>
      %81 = arith.addf %80, %76 : vector<128x64xf32>
      %c0_59 = arith.constant 0 : index
      %c0_60 = arith.constant 0 : index
      %c0_61 = arith.constant 0 : index
      %82 = vector.load %arg10[%c0_59, %c0_60, %c0_61] : memref<2x128x64xf32, #tpu.memory_space<vmem>>, vector<1x128x64xf32>
      %83 = vector.shape_cast %82 : vector<1x128x64xf32> to vector<128x64xf32>
      %84 = vector.shape_cast %81 : vector<128x64xf32> to vector<1x128x64xf32>
      tpu.vector_store %arg10[%c0_59, %c0_60, %c0_61], %84 {strides = array<i32>} : memref<2x128x64xf32, #tpu.memory_space<vmem>>, vector<1x128x64xf32>,
      %85 = vector.extract_strided_slice %39 {offsets = [0, 64], sizes = [128, 64], strides = [1, 1]} : vector<128x128xf32> to vector<128x64xf32>
      %86 = vector.extract_strided_slice %42 {offsets = [0, 64], sizes = [128, 64], strides = [1, 1]} : vector<128x128xf32> to vector<128x64xf32>
      %cst_62 = arith.constant dense<0.000000e+00> : vector<128x128xf32>
      %87 = tpu.matmul %13, %85, %cst_62 {dimension_numbers = #tpu.dot_dimension_numbers<[1], [1], [0], [0], [0, 0, 1, 0], [], []>} : vector<128x64xf32>, vector<128x64xf32>, vector<128x128xf32> -> vector<128x128xf32>
      %88 = vector.broadcast %45 : vector<1x128xf32> to vector<128x128xf32>
      %89 = arith.addf %87, %88 : vector<128x128xf32>
      %c1_63 = arith.constant 1 : index
      %c0_64 = arith.constant 0 : index
      %c0_65 = arith.constant 0 : index
      %90 = vector.load %arg8[%c1_63, %c0_64, %c0_65] : memref<2x128x128xf32, #tpu.memory_space<vmem>>, vector<1x128x128xf32>
      %91 = vector.shape_cast %90 : vector<1x128x128xf32> to vector<128x128xf32>
      %c1_66 = arith.constant 1 : index
      %c0_67 = arith.constant 0 : index
      %c0_68 = arith.constant 0 : index
      %92 = vector.load %arg9[%c1_66, %c0_67, %c0_68] : memref<2x128x128xf32, #tpu.memory_space<vmem>>, vector<1x128x128xf32>
      %93 = vector.shape_cast %92 : vector<1x128x128xf32> to vector<128x128xf32>
      %cst_69 = arith.constant dense<0xFF800000> : vector<128xf32>
      %94 = vector.multi_reduction <maximumf>, %89, %cst_69 [1] : vector<128x128xf32> to vector<128xf32>
      %95 = vector.shape_cast %94 : vector<128xf32> to vector<128x1xf32>
      %96 = vector.broadcast %95 : vector<128x1xf32> to vector<128x128xf32>
      %97 = arith.maximumf %91, %96 : vector<128x128xf32>
      %98 = arith.subf %91, %97 : vector<128x128xf32>
      %99 = math.exp %98 : vector<128x128xf32>
      %100 = vector.extract_strided_slice %97 {offsets = [0, 0], sizes = [128, 1], strides = [1, 1]} : vector<128x128xf32> to vector<128x1xf32>
      %101 = vector.broadcast %100 : vector<128x1xf32> to vector<128x128xf32>
      %102 = arith.subf %89, %101 : vector<128x128xf32>
      %103 = math.exp %102 : vector<128x128xf32>
      %104 = arith.mulf %99, %93 : vector<128x128xf32>
      %cst_70 = arith.constant dense<0.000000e+00> : vector<128xf32>
      %105 = vector.multi_reduction <add>, %103, %cst_70 [1] : vector<128x128xf32> to vector<128xf32>
      %106 = vector.shape_cast %105 : vector<128xf32> to vector<128x1xf32>
      %107 = vector.broadcast %106 : vector<128x1xf32> to vector<128x128xf32>
      %108 = arith.addf %104, %107 : vector<128x128xf32>
      %c1_71 = arith.constant 1 : index
      %c0_72 = arith.constant 0 : index
      %c0_73 = arith.constant 0 : index
      %109 = vector.load %arg9[%c1_71, %c0_72, %c0_73] : memref<2x128x128xf32, #tpu.memory_space<vmem>>, vector<1x128x128xf32>
      %110 = vector.shape_cast %109 : vector<1x128x128xf32> to vector<128x128xf32>
      %111 = vector.shape_cast %108 : vector<128x128xf32> to vector<1x128x128xf32>
      tpu.vector_store %arg9[%c1_71, %c0_72, %c0_73], %111 {strides = array<i32>} : memref<2x128x128xf32, #tpu.memory_space<vmem>>, vector<1x128x128xf32>,
      %c1_74 = arith.constant 1 : index
      %c0_75 = arith.constant 0 : index
      %c0_76 = arith.constant 0 : index
      %112 = vector.load %arg8[%c1_74, %c0_75, %c0_76] : memref<2x128x128xf32, #tpu.memory_space<vmem>>, vector<1x128x128xf32>
      %113 = vector.shape_cast %112 : vector<1x128x128xf32> to vector<128x128xf32>
      %114 = vector.shape_cast %97 : vector<128x128xf32> to vector<1x128x128xf32>
      tpu.vector_store %arg8[%c1_74, %c0_75, %c0_76], %114 {strides = array<i32>} : memref<2x128x128xf32, #tpu.memory_space<vmem>>, vector<1x128x128xf32>,
      %cst_77 = arith.constant dense<0.000000e+00> : vector<128x64xf32>
      %115 = tpu.matmul %103, %86, %cst_77 {dimension_numbers = #tpu.dot_dimension_numbers<[1], [0], [0], [1], [0, 0, 1, 1], [], []>} : vector<128x128xf32>, vector<128x64xf32>, vector<128x64xf32> -> vector<128x64xf32>
      %116 = vector.extract_strided_slice %99 {offsets = [0, 0], sizes = [128, 64], strides = [1, 1]} : vector<128x128xf32> to vector<128x64xf32>
      %c1_78 = arith.constant 1 : index
      %c0_79 = arith.constant 0 : index
      %c0_80 = arith.constant 0 : index
      %117 = vector.load %arg10[%c1_78, %c0_79, %c0_80] : memref<2x128x64xf32, #tpu.memory_space<vmem>>, vector<1x128x64xf32>
      %118 = vector.shape_cast %117 : vector<1x128x64xf32> to vector<128x64xf32>
      %119 = arith.mulf %118, %116 : vector<128x64xf32>
      %120 = arith.addf %119, %115 : vector<128x64xf32>
      %c1_81 = arith.constant 1 : index
      %c0_82 = arith.constant 0 : index
      %c0_83 = arith.constant 0 : index
      %121 = vector.load %arg10[%c1_81, %c0_82, %c0_83] : memref<2x128x64xf32, #tpu.memory_space<vmem>>, vector<1x128x64xf32>
      %122 = vector.shape_cast %121 : vector<1x128x64xf32> to vector<128x64xf32>
      %123 = vector.shape_cast %120 : vector<128x64xf32> to vector<1x128x64xf32>
      tpu.vector_store %arg10[%c1_81, %c0_82, %c0_83], %123 {strides = array<i32>} : memref<2x128x64xf32, #tpu.memory_space<vmem>>, vector<1x128x64xf32>,
    }
    %c2_i32_17 = arith.constant 2 : i32
    %c0_18 = arith.constant 0 : index
    %c0_19 = arith.constant 0 : index
    %c0_20 = arith.constant 0 : index
    %15 = vector.load %arg9[%c0_18, %c0_19, %c0_20] : memref<2x128x128xf32, #tpu.memory_space<vmem>>, vector<1x128x128xf32>
    %16 = vector.shape_cast %15 : vector<1x128x128xf32> to vector<128x128xf32>
    %17 = vector.extract_strided_slice %16 {offsets = [0, 0], sizes = [128, 64], strides = [1, 1]} : vector<128x128xf32> to vector<128x64xf32>
    %18 = tpu.reciprocal %17 : vector<128x64xf32> -> vector<128x64xf32>
    %c0_21 = arith.constant 0 : index
    %c0_22 = arith.constant 0 : index
    %c0_23 = arith.constant 0 : index
    %19 = vector.load %arg10[%c0_21, %c0_22, %c0_23] : memref<2x128x64xf32, #tpu.memory_space<vmem>>, vector<1x128x64xf32>
    %20 = vector.shape_cast %19 : vector<1x128x64xf32> to vector<128x64xf32>
    %21 = arith.mulf %20, %18 : vector<128x64xf32>
    %c1 = arith.constant 1 : index
    %c0_24 = arith.constant 0 : index
    %c0_25 = arith.constant 0 : index
    %22 = vector.load %arg9[%c1, %c0_24, %c0_25] : memref<2x128x128xf32, #tpu.memory_space<vmem>>, vector<1x128x128xf32>
    %23 = vector.shape_cast %22 : vector<1x128x128xf32> to vector<128x128xf32>
    %24 = vector.extract_strided_slice %23 {offsets = [0, 0], sizes = [128, 64], strides = [1, 1]} : vector<128x128xf32> to vector<128x64xf32>
    %25 = tpu.reciprocal %24 : vector<128x64xf32> -> vector<128x64xf32>
    %c1_26 = arith.constant 1 : index
    %c0_27 = arith.constant 0 : index
    %c0_28 = arith.constant 0 : index
    %26 = vector.load %arg10[%c1_26, %c0_27, %c0_28] : memref<2x128x64xf32, #tpu.memory_space<vmem>>, vector<1x128x64xf32>
    %27 = vector.shape_cast %26 : vector<1x128x64xf32> to vector<128x64xf32>
    %28 = arith.mulf %27, %25 : vector<128x64xf32>
    %29 = tpu.concatenate %21, %28 in 1 : vector<128x64xf32>, vector<128x64xf32> -> vector<128x128xf32>
    %c0_29 = arith.constant 0 : index
    %c0_30 = arith.constant 0 : index
    %c0_31 = arith.constant 0 : index
    %30 = vector.load %arg7[%c0_29, %c0_30, %c0_31] : memref<1x128x128xf32, #tpu.memory_space<vmem>>, vector<1x128x128xf32>
    %31 = vector.shape_cast %30 : vector<1x128x128xf32> to vector<128x128xf32>
    %32 = vector.shape_cast %29 : vector<128x128xf32> to vector<1x128x128xf32>
    tpu.vector_store %arg7[%c0_29, %c0_30, %c0_31], %32 {strides = array<i32>} : memref<1x128x128xf32, #tpu.memory_space<vmem>>, vector<1x128x128xf32>,
    return
  }
  func.func @transform_0(%arg0: i32, %arg1: i32, %arg2: i32) -> (i32, i32, i32) {
    %c0_i32 = arith.constant 0 : i32
    %c0_i32_0 = arith.constant 0 : i32
    %c0_i32_1 = arith.constant 0 : i32
    return %arg0, %c0_i32, %c0_i32_0 : i32, i32, i32
  }
  func.func @transform_1(%arg0: i32, %arg1: i32, %arg2: i32) -> (i32, i32, i32) {
    %c0_i32 = arith.constant 0 : i32
    return %arg0, %arg2, %arg1 : i32, i32, i32
  }
  func.func @transform_2(%arg0: i32, %arg1: i32, %arg2: i32) -> (i32, i32, i32) {
    %c1_i32 = arith.constant 1 : i32
    %0 = arith.addi %c1_i32, %arg1 : i32
    %c0_i32 = arith.constant 0 : i32
    %c0_i32_0 = arith.constant 0 : i32
    return %arg0, %c0_i32, %0 : i32, i32, i32
  }
  func.func @transform_3(%arg0: i32, %arg1: i32, %arg2: i32) -> (i32, i32, i32) {
    %c2_i32 = arith.constant 2 : i32
    %0 = arith.addi %c2_i32, %arg1 : i32
    %c0_i32 = arith.constant 0 : i32
    %c0_i32_0 = arith.constant 0 : i32
    return %arg0, %c0_i32, %0 : i32, i32, i32
  }
  func.func @transform_4(%arg0: i32, %arg1: i32, %arg2: i32) -> (i32, i32, i32) {
    %c0_i32 = arith.constant 0 : i32
    return %arg0, %arg2, %arg1 : i32, i32, i32
  }
}

</mosaic_0001>

<bundles_post_ra>
// kernel: tpu_custom_call.1
= control target key start
LH: loop header
LB: loop body
LE: loop exit
PB: predicated region body
PF: predicated region fallthrough
CT: control target
= control target key end

     0   :  { %s5694_s0 = inlined_call_operand.hbm [shape: f32[2,1,256], index: 0, kind: input, shape index: {}]   ;;  %s5695_s1 = inlined_call_operand.hbm [shape: f32[2,256,384], index: 1, kind: input, shape index: {}]   ;;  %s5696_s2 = inlined_call_operand.hbm [shape: f32[2,256,384], index: 2, kind: input, shape index: {}]   ;;  %s5697_s3 = inlined_call_operand.hbm [shape: f32[2,256,384], index: 3, kind: input, shape index: {}]   ;;  %s5698_s4 = inlined_call_operand.hbm [shape: f32[2,256,128], index: 4, kind: output, shape index: {}]  }
   0x1   :  { %5792 = sst [smem:[#allocation80_spill]] %s5694_s0 }
   0x2   :  { %5793 = sst [smem:[#allocation81_spill]] %s5695_s1 }
   0x3   :  { %5794 = sst [smem:[#allocation82_spill]] %s5696_s2 }
   0x4   :  { %5795 = sst [smem:[#allocation83_spill]] %s5698_s4 }
   0x5   :  { %9 = vsyncpa [#allocation6], 0 }
   0x6   :  { %11 = vsyncpa [#allocation6 + $0x1], 0 }
   0x7   :  { %12 = vsyncpa [#allocation9], 0 }
   0x8   :  { %14 = vsyncpa [#allocation9 + $0x1], 0 }
   0x9   :  { %15 = vsyncpa [#allocation12], 0 }
   0xa   :  { %17 = vsyncpa [#allocation12 + $0x1], 0 }
   0xb   :  { %18 = vsyncpa [#allocation7], 0 }
   0xc   :  { %20 = vsyncpa [#allocation7 + $0x1], 0  ;;  %s4012_s15 = smov 0   ;;  %s4014_s16 = smov 0  }
   0xd   :  { %s4016_s17 = smov 0   ;;  %s4018_s18 = smov 0  }
   0xe   :  { %s4020_s19 = smov 0   ;;  %s4022_s20 = smov 0  }
   0xf   :  { %s4024_s21 = smov 0   ;;  %s4026_s22 = smov 0  }
  0x10   :  { %s4028_s23 = smov 0   ;;  %s4030_s24 = smov 0  }
  0x11   :  { %s4032_s25 = smov 0  }
  0x12 LB: > { %5796 = sst [smem:[#allocation19_spill]] %s3926_s15  ;;  %s38_s26 = sadd.s32 1, %s3958_s23  ;;  %s3966_s25 = sphi %s4032_s25, %s26_s25   ;;  %s3962_s24 = sphi %s4030_s24, %s6024_s24   ;;  %s3958_s23 = sphi %s4028_s23, %s6023_s23   ;;  %s3954_s22 = sphi %s4026_s22, %s6022_s22   ;;  %s3950_s21 = sphi %s4024_s21, %s6021_s21   ;;  %s3946_s20 = sphi %s4022_s20, %s6020_s20   ;;  %s3942_s19 = sphi %s4020_s19, %s6028_s19   ;;  %s3938_s18 = sphi %s4018_s18, %s6027_s18   ;;  %s3934_s17 = sphi %s4016_s17, %s6018_s17   ;;  %s3930_s16 = sphi %s4014_s16, %s6026_s16   ;;  %s3926_s15 = sphi %s4012_s15, %s6025_s15  }
  0x13   : > { %5797 = sst [smem:[#allocation20_spill]] %s3934_s17  ;;  %s45_s27 = sadd.s32 1, %s3962_s24 }
  0x14   : > { %5798 = sst [smem:[#allocation21_spill]] %s3946_s20  ;;  %p39_p0 = scmp.ge.s32.totalorder %s38_s26, 2 }
  0x15   : > { %5799 = sst [smem:[#allocation22_spill]] %s3954_s22  ;;  %p5704_p1 = scmp.eq.s32.totalorder %s3966_s25, 0 }
  0x16   : > { %5800 = sst [smem:[#allocation23_spill]] %s3958_s23  ;;  %s82_s28 = sadd.s32 1, %s3934_s17 }
  0x17   : > { %5801 = sst [smem:[#allocation24_spill]] %s3962_s24  ;;  %p5703_p2 = scmp.ne.s32.totalorder %s3934_s17, %s3930_s16 }
  0x18   : > { %s6030_s26 = smov (%p39_p0, %s38_s26), 0  ;;  %s6032_s27 = smov (!%p39_p0, %s45_s27), %s3962_s24 }
  0x19   : > { %5802 = sst [smem:[#allocation25_spill]] %s6030_s26  ;;  %s76_s29 = ssub.s32 %s3958_s23, %s6030_s26 }
  0x1a   : > { %p4083_p3 = por %p5703_p2, %p5704_p1  ;;  %p47_p4 = scmp.ge.s32.totalorder %s6032_s27, 2 }
  0x1b   : > { %p5702_p5 = scmp.lt.s32.totalorder %s3966_s25, 4  ;;  %s228_s5 = sand.u32 1, %s3966_s25  }
  0x1c   : > { %s6034_s27 = smov (%p47_p4, %s6032_s27), 0  ;;  %s230_s6 = sand.u32 1, %s3934_s17  }
  0x1d   : > { %5804 = sst [smem:[#allocation26_spill]] %s6034_s27  ;;  %s4094_s7 = ssub.s32 %s3962_s24, %s6034_s27 }
  0x1e   : > { %s2688_s8 = sshll.u32 %s230_s6, 7  ;;  %s77_s9 = sor.u32 %s76_s29, %s4094_s7 }
  0x1f   : > { %p80_p6 = scmp.eq.s32.totalorder %s77_s9, 0  ;;  %s3287_s10 = smul.u32 48, %s3958_s23 }
  0x20   : > { %s3288_s11 = smul.u32 96, %s3962_s24  ;;  %s232_s12 = scalar_lea.vmem [#allocation8], %s2688_s8 }
  0x21   : > { %s243_s13 = sshll.u32 %s232_s12, 4  ;;  %p4108_p7 = pnand %p5702_p5, %p4083_p3  ;;  %s4102_s13 = int_to_ptr.vmem [resolvable:$true] %s243_s13 }
  0x22   : > { %s4100_s14 = scalar_select %p80_p6, %s3934_s17, %s82_s28  }
  0x23   : > { %s240_s26 = sadd.s32 %s3288_s11, %s3287_s10  ;;  %s5807_s1 = sld [smem:[#allocation81_spill]] }
  0x24   : > { %5805 = sst [smem:[#allocation27_spill]] %s4100_s14  ;;  %s2691_s4 = sshll.u32 %s240_s26, 7 }
  0x25   : > { %p2696_p8 = scmp.ge.s32.totalorder %s3966_s25, 1  ;;  %s4118_s28 = scalar_lea.sflag [#allocation9], %s228_s5 }
  0x26   : > { %p3708_p10 = pneg %p4108_p7 }
  0x29   : > { %s4115_s29 = scalar_lea.hbm %s5807_s1, %s2691_s4  ;;  %s3711_s4 = scalar_lea.hbm %s5807_s1, 24576 }
  0x2a   : > { %s3706_s26 = scalar_lea.hbm %s4115_s29, 2048  ;;  %p3712_p13 = scmp.lt.u32.totalorder %s4115_s29, %s5807_s1 }
  0x2b   : > { %p3707_p9 = scmp.ne.s32.totalorder %s4115_s29, %s3706_s26  ;;  %p3713_p0 = scmp.lt.u32.totalorder %s3711_s4, %s3706_s26 }
  0x2c   : > { %p3715_p4 = scmp.lt.u32.totalorder %s3706_s26, %s4115_s29 }
  0x2d   : > { %p3709_p11 = pnand %p3708_p10, %p3707_p9  ;;  %p3714_p3 = por %p3713_p0, %p3712_p13 }
  0x2f   : > { %p3710_p12 = pneg %p3709_p11  ;;  %p3716_p6 = por %p3715_p4, %p3714_p3 }
  0x31   : > { %p3717_p5 = pnand %p3716_p6, %p3710_p12 }
  0x33   : > { %3720 = shalt.err (!%p3717_p5)
}
  0x34   : > { %s3721_s5 = scalar_lea.vmem %s4102_s13, 2048  ;;  %s3972_s10 = smov [#allocation8]  }
  0x35   : > { %p3722_p9 = scmp.ne.s32.totalorder %s4102_s13, %s3721_s5  ;;  %s3726_s11 = sshll.u32 %s3972_s10, 4  ;;  %s3727_s11 = int_to_ptr.vmem [resolvable:$false] %s3726_s11 }
  0x36   : > { %s3728_s12 = scalar_lea.vmem %s3727_s11, 4096  ;;  %p3729_p1 = scmp.lt.s32.totalorder %s4102_s13, %s3727_s11 }
  0x37   : > { %p3724_p11 = pnand %p3722_p9, %p3708_p10  ;;  %p3730_p13 = scmp.lt.s32.totalorder %s3728_s12, %s3721_s5 }
  0x39   : > { %p3725_p2 = pneg %p3724_p11  ;;  %p3731_p0 = por %p3730_p13, %p3729_p1 }
  0x3b   : > { %p3732_p3 = pnand %p3731_p0, %p3725_p2 }
  0x3d   : > { %3735 = shalt.err (!%p3732_p3)
}
  0x3e   : > { %s5705_s6 = smov 384   ;;  %s5707_s26 = smov 128  }
  0x3f   : > { %s5709_s27 = smov 8   ;;  %p297_p1 = scmp.lt.s32.totalorder %s3966_s25, 5 }
  0x40   : > { %3305 = dma.hbm_to_vmem [thread:$0]  (!%p4108_p7), %s4115_s29, 2048, %s4102_s13, %s4118_s28, %s5705_s6, %s5707_s26, %s5709_s27  }
  0x41   : > { %p4152_p2 = pnand %p2696_p8, %p297_p1  ;;  %s4157_s4 = sadd.s32 4294967295, %s3966_s25  }
  0x42   : > { %s2682_s8 = sadd.s32 4294967294, %s3966_s25   ;;  %p50_p5 = scmp.eq.s32.totalorder %s4094_s7, 0 }
  0x43   : > { %s5808_s30 = scalar_select %p4152_p2, 1, 0 }
  0x44   : > { %s52_s22 = sadd.s32 1, %s3946_s20  ;;  %p59_p10 = scmp.ne.s32.totalorder %s3946_s20, %s3942_s19 }
  0x45   : > { %p65_p12 = scmp.ne.s32.totalorder %s3942_s19, %s3938_s18  ;;  %p5810_p7 = scmp.eq.s32.totalorder %s3966_s25, 0 }
  0x46   : > { %s4167_s13 = scalar_select %p50_p5, %s3946_s20, %s52_s22  }
  0x47   : > { %p4171_p4 = por %p5810_p7, %p59_p10  ;;  %p66_p8 = scmp.eq.s32.totalorder %s4157_s4, 0 }
  0x48   : > { %5809 = sst [smem:[#allocation28_spill]] %s4167_s13  ;;  %p95_p6 = scmp.ne.s32.totalorder %s3930_s16, %s3926_s15 }
  0x49   : > { %p183_p9 = scmp.eq.s32.totalorder %s4157_s4, 3  ;;  %p4179_p11 = por %p66_p8, %p65_p12 }
  0x4a   : > { %p189_p13 = scmp.eq.s32.totalorder %s2682_s8, 3  ;;  %p4183_p0 = por %p95_p6, %p66_p8 }
  0x4b   : > { %s5812_s9 = scalar_select %p4179_p11, 1, 0 }
  0x4c   : > { %s5813_s7 = scalar_select %p4183_p0, 1, 0 }
  0x4d   : > { %p5814_p3 = scmp.ne.s32.totalorder %s3934_s17, %s3930_s16  ;;  %p4194_p5 = por %p189_p13, %p95_p6 }
  0x4e   : > { %s4199_s10 = sand.u32 1, %s3946_s20   ;;  %s2774_s12 = sshll.u32 %s3962_s24, 5 }
  0x4f   : > { %p4190_p1 = por %p183_p9, %p5814_p3  ;;  %s2685_s11 = sshll.u32 %s4199_s10, 1 }
  0x50   : > { %s5816_s5 = scalar_select %p4194_p5, 1, 0 }
  0x51   : > { %s5815_s18 = scalar_select %p4190_p1, 1, 0 }
  0x52   : > { %5817 = sst [smem:[#allocation29_spill]] %s5816_s5  ;;  %s5818_s0 = sld [smem:[#allocation80_spill]] }
  0x53   : > { %s213_s26 = scalar_lea.vmem [#allocation5], %s2685_s11  ;;  %p5819_p10 = scmp.lt.s32.totalorder %s3966_s25, 4 }
  0x54   : > { %s221_s27 = sshll.u32 %s213_s26, 4  ;;  %s210_s13 = scalar_lea.sflag [#allocation6], %s4199_s10  ;;  %s4208_s27 = int_to_ptr.vmem [resolvable:$true] %s221_s27 }
  0x55   : > { %p4214_p12 = pnand %p5819_p10, %p4171_p4 }
  0x57   : > { %p4224_p8 = pneg %p4214_p12 }
  0x58   : > { %s4206_s6 = scalar_lea.hbm %s5818_s0, %s2774_s12  ;;  %s3741_s11 = scalar_lea.hbm %s5818_s0, 64 }
  0x59   : > { %s3736_s8 = scalar_lea.hbm %s4206_s6, 32  ;;  %p3742_p4 = scmp.lt.u32.totalorder %s4206_s6, %s5818_s0 }
  0x5a   : > { %p3737_p7 = scmp.ne.s32.totalorder %s4206_s6, %s3736_s8  ;;  %p3743_p13 = scmp.lt.u32.totalorder %s3741_s11, %s3736_s8 }
  0x5b   : > { %p3745_p10 = scmp.lt.u32.totalorder %s3736_s8, %s4206_s6 }
  0x5c   : > { %p3739_p6 = pnand %p4224_p8, %p3737_p7  ;;  %p3744_p3 = por %p3743_p13, %p3742_p4 }
  0x5e   : > { %p3740_p9 = pneg %p3739_p6  ;;  %p3746_p5 = por %p3745_p10, %p3744_p3 }
  0x60   : > { %p3747_p1 = pnand %p3746_p5, %p3740_p9 }
  0x62   : > { %3750 = shalt.err (!%p3747_p1)
}
  0x63   : > { %s3751_s23 = scalar_lea.vmem %s4208_s27, 32  ;;  %s3976_s26 = smov [#allocation5]  }
  0x64   : > { %p3752_p7 = scmp.ne.s32.totalorder %s4208_s27, %s3751_s23  ;;  %s3756_s29 = sshll.u32 %s3976_s26, 4  ;;  %s3757_s29 = int_to_ptr.vmem [resolvable:$false] %s3756_s29 }
  0x65   : > { %s3758_s20 = scalar_lea.vmem %s3757_s29, 64  ;;  %p3759_p11 = scmp.lt.s32.totalorder %s4208_s27, %s3757_s29 }
  0x66   : > { %p3754_p6 = pnand %p3752_p7, %p4224_p8  ;;  %p3760_p2 = scmp.lt.s32.totalorder %s3758_s20, %s3751_s23 }
  0x68   : > { %p3755_p0 = pneg %p3754_p6  ;;  %p3761_p4 = por %p3760_p2, %p3759_p11 }
  0x6a   : > { %p3762_p13 = pnand %p3761_p4, %p3755_p0 }
  0x6c   : > { %3765 = shalt.err (!%p3762_p13)
}
  0x6d   : > { %3302 = dma.hbm_to_vmem [thread:$0]  (!%p4214_p12), %s4206_s6, 32, %s4208_s27, %s210_s13  }
  0x6e   : > { %s5822_s8 = sshll.u32 %s4199_s10, 8  ;;  %s2693_s0 = smul.u32 12288, %s3962_s24 }
  0x6f   : > { %s257_s11 = scalar_lea.vmem [#allocation10], %s5822_s8  ;;  %s5823_s2 = sld [smem:[#allocation82_spill]] }
  0x70   : > { %s266_s22 = sshll.u32 %s257_s11, 4  ;;  %s4258_s17 = scalar_lea.hbm %s5697_s3, %s2693_s0  ;;  %s4250_s22 = int_to_ptr.vmem [resolvable:$true] %s266_s22 }
  0x71   : > { %s4263_s6 = scalar_lea.hbm %s4258_s17, 256 }
  0x75   : > { %s2557_s23 = scalar_lea.hbm %s5823_s2, %s2693_s0  ;;  %s3771_s11 = scalar_lea.hbm %s5823_s2, 24576 }
  0x76   : > { %s4260_s5 = scalar_lea.hbm %s2557_s23, 128  ;;  %s3796_s27 = scalar_lea.hbm %s2557_s23, 4224 }
  0x77   : > { %p3767_p2 = scmp.ne.s32.totalorder %s4260_s5, %s3796_s27  ;;  %p3772_p1 = scmp.lt.u32.totalorder %s4260_s5, %s5823_s2 }
  0x78   : > { %p3773_p5 = scmp.lt.u32.totalorder %s3771_s11, %s3796_s27  ;;  %p3775_p3 = scmp.lt.u32.totalorder %s3796_s27, %s4260_s5 }
  0x79   : > { %p3769_p11 = pnand %p3767_p2, %p4224_p8 }
  0x7a   : > { %p3774_p9 = por %p3773_p5, %p3772_p1 }
  0x7b   : > { %p3770_p0 = pneg %p3769_p11 }
  0x7c   : > { %p3776_p10 = por %p3775_p3, %p3774_p9 }
  0x7e   : > { %p3777_p7 = pnand %p3776_p10, %p3770_p0 }
  0x80   : > { %3780 = shalt.err (!%p3777_p7)
}
  0x81   : > { %s3781_s26 = scalar_lea.vmem %s4250_s22, 4096  ;;  %s3977_s29 = smov [#allocation10]  }
  0x82   : > { %p3782_p6 = scmp.ne.s32.totalorder %s4250_s22, %s3781_s26  ;;  %s3786_s23 = sshll.u32 %s3977_s29, 4  ;;  %s3787_s23 = int_to_ptr.vmem [resolvable:$false] %s3786_s23 }
  0x83   : > { %s3788_s20 = scalar_lea.vmem %s3787_s23, 8192  ;;  %p3789_p2 = scmp.lt.s32.totalorder %s4250_s22, %s3787_s23 }
  0x84   : > { %p3784_p4 = pnand %p3782_p6, %p4224_p8  ;;  %p3790_p11 = scmp.lt.s32.totalorder %s3788_s20, %s3781_s26 }
  0x86   : > { %p3785_p13 = pneg %p3784_p4  ;;  %p3791_p1 = por %p3790_p11, %p3789_p2 }
  0x88   : > { %p3792_p5 = pnand %p3791_p1, %p3785_p13 }
  0x8a   : > { %3795 = shalt.err (!%p3792_p5)
}
  0x8b   : > { %s5824_s27 = smov 8   ;;  %s5825_s13 = smov 128  }
  0x8c   : > { %s5826_s8 = smov 384   ;;  %s5827_s11 = sshll.u32 %s4199_s10, 8 }
  0x8d   : > { %3308 = dma.hbm_to_vmem [thread:$0]  (!%p4214_p12), %s4260_s5, 4096, %s4250_s22, %s4118_s28, %s5826_s8, %s5825_s13, %s5824_s27  }
  0x8e   : > { %s280_s14 = scalar_lea.vmem [#allocation11], %s5827_s11  ;;  %s277_s26 = scalar_lea.sflag [#allocation12], %s4199_s10 }
  0x8f   : > { %s289_s0 = sshll.u32 %s280_s14, 4  ;;  %s3827_s29 = scalar_lea.hbm %s4258_s17, 4352  ;;  %s4291_s0 = int_to_ptr.vmem [resolvable:$true] %s289_s0 }
  0x90   : > { %p3798_p0 = scmp.ne.s32.totalorder %s4263_s6, %s3827_s29  ;;  %s3802_s2 = scalar_lea.hbm %s5697_s3, 24576 }
  0x91   : > { %p3803_p10 = scmp.lt.u32.totalorder %s4263_s6, %s5697_s3  ;;  %p3804_p7 = scmp.lt.u32.totalorder %s3802_s2, %s3827_s29 }
  0x92   : > { %p3800_p9 = pnand %p3798_p0, %p4224_p8  ;;  %p3806_p4 = scmp.lt.u32.totalorder %s3827_s29, %s4263_s6 }
  0x93   : > { %p3805_p6 = por %p3804_p7, %p3803_p10 }
  0x94   : > { %p3801_p3 = pneg %p3800_p9 }
  0x95   : > { %p3807_p13 = por %p3806_p4, %p3805_p6 }
  0x97   : > { %p3808_p2 = pnand %p3807_p13, %p3801_p3 }
  0x99   : > { %3811 = shalt.err (!%p3808_p2)
}
  0x9a   : > { %s3812_s17 = scalar_lea.vmem %s4291_s0, 4096  ;;  %s3978_s28 = smov [#allocation11]  }
  0x9b   : > { %p3813_p11 = scmp.ne.s32.totalorder %s4291_s0, %s3812_s17  ;;  %s3817_s5 = sshll.u32 %s3978_s28, 4  ;;  %s3818_s5 = int_to_ptr.vmem [resolvable:$false] %s3817_s5 }
  0x9c   : > { %s3819_s15 = scalar_lea.vmem %s3818_s5, 8192  ;;  %p3820_p0 = scmp.lt.s32.totalorder %s4291_s0, %s3818_s5 }
  0x9d   : > { %p3815_p1 = pnand %p3813_p11, %p4224_p8  ;;  %p3821_p9 = scmp.lt.s32.totalorder %s3819_s15, %s3812_s17 }
  0x9f   : > { %p3816_p5 = pneg %p3815_p1  ;;  %p3822_p10 = por %p3821_p9, %p3820_p0 }
  0xa1   : > { %p3823_p7 = pnand %p3822_p10, %p3816_p5 }
  0xa3   : > { %3826 = shalt.err (!%p3823_p7)
}
  0xa4   : > { %3311 = dma.hbm_to_vmem [thread:$0]  (!%p4214_p12), %s4263_s6, 4096, %s4291_s0, %s277_s26, %s5826_s8, %s5825_s13, %s5824_s27  }
  0xa5   : > { %p5828_p8 = scmp.ne.s32.totalorder %s5808_s30, 0 }
  0xa7   : > { %301 = sbr.rel (%p5828_p8) target bundleno = 1794 (0x702), region = 36 }
  0xae   : > { %s303_s2 = sand.u32 1, %s3942_s19   ;;  %p5829_p3 = scmp.ne.s32.totalorder %s5812_s9, 0 }
  0xaf   : > { %s2697_s24 = sshll.u32 %s303_s2, 1  ;;  %s304_s12 = scalar_lea.sflag [#allocation6], %s303_s2 }
  0xb0   : > { %s4323_s22 = scalar_lea.vmem [#allocation5], %s2697_s24 }
  0xb1   : > { %3905 = dma.done.wait (%p5829_p3), %s304_s12, 32  }
  0xb2   : > { %3907 = vsyncadd (%p5829_p3), %s304_s12, 4294967264  ;;  %s312_s1 = sand.u32 1, %s4157_s4   ;;  %s314_s10 = sand.u32 1, %s3930_s16  }
  0xb3   : > { %s4333_s30 = sshll.u32 %s314_s10, 7  ;;  %s313_s6 = scalar_lea.sflag [#allocation9], %s312_s1 }
  0xb4   : > { %s4336_s27 = scalar_lea.vmem [#allocation8], %s4333_s30  ;;  %p5830_p12 = scmp.ne.s32.totalorder %s5813_s7, 0 }
  0xb6   : > { %3909 = dma.done.wait (%p5830_p12), %s313_s6, 2048  }
  0xb7   : > { %3911 = vsyncadd (%p5830_p12), %s313_s6, 4294965248  ;;  %s2699_s13 = sshll.u32 %s303_s2, 8 }
  0xb8   : > { %s4342_s8 = scalar_lea.vmem [#allocation10], %s2699_s13 }
  0xb9   : > { %3913 = dma.done.wait (%p5829_p3), %s313_s6, 4096  }
  0xba   : > { %3915 = vsyncadd (%p5829_p3), %s313_s6, 4294963200  ;;  %s331_s4 = scalar_lea.sflag [#allocation12], %s303_s2  ;;  %s4348_s11 = scalar_lea.vmem [#allocation11], %s2699_s13 }
  0xbb   : > { %3917 = dma.done.wait (%p5829_p3), %s331_s4, 4096  }
  0xbc   : > { %3919 = vsyncadd (%p5829_p3), %s331_s4, 4294963200  ;;  %vm442_vm0 = vcmask 523264   ;;  %v3979_v0 = vmov -2.3819763e+38   ;;  %v3980_v1 = vmov 0.0   ;;  %v475_v2 = vld [vmem:[%s4336_s27] sm:$0xff] }
  0xbd   : > { %378 = vst [vmem:[#allocation2] sm:$0xff] %v3979_v0  ;;  %379 = vst [vmem:[#allocation2 + $0x8] sm:$0xff] %v3979_v0  ;;  %v476_v3 = vld [vmem:[%s4336_s27 + $0x8] sm:$0xff]  ;;  %v477_v4 = vld [vmem:[%s4336_s27 + $0x10] sm:$0xff]  ;;  %v4456_v8 = vmul.f32 0.125, %v475_v2  ;;  %s4499_s9 = scalar_lea.vmem [#allocation13], %s4333_s30 }
  0xbe   : > { %380 = vst [vmem:[#allocation2 + $0x10] sm:$0xff] %v3979_v0  ;;  %381 = vst [vmem:[#allocation2 + $0x18] sm:$0xff] %v3979_v0  ;;  %v478_v5 = vld [vmem:[%s4336_s27 + $0x18] sm:$0xff]  ;;  %v479_v6 = vld [vmem:[%s4336_s27 + $0x20] sm:$0xff]  ;;  %v4458_v9 = vmul.f32 0.125, %v476_v3  ;;  %v4460_v10 = vmul.f32 0.125, %v477_v4 }
  0xbf   : > { %382 = vst [vmem:[#allocation2 + $0x20] sm:$0xff] %v3979_v0  ;;  %383 = vst [vmem:[#allocation2 + $0x28] sm:$0xff] %v3979_v0  ;;  %v480_v7 = vld [vmem:[%s4336_s27 + $0x28] sm:$0xff]  ;;  %v481_v11 = vld [vmem:[%s4336_s27 + $0x30] sm:$0xff]  ;;  %v4465_v14 = vmul.f32 0.125, %v478_v5  ;;  %v4467_v15 = vmul.f32 0.125, %v479_v6 }
  0xc0   : > { %384 = vst [vmem:[#allocation2 + $0x30] sm:$0xff] %v3979_v0  ;;  %385 = vst [vmem:[#allocation2 + $0x38] sm:$0xff] %v3979_v0  ;;  %v482_v12 = vld [vmem:[%s4336_s27 + $0x38] sm:$0xff]  ;;  %v483_v13 = vld [vmem:[%s4336_s27 + $0x40] sm:$0xff]  ;;  %v4469_v16 = vmul.f32 0.125, %v480_v7  ;;  %v4474_v20 = vmul.f32 0.125, %v481_v11 }
  0xc1   : > { %386 = vst [vmem:[#allocation2 + $0x40] sm:$0xff] %v3979_v0  ;;  %387 = vst [vmem:[#allocation2 + $0x48] sm:$0xff] %v3979_v0  ;;  %v484_v17 = vld [vmem:[%s4336_s27 + $0x48] sm:$0xff]  ;;  %v485_v18 = vld [vmem:[%s4336_s27 + $0x50] sm:$0xff]  ;;  %v4476_v21 = vmul.f32 0.125, %v482_v12  ;;  %v4478_v22 = vmul.f32 0.125, %v483_v13 }
  0xc2   : > { %388 = vst [vmem:[#allocation2 + $0x50] sm:$0xff] %v3979_v0  ;;  %389 = vst [vmem:[#allocation2 + $0x58] sm:$0xff] %v3979_v0  ;;  %v486_v19 = vld [vmem:[%s4336_s27 + $0x58] sm:$0xff]  ;;  %v487_v23 = vld [vmem:[%s4336_s27 + $0x60] sm:$0xff]  ;;  %v4483_v26 = vmul.f32 0.125, %v484_v17  ;;  %v4485_v27 = vmul.f32 0.125, %v485_v18 }
  0xc3   : > { %390 = vst [vmem:[#allocation2 + $0x60] sm:$0xff] %v3979_v0  ;;  %391 = vst [vmem:[#allocation2 + $0x68] sm:$0xff] %v3979_v0  ;;  %v488_v24 = vld [vmem:[%s4336_s27 + $0x68] sm:$0xff]  ;;  %v489_v25 = vld [vmem:[%s4336_s27 + $0x70] sm:$0xff]  ;;  %v4487_v28 = vmul.f32 0.125, %v486_v19  ;;  %v4490_v30 = vmul.f32 0.125, %v487_v23 }
  0xc4   : > { %392 = vst [vmem:[#allocation2 + $0x70] sm:$0xff] %v3979_v0  ;;  %393 = vst [vmem:[#allocation2 + $0x78] sm:$0xff] %v3979_v0  ;;  %v490_v29 = vld [vmem:[%s4336_s27 + $0x78] sm:$0xff]  ;;  %v4492_v31 = vmul.f32 0.125, %v488_v24  ;;  %v4494_v32 = vmul.f32 0.125, %v489_v25  ;;  %s4501_s7 = smov 0  }
  0xc5   : > { %394 = vst [vmem:[#allocation2 + $0x80] sm:$0xff] %v3979_v0  ;;  %395 = vst [vmem:[#allocation2 + $0x88] sm:$0xff] %v3979_v0  ;;  %v4496_v33 = vmul.f32 0.125, %v490_v29 }
  0xc6   : > { %396 = vst [vmem:[#allocation2 + $0x90] sm:$0xff] %v3979_v0  ;;  %397 = vst [vmem:[#allocation2 + $0x98] sm:$0xff] %v3979_v0 }
  0xc7   : > { %398 = vst [vmem:[#allocation2 + $0xa0] sm:$0xff] %v3979_v0  ;;  %399 = vst [vmem:[#allocation2 + $0xa8] sm:$0xff] %v3979_v0 }
  0xc8   : > { %400 = vst [vmem:[#allocation2 + $0xb0] sm:$0xff] %v3979_v0  ;;  %401 = vst [vmem:[#allocation2 + $0xb8] sm:$0xff] %v3979_v0 }
  0xc9   : > { %402 = vst [vmem:[#allocation2 + $0xc0] sm:$0xff] %v3979_v0  ;;  %403 = vst [vmem:[#allocation2 + $0xc8] sm:$0xff] %v3979_v0 }
  0xca   : > { %404 = vst [vmem:[#allocation2 + $0xd0] sm:$0xff] %v3979_v0  ;;  %405 = vst [vmem:[#allocation2 + $0xd8] sm:$0xff] %v3979_v0 }
  0xcb   : > { %406 = vst [vmem:[#allocation2 + $0xe0] sm:$0xff] %v3979_v0  ;;  %407 = vst [vmem:[#allocation2 + $0xe8] sm:$0xff] %v3979_v0 }
  0xcc   : > { %408 = vst [vmem:[#allocation2 + $0xf0] sm:$0xff] %v3979_v0  ;;  %409 = vst [vmem:[#allocation2 + $0xf8] sm:$0xff] %v3979_v0 }
  0xcd   : > { %410 = vst [vmem:[#allocation3] sm:$0xff] %v3980_v1  ;;  %411 = vst [vmem:[#allocation3 + $0x8] sm:$0xff] %v3980_v1 }
  0xce   : > { %412 = vst [vmem:[#allocation3 + $0x10] sm:$0xff] %v3980_v1  ;;  %413 = vst [vmem:[#allocation3 + $0x18] sm:$0xff] %v3980_v1 }
  0xcf   : > { %414 = vst [vmem:[#allocation3 + $0x20] sm:$0xff] %v3980_v1  ;;  %415 = vst [vmem:[#allocation3 + $0x28] sm:$0xff] %v3980_v1 }
  0xd0   : > { %416 = vst [vmem:[#allocation3 + $0x30] sm:$0xff] %v3980_v1  ;;  %417 = vst [vmem:[#allocation3 + $0x38] sm:$0xff] %v3980_v1 }
  0xd1   : > { %418 = vst [vmem:[#allocation3 + $0x40] sm:$0xff] %v3980_v1  ;;  %419 = vst [vmem:[#allocation3 + $0x48] sm:$0xff] %v3980_v1 }
  0xd2   : > { %420 = vst [vmem:[#allocation3 + $0x50] sm:$0xff] %v3980_v1  ;;  %421 = vst [vmem:[#allocation3 + $0x58] sm:$0xff] %v3980_v1 }
  0xd3   : > { %422 = vst [vmem:[#allocation3 + $0x60] sm:$0xff] %v3980_v1  ;;  %423 = vst [vmem:[#allocation3 + $0x68] sm:$0xff] %v3980_v1 }
  0xd4   : > { %424 = vst [vmem:[#allocation3 + $0x70] sm:$0xff] %v3980_v1  ;;  %425 = vst [vmem:[#allocation3 + $0x78] sm:$0xff] %v3980_v1 }
  0xd5   : > { %426 = vst [vmem:[#allocation3 + $0x80] sm:$0xff] %v3980_v1  ;;  %427 = vst [vmem:[#allocation3 + $0x88] sm:$0xff] %v3980_v1 }
  0xd6   : > { %428 = vst [vmem:[#allocation3 + $0x90] sm:$0xff] %v3980_v1  ;;  %429 = vst [vmem:[#allocation3 + $0x98] sm:$0xff] %v3980_v1 }
  0xd7   : > { %430 = vst [vmem:[#allocation3 + $0xa0] sm:$0xff] %v3980_v1  ;;  %431 = vst [vmem:[#allocation3 + $0xa8] sm:$0xff] %v3980_v1 }
  0xd8   : > { %432 = vst [vmem:[#allocation3 + $0xb0] sm:$0xff] %v3980_v1  ;;  %433 = vst [vmem:[#allocation3 + $0xb8] sm:$0xff] %v3980_v1 }
  0xd9   : > { %434 = vst [vmem:[#allocation3 + $0xc0] sm:$0xff] %v3980_v1  ;;  %435 = vst [vmem:[#allocation3 + $0xc8] sm:$0xff] %v3980_v1 }
  0xda   : > { %436 = vst [vmem:[#allocation3 + $0xd0] sm:$0xff] %v3980_v1  ;;  %437 = vst [vmem:[#allocation3 + $0xd8] sm:$0xff] %v3980_v1 }
  0xdb   : > { %438 = vst [vmem:[#allocation3 + $0xe0] sm:$0xff] %v3980_v1  ;;  %439 = vst [vmem:[#allocation3 + $0xe8] sm:$0xff] %v3980_v1 }
  0xdc   : > { %440 = vst [vmem:[#allocation3 + $0xf0] sm:$0xff] %v3980_v1  ;;  %441 = vst [vmem:[#allocation3 + $0xf8] sm:$0xff] %v3980_v1 }
  0xdd   : > { %443 = vst.msk [vmem:[#allocation4] sm:$0xff] %vm442_vm0, %v3980_v1  ;;  %444 = vst.msk [vmem:[#allocation4 + $0x8] sm:$0xff] %vm442_vm0, %v3980_v1 }
  0xde   : > { %445 = vst.msk [vmem:[#allocation4 + $0x10] sm:$0xff] %vm442_vm0, %v3980_v1  ;;  %446 = vst.msk [vmem:[#allocation4 + $0x18] sm:$0xff] %vm442_vm0, %v3980_v1 }
  0xdf   : > { %447 = vst.msk [vmem:[#allocation4 + $0x20] sm:$0xff] %vm442_vm0, %v3980_v1  ;;  %448 = vst.msk [vmem:[#allocation4 + $0x28] sm:$0xff] %vm442_vm0, %v3980_v1 }
  0xe0   : > { %449 = vst.msk [vmem:[#allocation4 + $0x30] sm:$0xff] %vm442_vm0, %v3980_v1  ;;  %450 = vst.msk [vmem:[#allocation4 + $0x38] sm:$0xff] %vm442_vm0, %v3980_v1 }
  0xe1   : > { %451 = vst.msk [vmem:[#allocation4 + $0x40] sm:$0xff] %vm442_vm0, %v3980_v1  ;;  %452 = vst.msk [vmem:[#allocation4 + $0x48] sm:$0xff] %vm442_vm0, %v3980_v1 }
  0xe2   : > { %453 = vst.msk [vmem:[#allocation4 + $0x50] sm:$0xff] %vm442_vm0, %v3980_v1  ;;  %454 = vst.msk [vmem:[#allocation4 + $0x58] sm:$0xff] %vm442_vm0, %v3980_v1 }
  0xe3   : > { %455 = vst.msk [vmem:[#allocation4 + $0x60] sm:$0xff] %vm442_vm0, %v3980_v1  ;;  %456 = vst.msk [vmem:[#allocation4 + $0x68] sm:$0xff] %vm442_vm0, %v3980_v1 }
  0xe4   : > { %457 = vst.msk [vmem:[#allocation4 + $0x70] sm:$0xff] %vm442_vm0, %v3980_v1  ;;  %458 = vst.msk [vmem:[#allocation4 + $0x78] sm:$0xff] %vm442_vm0, %v3980_v1 }
  0xe5   : > { %459 = vst.msk [vmem:[#allocation4 + $0x80] sm:$0xff] %vm442_vm0, %v3980_v1  ;;  %460 = vst.msk [vmem:[#allocation4 + $0x88] sm:$0xff] %vm442_vm0, %v3980_v1 }
  0xe6   : > { %461 = vst.msk [vmem:[#allocation4 + $0x90] sm:$0xff] %vm442_vm0, %v3980_v1  ;;  %462 = vst.msk [vmem:[#allocation4 + $0x98] sm:$0xff] %vm442_vm0, %v3980_v1 }
  0xe7   : > { %463 = vst.msk [vmem:[#allocation4 + $0xa0] sm:$0xff] %vm442_vm0, %v3980_v1  ;;  %464 = vst.msk [vmem:[#allocation4 + $0xa8] sm:$0xff] %vm442_vm0, %v3980_v1 }
  0xe8   : > { %465 = vst.msk [vmem:[#allocation4 + $0xb0] sm:$0xff] %vm442_vm0, %v3980_v1  ;;  %466 = vst.msk [vmem:[#allocation4 + $0xb8] sm:$0xff] %vm442_vm0, %v3980_v1 }
  0xe9   : > { %467 = vst.msk [vmem:[#allocation4 + $0xc0] sm:$0xff] %vm442_vm0, %v3980_v1  ;;  %468 = vst.msk [vmem:[#allocation4 + $0xc8] sm:$0xff] %vm442_vm0, %v3980_v1 }
  0xea   : > { %469 = vst.msk [vmem:[#allocation4 + $0xd0] sm:$0xff] %vm442_vm0, %v3980_v1  ;;  %470 = vst.msk [vmem:[#allocation4 + $0xd8] sm:$0xff] %vm442_vm0, %v3980_v1 }
  0xeb   : > { %471 = vst.msk [vmem:[#allocation4 + $0xe0] sm:$0xff] %vm442_vm0, %v3980_v1  ;;  %472 = vst.msk [vmem:[#allocation4 + $0xe8] sm:$0xff] %vm442_vm0, %v3980_v1 }
  0xec   : > { %473 = vst.msk [vmem:[#allocation4 + $0xf0] sm:$0xff] %vm442_vm0, %v3980_v1  ;;  %474 = vst.msk [vmem:[#allocation4 + $0xf8] sm:$0xff] %vm442_vm0, %v3980_v1 }
  0xed   : > { %5831 = vst [vmem:[#allocation30_spill] sm:$0xff] %v4456_v8  ;;  %5832 = vst [vmem:[#allocation31_spill] sm:$0xff] %v4458_v9 }
  0xee   : > { %5833 = vst [vmem:[#allocation32_spill] sm:$0xff] %v4460_v10  ;;  %5834 = vst [vmem:[#allocation33_spill] sm:$0xff] %v4465_v14 }
  0xef   : > { %5835 = vst [vmem:[#allocation34_spill] sm:$0xff] %v4467_v15  ;;  %5836 = vst [vmem:[#allocation35_spill] sm:$0xff] %v4469_v16 }
  0xf0   : > { %5837 = vst [vmem:[#allocation36_spill] sm:$0xff] %v4474_v20  ;;  %5838 = vst [vmem:[#allocation37_spill] sm:$0xff] %v4476_v21 }
  0xf1   : > { %5839 = vst [vmem:[#allocation38_spill] sm:$0xff] %v4478_v22  ;;  %5840 = vst [vmem:[#allocation39_spill] sm:$0xff] %v4483_v26 }
  0xf2   : > { %5841 = vst [vmem:[#allocation40_spill] sm:$0xff] %v4485_v27  ;;  %5842 = vst [vmem:[#allocation41_spill] sm:$0xff] %v4487_v28 }
  0xf3   : > { %5843 = vst [vmem:[#allocation42_spill] sm:$0xff] %v4490_v30  ;;  %5844 = vst [vmem:[#allocation43_spill] sm:$0xff] %v4492_v31 }
  0xf4   : > { %5845 = vst [vmem:[#allocation44_spill] sm:$0xff] %v4494_v32  ;;  %5846 = vst [vmem:[#allocation45_spill] sm:$0xff] %v4496_v33 }
  0xf5 LB: >> { %v5859_v14 = vld [vmem:[#allocation33_spill] sm:$0xff]  ;;  %v5860_v10 = vld [vmem:[#allocation32_spill] sm:$0xff]  ;;  %v5861_v9 = vld [vmem:[#allocation31_spill] sm:$0xff]  ;;  %s4509_s14 = sshll.u32 %s3970_s7, 7  ;;  %v3981_v29 = vmov 0   ;;  %s3982_s20 = smov 64   ;;  %s3970_s7 = sphi %s4501_s7, %s512_s7  }
  0xf6   : >> { %v5857_v16 = vld [vmem:[#allocation35_spill] sm:$0xff]  ;;  %v5858_v15 = vld [vmem:[#allocation34_spill] sm:$0xff]  ;;  %s4513_s0 = scalar_lea.vmem %s4342_s8, %s4509_s14 [#allocation10]  ;;  %vm4517_vm1 = vmpackc.low %vm442_vm0, %vm442_vm0  ;;  %s548_s26 = sshra.s32 %s4509_s14, 7  ;;  %3424 = vset.pattern.permute.xlu0 %v3981_v29  ;;  %3425 = vset.pattern.permute.xlu1 %v3981_v29 }
  0xf7   : >> { %v5855_v21 = vld [vmem:[#allocation37_spill] sm:$0xff]  ;;  %v5856_v20 = vld [vmem:[#allocation36_spill] sm:$0xff]  ;;  %v5862_v8 = vld [vmem:[#allocation30_spill] sm:$0xff]  ;;  %s4651_s29 = scalar_lea.vmem %s4323_s22, %s548_s26 [#allocation5]  ;;  %s4704_s23 = scalar_lea.vmem %s4348_s11, %s4509_s14 [#allocation11] }
  0xf8   : >> { %v5853_v26 = vld [vmem:[#allocation39_spill] sm:$0xff]  ;;  %v5854_v22 = vld [vmem:[#allocation38_spill] sm:$0xff]  ;;  %2935 = vmatprep.mubr.msk.f32.mxu0 %vm442_vm0, %v5862_v8  ;;  %v4535_v40 = vld [vmem:[%s4513_s0 + $0x18] sm:$0xff]  ;;  %s512_s7 = sadd.s32 1, %s3970_s7  }
  0xf9   : >> { %v5851_v28 = vld [vmem:[#allocation41_spill] sm:$0xff]  ;;  %v5852_v27 = vld [vmem:[#allocation40_spill] sm:$0xff]  ;;  %v4525_v36 = vld [vmem:[%s4513_s0 + $0x8] sm:$0xff]  ;;  %p509_p6 = scmp.ge.s32.totalorder %s512_s7, 2  }
  0xfa   : >> { %v5849_v31 = vld [vmem:[#allocation43_spill] sm:$0xff]  ;;  %v5850_v30 = vld [vmem:[#allocation42_spill] sm:$0xff]  ;;  %v4561_v46 = vld [vmem:[%s4513_s0 + $0x38] sm:$0xff]  ;;  %s3983_s17 = smov (%p509_p6), 64   ;;  %s6011_s28 = sld [smem:[#allocation22_spill]] (%p509_p6) }
  0xfb   : >> { %v5847_v33 = vld [vmem:[#allocation45_spill] sm:$0xff]  ;;  %v5848_v32 = vld [vmem:[#allocation44_spill] sm:$0xff]  ;;  %v4549_v43 = vld [vmem:[%s4513_s0 + $0x28] sm:$0xff]  ;;  %s2769_s5 = sshll.u32 (%p509_p6), %s3950_s21, 4  ;;  %s2504_s24 = sshll.u32 (%p509_p6), %s4499_s9, 4  ;;  %s5625_s24 = int_to_ptr.vmem [resolvable:$true] %s2504_s24 }
  0xfc   : >> { %v4522_v35 = vld [vmem:[%s4513_s0] sm:$0xff]  ;;  %v4528_v37 = vld [vmem:[%s4513_s0 + $0x10] sm:$0xff]  ;;  %v4573_v49 = vld [vmem:[%s4513_s0 + $0x48] sm:$0xff]  ;;  %s6012_s1 = sld [smem:[#allocation83_spill]] (%p509_p6)  ;;  %s5633_s6 = scalar_lea.sflag (%p509_p6), [#allocation7], %s314_s10 }
  0xfd   : >> { %v3127_v39 = vpack.c.bf16 %v4525_v36, %v4522_v35  ;;  %v3133_v41 = vpack.c.bf16 %v4535_v40, %v4528_v37  ;;  %v4546_v42 = vld [vmem:[%s4513_s0 + $0x20] sm:$0xff]  ;;  %v4558_v45 = vld [vmem:[%s4513_s0 + $0x30] sm:$0xff]  ;;  %v4585_v52 = vld [vmem:[%s4513_s0 + $0x58] sm:$0xff]  ;;  %s3828_s27 = scalar_lea.vmem (%p509_p6), %s5625_s24, 2048  ;;  %p6013_p13 = scmp.ne.s32.totalorder (%p509_p6), %s5815_s18, 0 }
  0xfe   : >> { %v3139_v44 = vpack.c.bf16 %v4549_v43, %v4546_v42  ;;  %v3145_v47 = vpack.c.bf16 %v4561_v46, %v4558_v45  ;;  %v4570_v48 = vld [vmem:[%s4513_s0 + $0x40] sm:$0xff]  ;;  %v4582_v51 = vld [vmem:[%s4513_s0 + $0x50] sm:$0xff]  ;;  %v4597_v55 = vld [vmem:[%s4513_s0 + $0x68] sm:$0xff]  ;;  %v3441_v38 = vpack.i.bf16 %v4561_v46, %v4558_v45  ;;  %p3829_p4 = scmp.ne.s32.totalorder (%p509_p6), %s5625_s24, %s3828_s27  ;;  %s3984_s13 = smov (%p509_p6), [#allocation13]  }
  0xff   : >> { %3129 = vmatprep.subr.msk.bf16.mxu0 %vm4517_vm1, %v3127_v39  ;;  %v3151_v50 = vpack.c.bf16 %v4573_v49, %v4570_v48  ;;  %v3157_v53 = vpack.c.bf16 %v4585_v52, %v4582_v51  ;;  %v4594_v54 = vld [vmem:[%s4513_s0 + $0x60] sm:$0xff]  ;;  %v4606_v57 = vld [vmem:[%s4513_s0 + $0x70] sm:$0xff]  ;;  %v4609_v58 = vld [vmem:[%s4513_s0 + $0x78] sm:$0xff]  ;;  %s3832_s8 = sshll.u32 (%p509_p6), %s3984_s13, 4  ;;  %s3833_s8 = int_to_ptr.vmem [resolvable:$false] %s3832_s8 }
 0x100   : >> { %3132 = vmatpush3.bf16.xpose.msk.msra.mxu0 %vm4517_vm1, %v3127_v39  ;;  %v3163_v56 = vpack.c.bf16 %v4597_v55, %v4594_v54  ;;  %v3169_v59 = vpack.c.bf16 %v4609_v58, %v4606_v57  ;;  %v2703_v60 = vld [vmem:[%s4651_s29] ss:$0 sm:$0xff]  ;;  %s2770_s15 = sshll.u32 (%p509_p6), %s6011_s28, 5  ;;  %p3830_p2 = pnand (%p509_p6), %p3829_p4, %p6013_p13 }
 0x101   : >> { %3135 = vmatprep.subr.msk.bf16.mxu0 %vm4517_vm1, %v3133_v41  ;;  %v536_v29 = vld [vmem:[%s4704_s23 + $0x20] sm:$0xff]  ;;  %s2501_s2 = sadd.s32 (%p509_p6), %s2770_s15, %s2769_s5  ;;  %s3834_s4 = scalar_lea.vmem (%p509_p6), %s3833_s8, 4096 }
 0x102   : >> { %v4773_v45 = vld [vmem:[#allocation2 + $0x20] sm:$0xff]  ;;  %s2771_s21 = sshll.u32 (%p509_p6), %s2501_s2, 7  ;;  %p3831_p11 = pneg (%p509_p6), %p3830_p2 }
 0x103   : > { %s5623_s30 = scalar_lea.hbm (%p509_p6), %s6012_s1, %s2771_s21  ;;  %p3835_p1 = scmp.lt.s32.totalorder (%p509_p6), %s5625_s24, %s3833_s8 }
 0x104   : > { %p3836_p5 = scmp.lt.s32.totalorder (%p509_p6), %s3834_s4, %s3828_s27 }
 0x106   : > { %p3837_p0 = por (%p509_p6), %p3836_p5, %p3835_p1 }
 0x108   : >> { %3138 = vmatpush3.bf16.xpose.msk.msra.mxu0 %vm4517_vm1, %v3133_v41  ;;  %p3838_p9 = pnand (%p509_p6), %p3837_p0, %p3831_p11 }
 0x109   : >> { %3141 = vmatprep.subr.msk.bf16.mxu0 %vm4517_vm1, %v3139_v44 }
 0x110   : >> { %3144 = vmatpush3.bf16.xpose.msk.msra.mxu0 %vm4517_vm1, %v3139_v44 }
 0x111   : >> { %3147 = vmatprep.subr.msk.bf16.mxu0 %vm4517_vm1, %v3145_v47 }
 0x118   : >> { %3150 = vmatpush3.bf16.xpose.msk.msra.mxu0 %vm4517_vm1, %v3145_v47 }
 0x119   : >> { %3153 = vmatprep.subr.msk.bf16.mxu0 %vm4517_vm1, %v3151_v50 }
 0x120   : >> { %3156 = vmatpush3.bf16.xpose.msk.msra.mxu0 %vm4517_vm1, %v3151_v50 }
 0x121   : >> { %3159 = vmatprep.subr.msk.bf16.mxu0 %vm4517_vm1, %v3157_v53 }
 0x128   : >> { %3162 = vmatpush3.bf16.xpose.msk.msra.mxu0 %vm4517_vm1, %v3157_v53 }
 0x129   : >> { %3165 = vmatprep.subr.msk.bf16.mxu0 %vm4517_vm1, %v3163_v56 }
 0x130   : >> { %3168 = vmatpush3.bf16.xpose.msk.msra.mxu0 %vm4517_vm1, %v3163_v56 }
 0x131   : >> { %3171 = vmatprep.subr.msk.bf16.mxu0 %vm4517_vm1, %v3169_v59 }
 0x138   : >> { %3174 = vmatpush3.bf16.xpose.msk.msra.mxu0 %vm4517_vm1, %v3169_v59 }
 0x13f   : >> { %2936 = vmatmul.mubr.msk.f32.vlgmr.msra.gmra.mrb[0].mxu0 %vm442_vm0, %v5861_v9 }
 0x140   : >> { %2938 = vmatprep.mubr.msk.f32.mxu0 %vm442_vm0, %v5860_v10 }
 0x143   : >> { %2939 = vmatmul.mubr.msk.f32.gmra.mrb[2].mxu0 %vm442_vm0, %v5859_v14 }
 0x144   : >> { %2941 = vmatprep.mubr.msk.f32.mxu0 %vm442_vm0, %v5858_v15 }
 0x147   : >> { %2942 = vmatmul.mubr.msk.f32.gmra.mrb[4].mxu0 %vm442_vm0, %v5857_v16 }
 0x148   : >> { %2944 = vmatprep.mubr.msk.f32.mxu0 %vm442_vm0, %v5856_v20 }
 0x14b   : >> { %2945 = vmatmul.mubr.msk.f32.gmra.mrb[6].mxu0 %vm442_vm0, %v5855_v21 }
 0x14c   : >> { %2947 = vmatprep.mubr.msk.f32.mxu0 %vm442_vm0, %v5854_v22 }
 0x14f   : >> { %2948 = vmatmul.mubr.msk.f32.gmra.mrb[8].mxu0 %vm442_vm0, %v5853_v26 }
 0x150   : >> { %2950 = vmatprep.mubr.msk.f32.mxu0 %vm442_vm0, %v5852_v27 }
 0x153   : >> { %2951 = vmatmul.mubr.msk.f32.gmra.mrb[10].mxu0 %vm442_vm0, %v5851_v28 }
 0x154   : >> { %2953 = vmatprep.mubr.msk.f32.mxu0 %vm442_vm0, %v5850_v30 }
 0x157   : >> { %2954 = vmatmul.mubr.msk.f32.gmra.mrb[12].mxu0 %vm442_vm0, %v5849_v31 }
 0x158   : >> { %2956 = vmatprep.mubr.msk.f32.mxu0 %vm442_vm0, %v5848_v32 }
 0x15b   : >> { %2957 = vmatmul.mubr.msk.f32.gmra.mrb[14].mxu0 %vm442_vm0, %v5847_v33 }
 0x212   : >> { %v2937_v61 = vpop.f32.mrb[0].mxu0 }
 0x213   : >> { %v720_v62 = vpop.f32.mrb[1].mxu0  ;;  %v4659_v3 = vadd.f32 %v2937_v61, %v2703_v60 }
 0x214   : >> { %v4654_v63 = vadd.f32 %v2703_v60, %v720_v62 }
 0x216   : >> { %v2940_v0 = vpop.f32.mrb[2].mxu0  ;;  %831 = vmax.xlane.f32.xlu0 %v4654_v63 }
 0x217   : >> { %v4657_v1 = vadd.f32 %v2940_v0, %v2703_v60  ;;  %v730_v2 = vpop.f32.mrb[3].mxu0 }
 0x218   : >> { %v4662_v4 = vadd.f32 %v2703_v60, %v730_v2 }
 0x219   : >> { %837 = vmax.xlane.f32.xlu1 %v4657_v1 }
 0x21a   : >> { %v2943_v5 = vpop.f32.mrb[4].mxu0  ;;  %833 = vmax.xlane.f32.xlu0 %v4659_v3 }
 0x21b   : >> { %v740_v6 = vpop.f32.mrb[5].mxu0  ;;  %v4667_v11 = vadd.f32 %v2943_v5, %v2703_v60  ;;  %v4707_v5 = vld [vmem:[%s4704_s23] sm:$0xff] }
 0x21c   : >> { %v4665_v7 = vadd.f32 %v2703_v60, %v740_v6  ;;  %5865 = vst [vmem:[#allocation46_spill] sm:$0xff] %v4707_v5  ;;  %v4729_v6 = vld [vmem:[%s4704_s23 + $0x48] sm:$0xff] }
 0x21d   : >> { %835 = vmax.xlane.f32.xlu1 %v4662_v4  ;;  %5869 = vst [vmem:[#allocation50_spill] sm:$0xff] %v4729_v6 }
 0x21e   : >> { %v2946_v12 = vpop.f32.mrb[6].mxu0  ;;  %839 = vmax.xlane.f32.xlu0 %v4665_v7 }
 0x21f   : >> { %v750_v13 = vpop.f32.mrb[7].mxu0  ;;  %v4673_v18 = vadd.f32 %v2946_v12, %v2703_v60 }
 0x220   : >> { %v4671_v17 = vadd.f32 %v2703_v60, %v750_v13  ;;  %v534_v13 = vld [vmem:[%s4704_s23 + $0x10] sm:$0xff] }
 0x221   : >> { %841 = vmax.xlane.f32.xlu1 %v4667_v11 }
 0x222   : >> { %843 = vmax.xlane.f32.xlu0 %v4671_v17  ;;  %v2949_v19 = vpop.f32.mrb[8].mxu0 }
 0x223   : >> { %v760_v23 = vpop.f32.mrb[9].mxu0  ;;  %v4679_v25 = vadd.f32 %v2949_v19, %v2703_v60  ;;  %v535_v19 = vld [vmem:[%s4704_s23 + $0x18] sm:$0xff] }
 0x224   : >> { %v4677_v24 = vadd.f32 %v2703_v60, %v760_v23  ;;  %v3179_v23 = vpack.c.bf16 %v535_v19, %v534_v13  ;;  %v4733_v13 = vld [vmem:[#allocation2] sm:$0xff] }
 0x225   : >> { %845 = vmax.xlane.f32.xlu1 %v4673_v18  ;;  %5870 = vst [vmem:[#allocation51_spill] sm:$0xff] %v4733_v13 }
 0x226   : >> { %v2952_v39 = vpop.f32.mrb[10].mxu0  ;;  %847 = vmax.xlane.f32.xlu0 %v4677_v24 }
 0x227   : >> { %v770_v41 = vpop.f32.mrb[11].mxu0  ;;  %v4685_v47 = vadd.f32 %v2952_v39, %v2703_v60  ;;  %v537_v39 = vld [vmem:[%s4704_s23 + $0x28] sm:$0xff] }
 0x228   : >> { %v4683_v44 = vadd.f32 %v2703_v60, %v770_v41  ;;  %v3183_v41 = vpack.c.bf16 %v537_v39, %v536_v29  ;;  %v4738_v29 = vld [vmem:[#allocation2 + $0x18] sm:$0xff]  ;;  %v4741_v39 = vld [vmem:[%s4704_s23 + $0x50] sm:$0xff] }
 0x229   : >> { %849 = vmax.xlane.f32.xlu1 %v4679_v25  ;;  %5872 = vst [vmem:[#allocation53_spill] sm:$0xff] %v4738_v29  ;;  %5873 = vst [vmem:[#allocation54_spill] sm:$0xff] %v4741_v39 }
 0x22a   : >> { %v2955_v50 = vpop.f32.mrb[12].mxu0  ;;  %851 = vmax.xlane.f32.xlu0 %v4683_v44 }
 0x22b   : >> { %v780_v53 = vpop.f32.mrb[13].mxu0  ;;  %v4691_v59 = vadd.f32 %v2955_v50, %v2703_v60  ;;  %v538_v50 = vld [vmem:[%s4704_s23 + $0x30] sm:$0xff] }
 0x22c   : >> { %v4689_v56 = vadd.f32 %v2703_v60, %v780_v53  ;;  %v4722_v53 = vld [vmem:[%s4704_s23 + $0x38] sm:$0xff] }
 0x22d   : >> { %853 = vmax.xlane.f32.xlu1 %v4685_v47  ;;  %5867 = vst [vmem:[#allocation48_spill] sm:$0xff] %v4722_v53 }
 0x22e   : >> { %v2958_v61 = vpop.f32.mrb[14].mxu0  ;;  %855 = vmax.xlane.f32.xlu0 %v4689_v56 }
 0x22f   : >> { %v790_v62 = vpop.f32.mrb[15].mxu0  ;;  %v4697_v2 = vadd.f32 %v2958_v61, %v2703_v60  ;;  %v3187_v61 = vpack.c.bf16 %v4722_v53, %v538_v50  ;;  %v4746_v50 = vld [vmem:[#allocation2 + $0x8] sm:$0xff] }
 0x230   : >> { %v4695_v0 = vadd.f32 %v2703_v60, %v790_v62  ;;  %v4710_v60 = vld [vmem:[%s4704_s23 + $0x8] sm:$0xff]  ;;  %v4726_v62 = vld [vmem:[%s4704_s23 + $0x40] sm:$0xff] }
 0x231   : >> { %857 = vmax.xlane.f32.xlu1 %v4691_v59  ;;  %5866 = vst [vmem:[#allocation47_spill] sm:$0xff] %v4710_v60  ;;  %v3175_v12 = vpack.c.bf16 %v4710_v60, %v4707_v5  ;;  %5868 = vst [vmem:[#allocation49_spill] sm:$0xff] %v4726_v62 }
 0x232   : >> { %859 = vmax.xlane.f32.xlu0 %v4695_v0 }
 0x233   : >> { %3176 = vmatprep.subr.bf16.mxu1 %v3175_v12 }
 0x234   : >> { %3178 = vmatpush3.bf16.msra.mxu1 %v3175_v12  ;;  %v3191_v12 = vpack.c.bf16 %v4729_v6, %v4726_v62 }
 0x235   : >> { %861 = vmax.xlane.f32.xlu1 %v4697_v2  ;;  %3180 = vmatprep.subr.bf16.mxu1 %v3179_v23 }
 0x238   : >> { %3182 = vmatpush3.bf16.msra.mxu1 %v3179_v23 }
 0x239   : >> { %3184 = vmatprep.subr.bf16.mxu1 %v3183_v41 }
 0x23c   : >> { %3186 = vmatpush3.bf16.msra.mxu1 %v3183_v41  ;;  %v4744_v41 = vld [vmem:[%s4704_s23 + $0x58] sm:$0xff] }
 0x23d   : >> { %3188 = vmatprep.subr.bf16.mxu1 %v3187_v61  ;;  %5874 = vst [vmem:[#allocation55_spill] sm:$0xff] %v4744_v41 }
 0x240   : >> { %3190 = vmatpush3.bf16.msra.mxu1 %v3187_v61  ;;  %v3195_v61 = vpack.c.bf16 %v4744_v41, %v4741_v39  ;;  %v4762_v41 = vld [vmem:[#allocation2 + $0x10] sm:$0xff]  ;;  %v4768_v39 = vld [vmem:[%s4704_s23 + $0x68] sm:$0xff] }
 0x241   : >> { %3192 = vmatprep.subr.bf16.mxu1 %v3191_v12  ;;  %5875 = vst [vmem:[#allocation56_spill] sm:$0xff] %v4762_v41  ;;  %5877 = vst [vmem:[#allocation58_spill] sm:$0xff] %v4768_v39 }
 0x244   : >> { %3194 = vmatpush3.bf16.msra.mxu1 %v3191_v12  ;;  %v4765_v12 = vld [vmem:[%s4704_s23 + $0x60] sm:$0xff] }
 0x245   : >> { %3196 = vmatprep.subr.bf16.mxu1 %v3195_v61  ;;  %5876 = vst [vmem:[#allocation57_spill] sm:$0xff] %v4765_v12  ;;  %v3199_v46 = vpack.c.bf16 %v4768_v39, %v4765_v12  ;;  %v4788_v39 = vld [vmem:[#allocation2 + $0x28] sm:$0xff]  ;;  %v547_v12 = vld [vmem:[%s4704_s23 + $0x78] sm:$0xff] }
 0x248   : >> { %3198 = vmatpush3.bf16.msra.mxu1 %v3195_v61 }
 0x249   : >> { %3200 = vmatprep.subr.bf16.mxu1 %v3199_v46 }
 0x24c   : >> { %3202 = vmatpush3.bf16.msra.mxu1 %v3199_v46  ;;  %v5879_v46 = vpack.i.bf16 %v4525_v36, %v4522_v35  ;;  %v4817_v35 = vld [vmem:[#allocation2 + $0x40] sm:$0xff] }
 0x24d   : >> { %5881 = vst [vmem:[#allocation61_spill] sm:$0xff] %v4817_v35 }
 0x2a3   : >> { %v832_v19 = vpop.xlane.xlu0 %831 }
 0x2a4   : >> { %v4736_v23 = vmax.f32 %v4733_v13, %v832_v19  ;;  %v3431_v13 = vpack.i.bf16 %v4535_v40, %v4528_v37  ;;  %v3436_v40 = vpack.i.bf16 %v4549_v43, %v4546_v42 }
 0x2a6   : >> { %5871 = vst [vmem:[#allocation52_spill] sm:$0xff] %v4736_v23  ;;  %1135 = vst [vmem:[#allocation2] sm:$0xff] %v4736_v23  ;;  %v838_v19 = vpop.xlane.xlu1 %837  ;;  %929 = vperm.xlu0 %3424, %v4736_v23   ;;  %v4795_v23 = vld [vmem:[#allocation2 + $0x30] sm:$0xff] }
 0x2a7   : >> { %v4757_v53 = vmax.f32 %v4738_v29, %v838_v19  ;;  %v834_v5 = vpop.xlane.xlu0 %833  ;;  %5878 = vst [vmem:[#allocation59_spill] sm:$0xff] %v4795_v23 }
 0x2a8   : >> { %v4760_v60 = vmax.f32 %v4746_v50, %v834_v5  ;;  %v546_v5 = vld [vmem:[%s4704_s23 + $0x70] sm:$0xff] }
 0x2a9   : >> { %1138 = vst [vmem:[#allocation2 + $0x18] sm:$0xff] %v4757_v53 }
 0x2aa   : >> { %1136 = vst [vmem:[#allocation2 + $0x8] sm:$0xff] %v4760_v60  ;;  %v836_v61 = vpop.xlane.xlu1 %835  ;;  %934 = vperm.xlu1 %3425, %v4760_v60   ;;  %3442 = vrot.lane.b32.xlu0 %v3441_v38, %s3982_s20  ;;  %v3203_v38 = vpack.c.bf16 %v547_v12, %v546_v5  ;;  %v4812_v5 = vld [vmem:[#allocation2 + $0x38] sm:$0xff] }
 0x2ab   : >> { %v4783_v19 = vmax.f32 %v4762_v41, %v836_v61  ;;  %v840_v6 = vpop.xlane.xlu0 %839 }
 0x2ac   : >> { %v4786_v62 = vmax.f32 %v4773_v45, %v840_v6  ;;  %3204 = vmatprep.subr.bf16.mxu1 %v3203_v38 }
 0x2ad   : >> { %1137 = vst [vmem:[#allocation2 + $0x10] sm:$0xff] %v4783_v19  ;;  %3206 = vmatpush3.bf16.msra.mxu1 %v3203_v38 }
 0x2ae   : >> { %1139 = vst [vmem:[#allocation2 + $0x20] sm:$0xff] %v4786_v62  ;;  %v842_v6 = vpop.xlane.xlu1 %841  ;;  %3427 = vrot.lane.b32.xlu1 %v5879_v46, %s3982_s20 }
 0x2af   : >> { %v4807_v29 = vmax.f32 %v4788_v39, %v842_v6  ;;  %v844_v41 = vpop.xlane.xlu0 %843  ;;  %v4829_v6 = vld [vmem:[#allocation2 + $0x48] sm:$0xff] }
 0x2b0   : >> { %v4810_v12 = vmax.f32 %v4795_v23, %v844_v41  ;;  %5882 = vst [vmem:[#allocation62_spill] sm:$0xff] %v4829_v6  ;;  %v4873_v23 = vld [vmem:[#allocation2 + $0x70] sm:$0xff] }
 0x2b1   : >> { %1140 = vst [vmem:[#allocation2 + $0x28] sm:$0xff] %v4807_v29 }
 0x2b2   : >> { %5880 = vst [vmem:[#allocation60_spill] sm:$0xff] %v4810_v12  ;;  %1141 = vst [vmem:[#allocation2 + $0x30] sm:$0xff] %v4810_v12  ;;  %v846_v37 = vpop.xlane.xlu1 %845  ;;  %3432 = vrot.lane.b32.xlu1 %v3431_v13, %s3982_s20  ;;  %959 = vperm.xlu0 %3424, %v4810_v12   ;;  %v4837_v13 = vld [vmem:[#allocation2 + $0x50] sm:$0xff] }
 0x2b3   : >> { %v4827_v41 = vmax.f32 %v4812_v5, %v846_v37  ;;  %v848_v38 = vpop.xlane.xlu0 %847  ;;  %5883 = vst [vmem:[#allocation63_spill] sm:$0xff] %v4837_v13 }
 0x2b4   : >> { %v4832_v46 = vmax.f32 %v4817_v35, %v848_v38  ;;  %v4846_v38 = vld [vmem:[#allocation2 + $0x58] sm:$0xff] }
 0x2b5   : >> { %1142 = vst [vmem:[#allocation2 + $0x38] sm:$0xff] %v4827_v41  ;;  %5885 = vst [vmem:[#allocation65_spill] sm:$0xff] %v4846_v38 }
 0x2b6   : >> { %v850_v61 = vpop.xlane.xlu1 %849  ;;  %3437 = vrot.lane.b32.xlu1 %v3436_v40, %s3982_s20  ;;  %1143 = vst [vmem:[#allocation2 + $0x40] sm:$0xff] %v4832_v46  ;;  %v4855_v40 = vld [vmem:[#allocation2 + $0x60] sm:$0xff] }
 0x2b7   : >> { %v4844_v43 = vmax.f32 %v4829_v6, %v850_v61  ;;  %v852_v37 = vpop.xlane.xlu0 %851  ;;  %v4867_v6 = vld [vmem:[#allocation2 + $0x68] sm:$0xff] }
 0x2b8   : >> { %v4849_v36 = vmax.f32 %v4837_v13, %v852_v37 }
 0x2b9   : >> { %5884 = vst [vmem:[#allocation64_spill] sm:$0xff] %v4844_v43  ;;  %1144 = vst [vmem:[#allocation2 + $0x48] sm:$0xff] %v4844_v43  ;;  %974 = vperm.xlu0 %3424, %v4844_v43  }
 0x2ba   : >> { %v854_v42 = vpop.xlane.xlu1 %853  ;;  %944 = vperm.xlu1 %3425, %v4757_v53   ;;  %1145 = vst [vmem:[#allocation2 + $0x50] sm:$0xff] %v4849_v36 }
 0x2bb   : >> { %v4862_v37 = vmax.f32 %v4846_v38, %v854_v42  ;;  %v856_v35 = vpop.xlane.xlu0 %855  ;;  %v4885_v38 = vld [vmem:[#allocation2 + $0x78] sm:$0xff]  ;;  %v3461_v42 = vpack.i.bf16 %v4609_v58, %v4606_v57 }
 0x2bc   : >> { %v4865_v12 = vmax.f32 %v4855_v40, %v856_v35 }
 0x2bd   : >> { %5886 = vst [vmem:[#allocation66_spill] sm:$0xff] %v4862_v37  ;;  %1146 = vst [vmem:[#allocation2 + $0x58] sm:$0xff] %v4862_v37  ;;  %984 = vperm.xlu0 %3424, %v4862_v37   ;;  %v3451_v37 = vpack.i.bf16 %v4585_v52, %v4582_v51  ;;  %v3446_v51 = vpack.i.bf16 %v4573_v49, %v4570_v48  ;;  %v3456_v52 = vpack.i.bf16 %v4597_v55, %v4594_v54 }
 0x2be   : >> { %5887 = vst [vmem:[#allocation67_spill] sm:$0xff] %v4865_v12  ;;  %939 = vperm.xlu1 %3425, %v4783_v19   ;;  %1147 = vst [vmem:[#allocation2 + $0x60] sm:$0xff] %v4865_v12  ;;  %v858_v35 = vpop.xlane.xlu1 %857 }
 0x2bf   : >> { %v860_v61 = vpop.xlane.xlu0 %859  ;;  %v4880_v13 = vmax.f32 %v4867_v6, %v858_v35 }
 0x2c0   : >> { %v4883_v43 = vmax.f32 %v4873_v23, %v860_v61 }
 0x2c1   : >> { %989 = vperm.xlu0 %3424, %v4865_v12   ;;  %1148 = vst [vmem:[#allocation2 + $0x68] sm:$0xff] %v4880_v13 }
 0x2c2   : >> { %954 = vperm.xlu1 %3425, %v4807_v29   ;;  %1149 = vst [vmem:[#allocation2 + $0x70] sm:$0xff] %v4883_v43  ;;  %v862_v35 = vpop.xlane.xlu1 %861 }
 0x2c3   : >> { %v4896_v61 = vmax.f32 %v4885_v38, %v862_v35 }
 0x2c5   : >> { %999 = vperm.xlu0 %3424, %v4883_v43   ;;  %1150 = vst [vmem:[#allocation2 + $0x78] sm:$0xff] %v4896_v61 }
 0x2c6   : >> { %949 = vperm.xlu1 %3425, %v4786_v62  }
 0x2c9   : >> { %3452 = vrot.lane.b32.xlu0 %v3451_v37, %s3982_s20 }
 0x2ca   : >> { %964 = vperm.xlu1 %3425, %v4827_v41  }
 0x2cd   : >> { %3462 = vrot.lane.b32.xlu0 %v3461_v42, %s3982_s20 }
 0x2ce   : >> { %969 = vperm.xlu1 %3425, %v4832_v46  }
 0x2d1   : >> { %1362 = vrot.lane.b32.xlu0 %v5861_v9, %s3982_s20 }
 0x2d2   : >> { %979 = vperm.xlu1 %3425, %v4849_v36  }
 0x2d5   : >> { %1366 = vrot.lane.b32.xlu0 %v5859_v14, %s3982_s20 }
 0x2d6   : >> { %3447 = vrot.lane.b32.xlu1 %v3446_v51, %s3982_s20 }
 0x2d9   : >> { %1370 = vrot.lane.b32.xlu0 %v5857_v16, %s3982_s20 }
 0x2da   : >> { %994 = vperm.xlu1 %3425, %v4880_v13  }
 0x2dd   : >> { %1374 = vrot.lane.b32.xlu0 %v5855_v21, %s3982_s20  ;;  %v3638_v21 = vld [vmem:[%s4704_s23 + $0x28] sm:$0xff] }
 0x2de   : >> { %1004 = vperm.xlu1 %3425, %v4896_v61  }
 0x2e1   : >> { %1378 = vrot.lane.b32.xlu0 %v5853_v26, %s3982_s20  ;;  %v5920_v26 = vld [vmem:[#allocation49_spill] sm:$0xff] }
 0x2e2   : >> { %3457 = vrot.lane.b32.xlu1 %v3456_v52, %s3982_s20 }
 0x2e5   : >> { %1382 = vrot.lane.b32.xlu0 %v5851_v28, %s3982_s20 }
 0x2e6   : >> { %1360 = vrot.lane.b32.xlu1 %v5862_v8, %s3982_s20 }
 0x2e9   : >> { %1386 = vrot.lane.b32.xlu0 %v5849_v31, %s3982_s20  ;;  %v5925_v31 = vld [vmem:[#allocation48_spill] sm:$0xff] }
 0x2ea   : >> { %1364 = vrot.lane.b32.xlu1 %v5860_v10, %s3982_s20 }
 0x2ed   : >> { %1390 = vrot.lane.b32.xlu0 %v5847_v33, %s3982_s20 }
 0x2ee   : >> { %1368 = vrot.lane.b32.xlu1 %v5858_v15, %s3982_s20 }
 0x2f2   : >> { %1372 = vrot.lane.b32.xlu1 %v5856_v20, %s3982_s20 }
 0x2f6   : >> { %1376 = vrot.lane.b32.xlu1 %v5854_v22, %s3982_s20 }
 0x2fa   : >> { %1380 = vrot.lane.b32.xlu1 %v5852_v27, %s3982_s20 }
 0x2fe   : >> { %1384 = vrot.lane.b32.xlu1 %v5850_v30, %s3982_s20  ;;  %v3639_v30 = vld [vmem:[%s4704_s23 + $0x30] sm:$0xff] }
 0x302   : >> { %1388 = vrot.lane.b32.xlu1 %v5848_v32, %s3982_s20  ;;  %v3481_v32 = vpack.i.bf16 %v5925_v31, %v3639_v30 }
 0x325   : >> { %v930_v48 = vpop.permute.xlu0 %929 }
 0x326   : >> { %v1007_v49 = vsub.f32 %v4654_v63, %v930_v48 }
 0x328   : >> { %v1023_v54 = vmul.f32 1.442695, %v1007_v49 }
 0x329   : >> { %v935_v55 = vpop.permute.xlu1 %934  ;;  %v3443_v52 = vpop.permute.xlu0 %3442 }
 0x32a   : >> { %3506 = vpow2.f32 %v1023_v54  ;;  %v1008_v57 = vsub.f32 %v4659_v3, %v935_v55 }
 0x32c   : >> { %v1025_v58 = vmul.f32 1.442695, %v1008_v57 }
 0x32d   : >> { %v3428_v37 = vpop.permute.xlu1 %3427 }
 0x32e   : >> { %3508 = vpow2.f32 %v1025_v58  ;;  %v3430_v42 = vunpack.i.h.bf16 %v3428_v37  ;;  %v3429_v35 = vunpack.i.l.bf16 %v3428_v37 }
 0x330   : >> { %v3207_v51 = vpack.c.bf16 %v3430_v42, %v3429_v35 }
 0x331   : >> { %v3433_v12 = vpop.permute.xlu1 %3432  ;;  %v960_v49 = vpop.permute.xlu0 %959 }
 0x332   : >> { %3209 = vmatprep.subr.msk.bf16.mxu1 %vm4517_vm1, %v3207_v51  ;;  %v3435_v9 = vunpack.i.h.bf16 %v3433_v12  ;;  %v3434_v63 = vunpack.i.l.bf16 %v3433_v12 }
 0x334   : >> { %v4956_v8 = vpop.eup %3506  ;;  %v3213_v54 = vpack.c.bf16 %v3435_v9, %v3434_v63 }
 0x335   : >> { %v3438_v48 = vpop.permute.xlu1 %3437  ;;  %2991 = vmatprep.mubr.f32.mxu1 %v4956_v8 }
 0x336   : >> { %v3440_v12 = vunpack.i.h.bf16 %v3438_v48  ;;  %v3439_v37 = vunpack.i.l.bf16 %v3438_v48  ;;  %v3445_v48 = vunpack.i.h.bf16 %v3443_v52 }
 0x338   : >> { %v4959_v3 = vpop.eup %3508  ;;  %v975_v57 = vpop.permute.xlu0 %974  ;;  %v3219_v9 = vpack.c.bf16 %v3440_v12, %v3439_v37 }
 0x339   : >> { %v945_v55 = vpop.permute.xlu1 %944  ;;  %2992 = vmatmul.mubr.f32.vlgmr.msra.gmra.mrb[0].mxu1 %v4959_v3 }
 0x33a   : >> { %3212 = vmatpush3.bf16.xpose.msk.msra.mxu1 %vm4517_vm1, %v3207_v51  ;;  %v1010_v58 = vsub.f32 %v4657_v1, %v945_v55  ;;  %v1013_v51 = vsub.f32 %v4671_v17, %v960_v49  ;;  %v3444_v55 = vunpack.i.l.bf16 %v3443_v52 }
 0x33b   : >> { %3215 = vmatprep.subr.msk.bf16.mxu1 %vm4517_vm1, %v3213_v54 }
 0x33c   : >> { %v1029_v10 = vmul.f32 1.442695, %v1010_v58  ;;  %v985_v63 = vpop.permute.xlu0 %984 }
 0x33d   : >> { %v940_v42 = vpop.permute.xlu1 %939 }
 0x33e   : >> { %v1009_v35 = vsub.f32 %v4662_v4, %v940_v42  ;;  %v1035_v42 = vmul.f32 1.442695, %v1013_v51 }
 0x340   : >> { %v1027_v14 = vmul.f32 1.442695, %v1009_v35  ;;  %v990_v12 = vpop.permute.xlu0 %989  ;;  %v3225_v35 = vpack.c.bf16 %v3445_v48, %v3444_v55 }
 0x341   : >> { %v955_v15 = vpop.permute.xlu1 %954 }
 0x342   : >> { %3510 = vpow2.f32 %v1027_v14  ;;  %3218 = vmatpush3.bf16.xpose.msk.msra.mxu1 %vm4517_vm1, %v3213_v54  ;;  %v1012_v1 = vsub.f32 %v4667_v11, %v955_v15  ;;  %v1016_v15 = vsub.f32 %v4679_v25, %v975_v57  ;;  %v1018_v25 = vsub.f32 %v4685_v47, %v985_v63 }
 0x343   : >> { %3512 = vpow2.f32 %v1029_v10  ;;  %3221 = vmatprep.subr.msk.bf16.mxu1 %vm4517_vm1, %v3219_v9  ;;  %v1019_v54 = vsub.f32 %v4689_v56, %v990_v12 }
 0x344   : >> { %v1033_v37 = vmul.f32 1.442695, %v1012_v1  ;;  %v1000_v52 = vpop.permute.xlu0 %999  ;;  %v1045_v48 = vmul.f32 1.442695, %v1018_v25 }
 0x345   : >> { %v950_v4 = vpop.permute.xlu1 %949 }
 0x346   : >> { %v1011_v58 = vsub.f32 %v4665_v7, %v950_v4 }
 0x348   : >> { %v1031_v14 = vmul.f32 1.442695, %v1011_v58  ;;  %v3453_v1 = vpop.permute.xlu0 %3452 }
 0x349   : >> { %v965_v16 = vpop.permute.xlu1 %964  ;;  %v3455_v58 = vunpack.i.h.bf16 %v3453_v1 }
 0x34a   : >> { %3514 = vpow2.f32 %v1031_v14  ;;  %v1014_v10 = vsub.f32 %v4673_v18, %v965_v16  ;;  %3224 = vmatpush3.bf16.xpose.msk.msra.mxu1 %vm4517_vm1, %v3219_v9  ;;  %v1041_v18 = vmul.f32 1.442695, %v1016_v15 }
 0x34b   : >> { %3516 = vpow2.f32 %v1033_v37  ;;  %3227 = vmatprep.subr.msk.bf16.mxu1 %vm4517_vm1, %v3225_v35  ;;  %v3454_v37 = vunpack.i.l.bf16 %v3453_v1 }
 0x34c   : >> { %v4981_v11 = vpop.eup %3510  ;;  %3518 = vpow2.f32 %v1035_v42  ;;  %v1037_v7 = vmul.f32 1.442695, %v1014_v10  ;;  %v1021_v42 = vsub.f32 %v4695_v0, %v1000_v52  ;;  %v3463_v1 = vpop.permute.xlu0 %3462 }
 0x34d   : >> { %v4983_v17 = vpop.eup %3512  ;;  %v970_v49 = vpop.permute.xlu1 %969  ;;  %2994 = vmatprep.mubr.f32.mxu1 %v4981_v11  ;;  %v3237_v10 = vpack.c.bf16 %v3455_v58, %v3454_v37  ;;  %v3464_v58 = vunpack.i.l.bf16 %v3463_v1 }
 0x34e   : >> { %3520 = vpow2.f32 %v1037_v7  ;;  %v1015_v16 = vsub.f32 %v4677_v24, %v970_v49  ;;  %2995 = vmatmul.mubr.f32.gmra.mrb[2].mxu1 %v4983_v17  ;;  %v1047_v24 = vmul.f32 1.442695, %v1019_v54  ;;  %v1051_v49 = vmul.f32 1.442695, %v1021_v42 }
 0x350   : >> { %v1039_v57 = vmul.f32 1.442695, %v1015_v16  ;;  %v1363_v42 = vpop.permute.xlu0 %1362 }
 0x351   : >> { %v980_v9 = vpop.permute.xlu1 %979 }
 0x352   : >> { %3522 = vpow2.f32 %v1039_v57  ;;  %v1017_v51 = vsub.f32 %v4683_v44, %v980_v9  ;;  %3230 = vmatpush3.bf16.xpose.msk.msra.mxu1 %vm4517_vm1, %v3225_v35 }
 0x353   : >> { %3524 = vpow2.f32 %v1041_v18 }
 0x354   : >> { %v4993_v55 = vpop.eup %3514  ;;  %v1043_v4 = vmul.f32 1.442695, %v1017_v51 }
 0x355   : >> { %v4995_v47 = vpop.eup %3516  ;;  %v3448_v56 = vpop.permute.xlu1 %3447  ;;  %2997 = vmatprep.mubr.f32.mxu1 %v4993_v55 }
 0x356   : >> { %v4998_v63 = vpop.eup %3518  ;;  %3526 = vpow2.f32 %v1043_v4  ;;  %v3450_v44 = vunpack.i.h.bf16 %v3448_v56  ;;  %v3449_v12 = vunpack.i.l.bf16 %v3448_v56  ;;  %2998 = vmatmul.mubr.f32.gmra.mrb[4].mxu1 %v4995_v47  ;;  %v3465_v4 = vunpack.i.h.bf16 %v3463_v1 }
 0x357   : >> { %3528 = vpow2.f32 %v1045_v48  ;;  %3000 = vmatprep.mubr.f32.mxu1 %v4998_v63 }
 0x358   : >> { %v5003_v14 = vpop.eup %3520  ;;  %3530 = vpow2.f32 %v1047_v24  ;;  %v3231_v35 = vpack.c.bf16 %v3450_v44, %v3449_v12  ;;  %v3249_v44 = vpack.c.bf16 %v3465_v4, %v3464_v58  ;;  %v5888_v4 = vsub.f32 %v4746_v50, %v4760_v60 }
 0x359   : >> { %v995_v15 = vpop.permute.xlu1 %994 }
 0x35a   : >> { %v1020_v7 = vsub.f32 %v4691_v59, %v995_v15  ;;  %3001 = vmatmul.mubr.f32.gmra.mrb[6].mxu1 %v5003_v14  ;;  %3233 = vmatprep.subr.msk.bf16.mxu1 %vm4517_vm1, %v3231_v35  ;;  %v1367_v15 = vpop.permute.xlu0 %1366  ;;  %v897_v58 = vmul.f32 1.442695, %v5888_v4 }
 0x35b   : >> { %3236 = vmatpush3.bf16.xpose.msk.msra.mxu1 %vm4517_vm1, %v3231_v35 }
 0x35c   : >> { %v5011_v0 = vpop.eup %3522  ;;  %v1049_v52 = vmul.f32 1.442695, %v1020_v7  ;;  %3239 = vmatprep.subr.msk.bf16.mxu1 %vm4517_vm1, %v3237_v10 }
 0x35d   : >> { %v5015_v16 = vpop.eup %3524  ;;  %v1005_v18 = vpop.permute.xlu1 %1004  ;;  %3003 = vmatprep.mubr.f32.mxu1 %v5011_v0 }
 0x35e   : >> { %3532 = vpow2.f32 %v1049_v52  ;;  %v1022_v59 = vsub.f32 %v4697_v2, %v1005_v18  ;;  %3004 = vmatmul.mubr.f32.gmra.mrb[8].mxu1 %v5015_v16 }
 0x35f   : >> { %3534 = vpow2.f32 %v1051_v49  ;;  %v1371_v49 = vpop.permute.xlu0 %1370 }
 0x360   : >> { %v5020_v25 = vpop.eup %3526  ;;  %v1053_v54 = vmul.f32 1.442695, %v1022_v59 }
 0x361   : >> { %v5022_v57 = vpop.eup %3528  ;;  %3006 = vmatprep.mubr.f32.mxu1 %v5020_v25  ;;  %v3458_v9 = vpop.permute.xlu1 %3457 }
 0x362   : >> { %v5025_v51 = vpop.eup %3530  ;;  %3536 = vpow2.f32 %v1053_v54  ;;  %3007 = vmatmul.mubr.f32.gmra.mrb[10].mxu1 %v5022_v57  ;;  %v3460_v48 = vunpack.i.h.bf16 %v3458_v9  ;;  %v3459_v24 = vunpack.i.l.bf16 %v3458_v9 }
 0x363   : >> { %3009 = vmatprep.mubr.f32.mxu1 %v5025_v51  ;;  %3242 = vmatpush3.bf16.xpose.msk.msra.mxu1 %vm4517_vm1, %v3237_v10  ;;  %v1375_v18 = vpop.permute.xlu0 %1374  ;;  %3538 = vpow2.f32 %v897_v58  ;;  %v5896_v58 = vsub.f32 %v4788_v39, %v4807_v29  ;;  %v1298_v29 = vld [vmem:[#allocation4 + $0x10] sm:$0xff]  ;;  %v5902_v39 = vld [vmem:[#allocation62_spill] sm:$0xff] }
 0x364   : >> { %v3243_v2 = vpack.c.bf16 %v3460_v48, %v3459_v24 }
 0x365   : >> { %v1361_v37 = vpop.permute.xlu1 %1360 }
 0x366   : >> { %3245 = vmatprep.subr.msk.bf16.mxu1 %vm4517_vm1, %v3243_v2 }
 0x367   : >> { %v1379_v54 = vpop.permute.xlu0 %1378 }
 0x368   : >> { %v5033_v56 = vpop.eup %3532 }
 0x369   : >> { %v5035_v12 = vpop.eup %3534  ;;  %3010 = vmatmul.mubr.f32.gmra.mrb[12].mxu1 %v5033_v56  ;;  %v1365_v10 = vpop.permute.xlu1 %1364 }
 0x36a   : >> { %3012 = vmatprep.mubr.f32.mxu1 %v5035_v12 }
 0x36b   : >> { %3248 = vmatpush3.bf16.xpose.msk.msra.mxu1 %vm4517_vm1, %v3243_v2  ;;  %v1383_v34 = vpop.permute.xlu0 %1382 }
 0x36c   : >> { %v5041_v35 = vpop.eup %3536  ;;  %3251 = vmatprep.subr.msk.bf16.mxu1 %vm4517_vm1, %v3249_v44 }
 0x36d   : >> { %3013 = vmatmul.mubr.f32.gmra.mrb[14].mxu1 %v5041_v35  ;;  %v1369_v7 = vpop.permute.xlu1 %1368 }
 0x36e   : >> { %3047 = vmatprep.mubr.msk.f32.mxu1 %vm442_vm0, %v1361_v37  ;;  %v5889_v37 = vld [vmem:[#allocation51_spill] sm:$0xff] }
 0x36f   : >> { %v1387_v48 = vpop.permute.xlu0 %1386 }
 0x371   : >> { %v1373_v52 = vpop.permute.xlu1 %1372 }
 0x373   : >> { %3254 = vmatpush3.bf16.xpose.msk.msra.mxu1 %vm4517_vm1, %v3249_v44  ;;  %v1391_v2 = vpop.permute.xlu0 %1390  ;;  %v5890_v44 = vld [vmem:[#allocation52_spill] sm:$0xff] }
 0x375   : >> { %v1377_v59 = vpop.permute.xlu1 %1376 }
 0x379   : >> { %v1381_v9 = vpop.permute.xlu1 %1380 }
 0x37a   : >> { %3048 = vmatmul.mubr.msk.f32.vlgmr.msra.gmra.mrb[16].mxu1 %vm442_vm0, %v1363_v42  ;;  %v5891_v42 = vsub.f32 %v5889_v37, %v5890_v44  ;;  %v905_v37 = vmul.f32 1.442695, %v5896_v58  ;;  %v5897_v44 = vsub.f32 %v4773_v45, %v4786_v62  ;;  %v5903_v62 = vld [vmem:[#allocation64_spill] sm:$0xff]  ;;  %v5908_v58 = vld [vmem:[#allocation66_spill] sm:$0xff] }
 0x37b   : >> { %3050 = vmatprep.mubr.msk.f32.mxu1 %vm442_vm0, %v1365_v10  ;;  %v5904_v45 = vsub.f32 %v5902_v39, %v5903_v62  ;;  %v1303_v62 = vld [vmem:[#allocation4 + $0x38] sm:$0xff] }
 0x37c   : >> { %v895_v10 = vmul.f32 1.442695, %v5891_v42  ;;  %v903_v42 = vmul.f32 1.442695, %v5897_v44 }
 0x37d   : >> { %v1385_v1 = vpop.permute.xlu1 %1384 }
 0x37e   : >> { %3051 = vmatmul.mubr.msk.f32.gmra.mrb[18].mxu1 %vm442_vm0, %v1367_v15  ;;  %3540 = vpow2.f32 %v895_v10  ;;  %v5070_v15 = vpop.eup %3538 }
 0x37f   : >> { %3053 = vmatprep.mubr.msk.f32.mxu1 %vm442_vm0, %v1369_v7  ;;  %v1297_v7 = vld [vmem:[#allocation4 + $0x8] sm:$0xff] }
 0x381   : >> { %v1389_v24 = vpop.permute.xlu1 %1388 }
 0x382   : >> { %3054 = vmatmul.mubr.msk.f32.gmra.mrb[20].mxu1 %vm442_vm0, %v1371_v49 }
 0x383   : >> { %3056 = vmatprep.mubr.msk.f32.mxu1 %vm442_vm0, %v1373_v52  ;;  %v1296_v52 = vld [vmem:[#allocation4] sm:$0xff] }
 0x386   : >> { %3057 = vmatmul.mubr.msk.f32.gmra.mrb[22].mxu1 %vm442_vm0, %v1375_v18  ;;  %v1313_v18 = vmul.f32 %v5070_v15, %v1297_v7  ;;  %v5900_v7 = vld [vmem:[#allocation60_spill] sm:$0xff] }
 0x387   : >> { %3059 = vmatprep.mubr.msk.f32.mxu1 %vm442_vm0, %v1377_v59 }
 0x388   : >> { %v5072_v49 = vpop.eup %3540 }
 0x38a   : >> { %3060 = vmatmul.mubr.msk.f32.gmra.mrb[24].mxu1 %vm442_vm0, %v1379_v54  ;;  %v1312_v54 = vmul.f32 %v5072_v49, %v1296_v52 }
 0x38b   : >> { %3062 = vmatprep.mubr.msk.f32.mxu1 %vm442_vm0, %v1381_v9 }
 0x38e   : >> { %3063 = vmatmul.mubr.msk.f32.gmra.mrb[26].mxu1 %vm442_vm0, %v1383_v34  ;;  %v5892_v34 = vld [vmem:[#allocation53_spill] sm:$0xff] }
 0x38f   : >> { %3065 = vmatprep.mubr.msk.f32.mxu1 %vm442_vm0, %v1385_v1  ;;  %v5893_v1 = vsub.f32 %v5892_v34, %v4757_v53  ;;  %v5898_v53 = vsub.f32 %v4812_v5, %v4827_v41 }
 0x391   : >> { %v909_v10 = vmul.f32 1.442695, %v5898_v53  ;;  %v5910_v53 = vld [vmem:[#allocation63_spill] sm:$0xff] }
 0x392   : >> { %3066 = vmatmul.mubr.msk.f32.gmra.mrb[28].mxu1 %vm442_vm0, %v1387_v48  ;;  %v901_v48 = vmul.f32 1.442695, %v5893_v1 }
 0x393   : >> { %3068 = vmatprep.mubr.msk.f32.mxu1 %vm442_vm0, %v1389_v24  ;;  %v5894_v24 = vld [vmem:[#allocation56_spill] sm:$0xff] }
 0x394   : >> { %3542 = vpow2.f32 %v901_v48 }
 0x396   : >> { %3069 = vmatmul.mubr.msk.f32.gmra.mrb[30].mxu1 %vm442_vm0, %v1391_v2  ;;  %v5895_v2 = vsub.f32 %v5894_v24, %v4783_v19  ;;  %v5899_v19 = vld [vmem:[#allocation59_spill] sm:$0xff] }
 0x397   : >> { %v5901_v52 = vsub.f32 %v5899_v19, %v5900_v7  ;;  %v1301_v7 = vld [vmem:[#allocation4 + $0x28] sm:$0xff] }
 0x398   : >> { %v899_v4 = vmul.f32 1.442695, %v5895_v2 }
 0x39a   : >> { %3544 = vpow2.f32 %v899_v4  ;;  %v5907_v4 = vld [vmem:[#allocation65_spill] sm:$0xff] }
 0x39b   : >> { %3546 = vpow2.f32 %v905_v37  ;;  %v5909_v37 = vsub.f32 %v5907_v4, %v5908_v58 }
 0x39c   : >> { %3548 = vpow2.f32 %v903_v42 }
 0x39d   : >> { %3550 = vpow2.f32 %v909_v10  ;;  %v917_v44 = vmul.f32 1.442695, %v5909_v37  ;;  %v5911_v10 = vsub.f32 %v5910_v53, %v4849_v36 }
 0x39f   : >> { %v915_v19 = vmul.f32 1.442695, %v5911_v10 }
 0x40c   : >> { %v2993_v59 = vpop.f32.mrb[0].mxu1 }
 0x40d   : >> { %v1329_v9 = vadd.f32 %v2993_v59, %v1313_v18  ;;  %v1217_v60 = vpop.f32.mrb[1].mxu1  ;;  %v907_v18 = vmul.f32 1.442695, %v5901_v52  ;;  %v5096_v59 = vpop.eup %3542 }
 0x40e   : >> { %v1328_v50 = vadd.f32 %v1312_v54, %v1217_v60  ;;  %v1299_v54 = vld [vmem:[#allocation4 + $0x18] sm:$0xff]  ;;  %v913_v60 = vmul.f32 1.442695, %v5904_v45 }
 0x40f   : >> { %1345 = vst.msk [vmem:[#allocation4 + $0x8] sm:$0xff] %vm442_vm0, %v1329_v9  ;;  %v5098_v9 = vpop.eup %3544  ;;  %3552 = vpow2.f32 %v907_v18  ;;  %v1315_v34 = vmul.f32 %v5096_v59, %v1299_v54  ;;  %v1300_v18 = vld [vmem:[#allocation4 + $0x20] sm:$0xff] }
 0x410   : >> { %1344 = vst.msk [vmem:[#allocation4] sm:$0xff] %vm442_vm0, %v1328_v50  ;;  %v5905_v50 = vld [vmem:[#allocation61_spill] sm:$0xff]  ;;  %v1314_v48 = vmul.f32 %v5098_v9, %v1298_v29  ;;  %3554 = vpow2.f32 %v913_v60  ;;  %v5912_v60 = vsub.f32 %v4867_v6, %v4880_v13  ;;  %v1305_v13 = vld [vmem:[#allocation4 + $0x48] sm:$0xff] }
 0x411   : >> { %v5906_v5 = vsub.f32 %v5905_v50, %v4832_v46  ;;  %v5115_v46 = vpop.eup %3546 }
 0x412   : >> { %v5118_v52 = vpop.eup %3548  ;;  %v1317_v54 = vmul.f32 %v5115_v46, %v1301_v7  ;;  %v921_v50 = vmul.f32 1.442695, %v5912_v60  ;;  %v5916_v7 = vsub.f32 %v4873_v23, %v4883_v43  ;;  %v1306_v23 = vld [vmem:[#allocation4 + $0x50] sm:$0xff] }
 0x413   : >> { %v911_v41 = vmul.f32 1.442695, %v5906_v5  ;;  %v5121_v29 = vpop.eup %3550  ;;  %v1316_v36 = vmul.f32 %v5118_v52, %v1300_v18 }
 0x414   : >> { %v1319_v4 = vmul.f32 %v5121_v29, %v1303_v62  ;;  %v923_v18 = vmul.f32 1.442695, %v5916_v7 }
 0x415   : >> { %3556 = vpow2.f32 %v911_v41 }
 0x416   : >> { %3558 = vpow2.f32 %v917_v44 }
 0x417   : >> { %3560 = vpow2.f32 %v915_v19  ;;  %v1304_v19 = vld [vmem:[#allocation4 + $0x40] sm:$0xff] }
 0x418   : >> { %3562 = vpow2.f32 %v921_v50 }
 0x419   : >> { %v5124_v45 = vpop.eup %3552 }
 0x41a   : >> { %v5134_v58 = vpop.eup %3554 }
 0x41f   : >> { %v5138_v44 = vpop.eup %3556 }
 0x421   : >> { %v2996_v1 = vpop.f32.mrb[2].mxu1 }
 0x422   : >> { %v1331_v24 = vadd.f32 %v2996_v1, %v1315_v34  ;;  %v1227_v2 = vpop.f32.mrb[3].mxu1  ;;  %v1302_v34 = vld [vmem:[#allocation4 + $0x30] sm:$0xff] }
 0x423   : >> { %v1330_v42 = vadd.f32 %v1314_v48, %v1227_v2  ;;  %v5913_v1 = vld [vmem:[#allocation67_spill] sm:$0xff]  ;;  %v1318_v6 = vmul.f32 %v5124_v45, %v1302_v34 }
 0x424   : >> { %1347 = vst.msk [vmem:[#allocation4 + $0x18] sm:$0xff] %vm442_vm0, %v1331_v24  ;;  %v5914_v48 = vsub.f32 %v4855_v40, %v5913_v1  ;;  %v5915_v40 = vsub.f32 %v4885_v38, %v4896_v61  ;;  %v1320_v38 = vmul.f32 %v5138_v44, %v1304_v19  ;;  %v1307_v61 = vld [vmem:[#allocation4 + $0x58] sm:$0xff] }
 0x425   : >> { %1346 = vst.msk [vmem:[#allocation4 + $0x10] sm:$0xff] %vm442_vm0, %v1330_v42  ;;  %v1311_v19 = vld [vmem:[#allocation4 + $0x78] sm:$0xff] }
 0x426   : >> { %v919_v24 = vmul.f32 1.442695, %v5914_v48  ;;  %v925_v42 = vmul.f32 1.442695, %v5915_v40 }
 0x428   : >> { %3564 = vpow2.f32 %v919_v24 }
 0x429   : >> { %v2999_v39 = vpop.f32.mrb[4].mxu1  ;;  %3566 = vpow2.f32 %v925_v42 }
 0x42a   : >> { %v1333_v5 = vadd.f32 %v2999_v39, %v1317_v54  ;;  %v1237_v41 = vpop.f32.mrb[5].mxu1  ;;  %v1321_v39 = vmul.f32 %v5134_v58, %v1305_v13  ;;  %3568 = vpow2.f32 %v923_v18  ;;  %v1308_v13 = vld [vmem:[#allocation4 + $0x60] sm:$0xff] }
 0x42b   : >> { %v1332_v2 = vadd.f32 %v1316_v36, %v1237_v41  ;;  %v5148_v36 = vpop.eup %3558 }
 0x42c   : >> { %1349 = vst.msk [vmem:[#allocation4 + $0x28] sm:$0xff] %vm442_vm0, %v1333_v5  ;;  %v5152_v60 = vpop.eup %3560  ;;  %v1323_v41 = vmul.f32 %v5148_v36, %v1307_v61 }
 0x42d   : >> { %1348 = vst.msk [vmem:[#allocation4 + $0x20] sm:$0xff] %vm442_vm0, %v1332_v2  ;;  %v3002_v37 = vpop.f32.mrb[6].mxu1  ;;  %v1322_v1 = vmul.f32 %v5152_v60, %v1306_v23 }
 0x42e   : >> { %v1335_v53 = vadd.f32 %v3002_v37, %v1319_v4  ;;  %v1247_v10 = vpop.f32.mrb[7].mxu1  ;;  %v5158_v4 = vpop.eup %3562  ;;  %v1309_v37 = vld [vmem:[#allocation4 + $0x68] sm:$0xff] }
 0x42f   : >> { %v1334_v54 = vadd.f32 %v1318_v6, %v1247_v10  ;;  %5917 = vst [vmem:[#allocation51_spill] sm:$0xff] %v5158_v4  ;;  %v1325_v40 = vmul.f32 %v5158_v4, %v1309_v37 }
 0x430   : >> { %1351 = vst.msk [vmem:[#allocation4 + $0x38] sm:$0xff] %vm442_vm0, %v1335_v53 }
 0x431   : >> { %1350 = vst.msk [vmem:[#allocation4 + $0x30] sm:$0xff] %vm442_vm0, %v1334_v54  ;;  %v3005_v62 = vpop.f32.mrb[8].mxu1 }
 0x432   : >> { %v1337_v50 = vadd.f32 %v3005_v62, %v1321_v39  ;;  %v1257_v5 = vpop.f32.mrb[9].mxu1  ;;  %v5161_v6 = vpop.eup %3564  ;;  %v1310_v39 = vld [vmem:[#allocation4 + $0x70] sm:$0xff] }
 0x433   : >> { %v1336_v43 = vadd.f32 %v1320_v38, %v1257_v5  ;;  %v5165_v42 = vpop.eup %3566  ;;  %v1324_v10 = vmul.f32 %v5161_v6, %v1308_v13 }
 0x434   : >> { %1353 = vst.msk [vmem:[#allocation4 + $0x48] sm:$0xff] %vm442_vm0, %v1337_v50  ;;  %5918 = vst [vmem:[#allocation52_spill] sm:$0xff] %v5165_v42  ;;  %v5168_v7 = vpop.eup %3568  ;;  %v1327_v38 = vmul.f32 %v5165_v42, %v1311_v19 }
 0x435   : >> { %1352 = vst.msk [vmem:[#allocation4 + $0x40] sm:$0xff] %vm442_vm0, %v1336_v43  ;;  %v3008_v34 = vpop.f32.mrb[10].mxu1  ;;  %5919 = vst [vmem:[#allocation53_spill] sm:$0xff] %v5168_v7  ;;  %v1326_v50 = vmul.f32 %v5168_v7, %v1310_v39 }
 0x436   : >> { %v1339_v48 = vadd.f32 %v3008_v34, %v1323_v41  ;;  %v1267_v24 = vpop.f32.mrb[11].mxu1  ;;  %v3634_v34 = vld [vmem:[%s4651_s29] ss:$0 sm:$0xff] }
 0x437   : >> { %v1338_v2 = vadd.f32 %v1322_v1, %v1267_v24 }
 0x438   : >> { %1355 = vst.msk [vmem:[#allocation4 + $0x58] sm:$0xff] %vm442_vm0, %v1339_v48 }
 0x439   : >> { %1354 = vst.msk [vmem:[#allocation4 + $0x50] sm:$0xff] %vm442_vm0, %v1338_v2 }
 0x43c   : >> { %v3011_v53 = vpop.f32.mrb[12].mxu1 }
 0x43d   : >> { %v1341_v18 = vadd.f32 %v3011_v53, %v1325_v40  ;;  %v1277_v54 = vpop.f32.mrb[13].mxu1 }
 0x43e   : >> { %v1340_v62 = vadd.f32 %v1324_v10, %v1277_v54 }
 0x43f   : >> { %1357 = vst.msk [vmem:[#allocation4 + $0x68] sm:$0xff] %vm442_vm0, %v1341_v18 }
 0x440   : >> { %1356 = vst.msk [vmem:[#allocation4 + $0x60] sm:$0xff] %vm442_vm0, %v1340_v62  ;;  %v3014_v61 = vpop.f32.mrb[14].mxu1 }
 0x441   : >> { %v1343_v5 = vadd.f32 %v3014_v61, %v1327_v38  ;;  %v1287_v23 = vpop.f32.mrb[15].mxu1 }
 0x442   : >> { %v1342_v43 = vadd.f32 %v1326_v50, %v1287_v23 }
 0x443   : >> { %1359 = vst.msk [vmem:[#allocation4 + $0x78] sm:$0xff] %vm442_vm0, %v1343_v5 }
 0x444   : >> { %1358 = vst.msk [vmem:[#allocation4 + $0x70] sm:$0xff] %vm442_vm0, %v1342_v43 }
 0x44d   : >> { %v3049_v41 = vpop.f32.mrb[16].mxu1 }
 0x44e   : >> { %v5177_v1 = vadd.f32 %v3634_v34, %v3049_v41  ;;  %v1554_v48 = vpop.f32.mrb[17].mxu1 }
 0x44f   : >> { %v5179_v24 = vadd.f32 %v3634_v34, %v1554_v48 }
 0x450   : >> { %1669 = vmax.xlane.f32.xlu0 %v5177_v1 }
 0x451   : >> { %v3052_v2 = vpop.f32.mrb[18].mxu1  ;;  %1667 = vmax.xlane.f32.xlu1 %v5179_v24 }
 0x452   : >> { %v5183_v37 = vadd.f32 %v3634_v34, %v3052_v2  ;;  %v1564_v13 = vpop.f32.mrb[19].mxu1 }
 0x453   : >> { %v5185_v40 = vadd.f32 %v3634_v34, %v1564_v13 }
 0x455   : >> { %v3055_v53 = vpop.f32.mrb[20].mxu1  ;;  %1671 = vmax.xlane.f32.xlu0 %v5185_v40  ;;  %1673 = vmax.xlane.f32.xlu1 %v5183_v37 }
 0x456   : >> { %v5189_v10 = vadd.f32 %v3634_v34, %v3055_v53  ;;  %v1574_v19 = vpop.f32.mrb[21].mxu1 }
 0x457   : >> { %v5191_v18 = vadd.f32 %v3634_v34, %v1574_v19 }
 0x459   : >> { %v3058_v54 = vpop.f32.mrb[22].mxu1  ;;  %1675 = vmax.xlane.f32.xlu0 %v5191_v18  ;;  %1677 = vmax.xlane.f32.xlu1 %v5189_v10 }
 0x45a   : >> { %v5195_v39 = vadd.f32 %v3634_v34, %v3058_v54  ;;  %v1584_v62 = vpop.f32.mrb[23].mxu1 }
 0x45b   : >> { %v5197_v38 = vadd.f32 %v3634_v34, %v1584_v62 }
 0x45d   : >> { %v3061_v61 = vpop.f32.mrb[24].mxu1  ;;  %1679 = vmax.xlane.f32.xlu0 %v5197_v38  ;;  %1681 = vmax.xlane.f32.xlu1 %v5195_v39 }
 0x45e   : >> { %v5201_v50 = vadd.f32 %v3634_v34, %v3061_v61  ;;  %v1594_v5 = vpop.f32.mrb[25].mxu1 }
 0x45f   : >> { %v5203_v23 = vadd.f32 %v3634_v34, %v1594_v5 }
 0x461   : >> { %v3064_v43 = vpop.f32.mrb[26].mxu1  ;;  %1683 = vmax.xlane.f32.xlu0 %v5203_v23  ;;  %1685 = vmax.xlane.f32.xlu1 %v5201_v50 }
 0x462   : >> { %v5207_v41 = vadd.f32 %v3634_v34, %v3064_v43  ;;  %v1604_v48 = vpop.f32.mrb[27].mxu1 }
 0x463   : >> { %v5209_v2 = vadd.f32 %v3634_v34, %v1604_v48  ;;  %v3635_v48 = vld [vmem:[%s4704_s23 + $0x10] sm:$0xff] }
 0x465   : >> { %v3067_v13 = vpop.f32.mrb[28].mxu1  ;;  %1687 = vmax.xlane.f32.xlu0 %v5209_v2  ;;  %1689 = vmax.xlane.f32.xlu1 %v5207_v41 }
 0x466   : >> { %v5213_v53 = vadd.f32 %v3634_v34, %v3067_v13  ;;  %v1614_v19 = vpop.f32.mrb[29].mxu1  ;;  %v3636_v13 = vld [vmem:[%s4704_s23 + $0x18] sm:$0xff] }
 0x467   : >> { %v5215_v54 = vadd.f32 %v3634_v34, %v1614_v19  ;;  %v3471_v20 = vpack.i.bf16 %v3636_v13, %v3635_v48  ;;  %v3637_v19 = vld [vmem:[%s4704_s23 + $0x20] sm:$0xff] }
 0x468   : >> { %v3476_v22 = vpack.i.bf16 %v3638_v21, %v3637_v19  ;;  %v5926_v48 = vld [vmem:[#allocation57_spill] sm:$0xff]  ;;  %v5928_v21 = vld [vmem:[#allocation54_spill] sm:$0xff] }
 0x469   : >> { %v3070_v62 = vpop.f32.mrb[30].mxu1  ;;  %1691 = vmax.xlane.f32.xlu0 %v5215_v54  ;;  %1693 = vmax.xlane.f32.xlu1 %v5213_v53 }
 0x46a   : >> { %v5219_v61 = vadd.f32 %v3634_v34, %v3070_v62  ;;  %v1624_v5 = vpop.f32.mrb[31].mxu1  ;;  %v5921_v62 = vld [vmem:[#allocation50_spill] sm:$0xff] }
 0x46b   : >> { %v5221_v43 = vadd.f32 %v3634_v34, %v1624_v5  ;;  %v3486_v27 = vpack.i.bf16 %v5921_v62, %v5920_v26  ;;  %v5922_v34 = vld [vmem:[#allocation47_spill] sm:$0xff]  ;;  %v5923_v5 = vld [vmem:[#allocation46_spill] sm:$0xff] }
 0x46c   : >> { %v5924_v28 = vpack.i.bf16 %v5922_v34, %v5923_v5  ;;  %v5247_v26 = vld [vmem:[#allocation2 + $0x88] sm:$0xff]  ;;  %v5261_v34 = vld [vmem:[#allocation2 + $0x90] sm:$0xff]  ;;  %v5263_v5 = vld [vmem:[#allocation2 + $0x98] sm:$0xff] }
 0x46d   : >> { %1695 = vmax.xlane.f32.xlu0 %v5221_v43  ;;  %1697 = vmax.xlane.f32.xlu1 %v5219_v61  ;;  %5930 = vst [vmem:[#allocation56_spill] sm:$0xff] %v5247_v26  ;;  %5934 = vst [vmem:[#allocation64_spill] sm:$0xff] %v5261_v34 }
 0x46e   : >> { %5935 = vst [vmem:[#allocation61_spill] sm:$0xff] %v5263_v5 }
 0x47e   : >> { %3472 = vrot.lane.b32.xlu1 %v3471_v20, %s3982_s20  ;;  %v5927_v20 = vld [vmem:[#allocation58_spill] sm:$0xff] }
 0x47f   : >> { %v3496_v13 = vpack.i.bf16 %v5927_v20, %v5926_v48  ;;  %v5311_v48 = vld [vmem:[#allocation2 + $0xc0] sm:$0xff] }
 0x480   : >> { %5946 = vst [vmem:[#allocation58_spill] sm:$0xff] %v5311_v48 }
 0x482   : >> { %3477 = vrot.lane.b32.xlu1 %v3476_v22, %s3982_s20  ;;  %v5929_v22 = vld [vmem:[#allocation55_spill] sm:$0xff] }
 0x483   : >> { %3467 = vrot.lane.b32.xlu0 %v5924_v28, %s3982_s20  ;;  %v3491_v19 = vpack.i.bf16 %v5929_v22, %v5928_v21  ;;  %v5249_v28 = vld [vmem:[#allocation2 + $0x80] sm:$0xff] }
 0x484   : >> { %5931 = vst [vmem:[#allocation59_spill] sm:$0xff] %v5249_v28 }
 0x486   : >> { %3487 = vrot.lane.b32.xlu1 %v3486_v27, %s3982_s20 }
 0x487   : >> { %3482 = vrot.lane.b32.xlu0 %v3481_v32, %s3982_s20 }
 0x48a   : >> { %3497 = vrot.lane.b32.xlu1 %v3496_v13, %s3982_s20 }
 0x48b   : >> { %3492 = vrot.lane.b32.xlu0 %v3491_v19, %s3982_s20  ;;  %v5275_v19 = vld [vmem:[#allocation2 + $0xa0] sm:$0xff] }
 0x48c   : >> { %5938 = vst [vmem:[#allocation63_spill] sm:$0xff] %v5275_v19 }
 0x4dd   : >> { %v1670_v62 = vpop.xlane.xlu0 %1669 }
 0x4de   : >> { %v5252_v30 = vmax.f32 %v5247_v26, %v1670_v62  ;;  %v1668_v27 = vpop.xlane.xlu1 %1667  ;;  %v5277_v62 = vld [vmem:[#allocation2 + $0xa8] sm:$0xff] }
 0x4df   : >> { %v5255_v31 = vmax.f32 %v5249_v28, %v1668_v27  ;;  %5939 = vst [vmem:[#allocation67_spill] sm:$0xff] %v5277_v62  ;;  %v5293_v27 = vld [vmem:[#allocation2 + $0xb0] sm:$0xff] }
 0x4e0   : >> { %5932 = vst [vmem:[#allocation60_spill] sm:$0xff] %v5252_v30  ;;  %1972 = vst [vmem:[#allocation2 + $0x88] sm:$0xff] %v5252_v30  ;;  %1770 = vperm.xlu1 %3425, %v5252_v30  }
 0x4e1   : >> { %5933 = vst [vmem:[#allocation62_spill] sm:$0xff] %v5255_v31  ;;  %1971 = vst [vmem:[#allocation2 + $0x80] sm:$0xff] %v5255_v31  ;;  %1765 = vperm.xlu0 %3424, %v5255_v31  }
 0x4e2   : >> { %v1672_v20 = vpop.xlane.xlu0 %1671  ;;  %v1674_v13 = vpop.xlane.xlu1 %1673  ;;  %5942 = vst [vmem:[#allocation47_spill] sm:$0xff] %v5293_v27 }
 0x4e3   : >> { %v5270_v21 = vmax.f32 %v5261_v34, %v1672_v20  ;;  %v5273_v22 = vmax.f32 %v5263_v5, %v1674_v13  ;;  %v5295_v34 = vld [vmem:[#allocation2 + $0xb8] sm:$0xff] }
 0x4e4   : >> { %5943 = vst [vmem:[#allocation46_spill] sm:$0xff] %v5295_v34 }
 0x4e5   : >> { %5936 = vst [vmem:[#allocation65_spill] sm:$0xff] %v5270_v21  ;;  %5937 = vst [vmem:[#allocation66_spill] sm:$0xff] %v5273_v22  ;;  %1775 = vperm.xlu1 %3425, %v5270_v21   ;;  %1780 = vperm.xlu0 %3424, %v5273_v22  }
 0x4e6   : >> { %1973 = vst [vmem:[#allocation2 + $0x90] sm:$0xff] %v5270_v21  ;;  %1974 = vst [vmem:[#allocation2 + $0x98] sm:$0xff] %v5273_v22  ;;  %v1676_v20 = vpop.xlane.xlu0 %1675  ;;  %v1678_v13 = vpop.xlane.xlu1 %1677 }
 0x4e7   : >> { %v5288_v32 = vmax.f32 %v5275_v19, %v1676_v20  ;;  %v5291_v33 = vmax.f32 %v5277_v62, %v1678_v13  ;;  %v5313_v19 = vld [vmem:[#allocation2 + $0xc8] sm:$0xff] }
 0x4e8   : >> { %5947 = vst [vmem:[#allocation54_spill] sm:$0xff] %v5313_v19 }
 0x4e9   : >> { %5940 = vst [vmem:[#allocation49_spill] sm:$0xff] %v5288_v32  ;;  %5941 = vst [vmem:[#allocation50_spill] sm:$0xff] %v5291_v33  ;;  %1785 = vperm.xlu0 %3424, %v5288_v32   ;;  %1790 = vperm.xlu1 %3425, %v5291_v33  }
 0x4ea   : >> { %1975 = vst [vmem:[#allocation2 + $0xa0] sm:$0xff] %v5288_v32  ;;  %1976 = vst [vmem:[#allocation2 + $0xa8] sm:$0xff] %v5291_v33  ;;  %v1680_v20 = vpop.xlane.xlu0 %1679  ;;  %v1682_v13 = vpop.xlane.xlu1 %1681  ;;  %v5331_v32 = vld [vmem:[#allocation2 + $0xd8] sm:$0xff] }
 0x4eb   : >> { %v5306_v22 = vmax.f32 %v5293_v27, %v1680_v20  ;;  %v5309_v5 = vmax.f32 %v5295_v34, %v1682_v13  ;;  %v5329_v27 = vld [vmem:[#allocation2 + $0xd0] sm:$0xff]  ;;  %5951 = vst [vmem:[#allocation70_spill] sm:$0xff] %v5331_v32 }
 0x4ec   : >> { %5950 = vst [vmem:[#allocation69_spill] sm:$0xff] %v5329_v27 }
 0x4ed   : >> { %5944 = vst [vmem:[#allocation48_spill] sm:$0xff] %v5306_v22  ;;  %5945 = vst [vmem:[#allocation57_spill] sm:$0xff] %v5309_v5  ;;  %1795 = vperm.xlu1 %3425, %v5306_v22   ;;  %1800 = vperm.xlu0 %3424, %v5309_v5  }
 0x4ee   : >> { %1977 = vst [vmem:[#allocation2 + $0xb0] sm:$0xff] %v5306_v22  ;;  %1978 = vst [vmem:[#allocation2 + $0xb8] sm:$0xff] %v5309_v5  ;;  %v1684_v20 = vpop.xlane.xlu0 %1683  ;;  %v1686_v13 = vpop.xlane.xlu1 %1685  ;;  %v5351_v5 = vld [vmem:[#allocation2 + $0xe8] sm:$0xff] }
 0x4ef   : >> { %v5324_v62 = vmax.f32 %v5311_v48, %v1684_v20  ;;  %v5327_v21 = vmax.f32 %v5313_v19, %v1686_v13  ;;  %v3640_v20 = vld [vmem:[%s4704_s23 + $0x70] sm:$0xff]  ;;  %v3641_v13 = vld [vmem:[%s4704_s23 + $0x78] sm:$0xff]  ;;  %v5349_v48 = vld [vmem:[#allocation2 + $0xe0] sm:$0xff]  ;;  %5955 = vst [vmem:[#allocation74_spill] sm:$0xff] %v5351_v5 }
 0x4f0   : >> { %v3501_v34 = vpack.i.bf16 %v3641_v13, %v3640_v20  ;;  %5954 = vst [vmem:[#allocation73_spill] sm:$0xff] %v5349_v48  ;;  %v5367_v19 = vld [vmem:[#allocation2 + $0xf0] sm:$0xff] }
 0x4f1   : >> { %5948 = vst [vmem:[#allocation55_spill] sm:$0xff] %v5324_v62  ;;  %5949 = vst [vmem:[#allocation68_spill] sm:$0xff] %v5327_v21  ;;  %1805 = vperm.xlu0 %3424, %v5324_v62   ;;  %1810 = vperm.xlu1 %3425, %v5327_v21  }
 0x4f2   : >> { %1979 = vst [vmem:[#allocation2 + $0xc0] sm:$0xff] %v5324_v62  ;;  %1980 = vst [vmem:[#allocation2 + $0xc8] sm:$0xff] %v5327_v21  ;;  %v1688_v22 = vpop.xlane.xlu0 %1687  ;;  %v1690_v31 = vpop.xlane.xlu1 %1689 }
 0x4f3   : >> { %v5344_v28 = vmax.f32 %v5329_v27, %v1688_v22  ;;  %v5347_v33 = vmax.f32 %v5331_v32, %v1690_v31  ;;  %5958 = vst [vmem:[#allocation77_spill] sm:$0xff] %v5367_v19  ;;  %v5369_v27 = vld [vmem:[#allocation2 + $0xf8] sm:$0xff] }
 0x4f4   : >> { %5959 = vst [vmem:[#allocation78_spill] sm:$0xff] %v5369_v27 }
 0x4f5   : >> { %5952 = vst [vmem:[#allocation71_spill] sm:$0xff] %v5344_v28  ;;  %5953 = vst [vmem:[#allocation72_spill] sm:$0xff] %v5347_v33  ;;  %3502 = vrot.lane.b32.xlu0 %v3501_v34, %s3982_s20  ;;  %1815 = vperm.xlu1 %3425, %v5344_v28  }
 0x4f6   : >> { %1981 = vst [vmem:[#allocation2 + $0xd0] sm:$0xff] %v5344_v28  ;;  %1982 = vst [vmem:[#allocation2 + $0xd8] sm:$0xff] %v5347_v33  ;;  %v1692_v31 = vpop.xlane.xlu0 %1691  ;;  %v1694_v20 = vpop.xlane.xlu1 %1693 }
 0x4f7   : >> { %v5362_v13 = vmax.f32 %v5349_v48, %v1692_v31  ;;  %v5365_v21 = vmax.f32 %v5351_v5, %v1694_v20 }
 0x4f9   : >> { %5956 = vst [vmem:[#allocation75_spill] sm:$0xff] %v5362_v13  ;;  %5957 = vst [vmem:[#allocation76_spill] sm:$0xff] %v5365_v21  ;;  %1825 = vperm.xlu1 %3425, %v5362_v13   ;;  %1820 = vperm.xlu0 %3424, %v5347_v33  }
 0x4fa   : >> { %1983 = vst [vmem:[#allocation2 + $0xe0] sm:$0xff] %v5362_v13  ;;  %1984 = vst [vmem:[#allocation2 + $0xe8] sm:$0xff] %v5365_v21  ;;  %v1696_v20 = vpop.xlane.xlu0 %1695  ;;  %v1698_v22 = vpop.xlane.xlu1 %1697 }
 0x4fb   : >> { %v5380_v32 = vmax.f32 %v5367_v19, %v1696_v20  ;;  %v5383_v28 = vmax.f32 %v5369_v27, %v1698_v22 }
 0x4fd   : >> { %5960 = vst [vmem:[#allocation79_spill] sm:$0xff] %v5380_v32  ;;  %1985 = vst [vmem:[#allocation2 + $0xf0] sm:$0xff] %v5380_v32  ;;  %1835 = vperm.xlu1 %3425, %v5380_v32   ;;  %1830 = vperm.xlu0 %3424, %v5365_v21  }
 0x4fe   : >> { %1986 = vst [vmem:[#allocation2 + $0xf8] sm:$0xff] %v5383_v28  ;;  %v3468_v5 = vpop.permute.xlu0 %3467  ;;  %v3473_v20 = vpop.permute.xlu1 %3472 }
 0x4ff   : >> { %v3470_v13 = vunpack.i.h.bf16 %v3468_v5  ;;  %v3469_v48 = vunpack.i.l.bf16 %v3468_v5  ;;  %v3475_v22 = vunpack.i.h.bf16 %v3473_v20  ;;  %v3474_v33 = vunpack.i.l.bf16 %v3473_v20 }
 0x501   : >> { %1840 = vperm.xlu0 %3424, %v5383_v28   ;;  %v3255_v34 = vpack.c.bf16 %v3470_v13, %v3469_v48  ;;  %v3259_v19 = vpack.c.bf16 %v3475_v22, %v3474_v33 }
 0x502   : >> { %v3478_v62 = vpop.permute.xlu1 %3477  ;;  %v3483_v30 = vpop.permute.xlu0 %3482 }
 0x503   : >> { %3256 = vmatprep.subr.bf16.mxu0 %v3255_v34  ;;  %v3480_v32 = vunpack.i.h.bf16 %v3478_v62  ;;  %v3479_v21 = vunpack.i.l.bf16 %v3478_v62  ;;  %v3485_v31 = vunpack.i.h.bf16 %v3483_v30  ;;  %v3484_v27 = vunpack.i.l.bf16 %v3483_v30 }
 0x504   : >> { %3258 = vmatpush3.bf16.msra.mxu0 %v3255_v34 }
 0x505   : >> { %v3263_v26 = vpack.c.bf16 %v3480_v32, %v3479_v21  ;;  %3260 = vmatprep.subr.bf16.mxu0 %v3259_v19  ;;  %v3267_v7 = vpack.c.bf16 %v3485_v31, %v3484_v27 }
 0x506   : >> { %v3488_v42 = vpop.permute.xlu1 %3487  ;;  %v3493_v4 = vpop.permute.xlu0 %3492 }
 0x507   : >> { %v3490_v5 = vunpack.i.h.bf16 %v3488_v42  ;;  %v3489_v20 = vunpack.i.l.bf16 %v3488_v42  ;;  %v3495_v33 = vunpack.i.h.bf16 %v3493_v4  ;;  %v3494_v13 = vunpack.i.l.bf16 %v3493_v4 }
 0x508   : >> { %3262 = vmatpush3.bf16.msra.mxu0 %v3259_v19 }
 0x509   : >> { %3264 = vmatprep.subr.bf16.mxu0 %v3263_v26  ;;  %v3271_v48 = vpack.c.bf16 %v3490_v5, %v3489_v20  ;;  %v3275_v62 = vpack.c.bf16 %v3495_v33, %v3494_v13 }
 0x50a   : >> { %v3498_v22 = vpop.permute.xlu1 %3497 }
 0x50b   : >> { %v3500_v32 = vunpack.i.h.bf16 %v3498_v22  ;;  %v3499_v21 = vunpack.i.l.bf16 %v3498_v22 }
 0x50c   : >> { %3266 = vmatpush3.bf16.msra.mxu0 %v3263_v26 }
 0x50d   : >> { %3268 = vmatprep.subr.bf16.mxu0 %v3267_v7  ;;  %v3279_v30 = vpack.c.bf16 %v3500_v32, %v3499_v21 }
 0x510   : >> { %3270 = vmatpush3.bf16.msra.mxu0 %v3267_v7 }
 0x511   : >> { %3272 = vmatprep.subr.bf16.mxu0 %v3271_v48 }
 0x514   : >> { %3274 = vmatpush3.bf16.msra.mxu0 %v3271_v48 }
 0x515   : >> { %3276 = vmatprep.subr.bf16.mxu0 %v3275_v62 }
 0x518   : >> { %3278 = vmatpush3.bf16.msra.mxu0 %v3275_v62 }
 0x519   : >> { %3280 = vmatprep.subr.bf16.mxu0 %v3279_v30 }
 0x51c   : >> { %3282 = vmatpush3.bf16.msra.mxu0 %v3279_v30 }
 0x520   : >> { %1073 = vadd.xlane.f32.xlu0 %v4959_v3 }
 0x521   : >> { %1071 = vadd.xlane.f32.xlu1 %v4956_v8 }
 0x524   : >> { %1075 = vadd.xlane.f32.xlu0 %v4981_v11 }
 0x525   : >> { %1077 = vadd.xlane.f32.xlu1 %v4983_v17 }
 0x528   : >> { %1079 = vadd.xlane.f32.xlu0 %v4993_v55 }
 0x529   : >> { %1081 = vadd.xlane.f32.xlu1 %v4995_v47 }
 0x52c   : >> { %1083 = vadd.xlane.f32.xlu0 %v4998_v63 }
 0x52d   : >> { %1085 = vadd.xlane.f32.xlu1 %v5003_v14 }
 0x530   : >> { %1087 = vadd.xlane.f32.xlu0 %v5011_v0 }
 0x531   : >> { %1089 = vadd.xlane.f32.xlu1 %v5015_v16 }
 0x534   : >> { %1091 = vadd.xlane.f32.xlu0 %v5020_v25 }
 0x535   : >> { %1093 = vadd.xlane.f32.xlu1 %v5022_v57 }
 0x538   : >> { %1095 = vadd.xlane.f32.xlu0 %v5025_v51 }
 0x539   : >> { %1097 = vadd.xlane.f32.xlu1 %v5033_v56 }
 0x53c   : >> { %1099 = vadd.xlane.f32.xlu0 %v5035_v12 }
 0x53d   : >> { %1101 = vadd.xlane.f32.xlu1 %v5041_v35 }
 0x55f   : >> { %v1771_v8 = vpop.permute.xlu1 %1770 }
 0x560   : >> { %v1844_v3 = vsub.f32 %v5177_v1, %v1771_v8  ;;  %v1766_v11 = vpop.permute.xlu0 %1765 }
 0x561   : >> { %v1843_v17 = vsub.f32 %v5179_v24, %v1766_v11 }
 0x562   : >> { %v1861_v55 = vmul.f32 1.442695, %v1844_v3 }
 0x563   : >> { %v1859_v47 = vmul.f32 1.442695, %v1843_v17 }
 0x564   : >> { %3570 = vpow2.f32 %v1861_v55  ;;  %v1781_v63 = vpop.permute.xlu0 %1780  ;;  %v1776_v14 = vpop.permute.xlu1 %1775 }
 0x565   : >> { %3572 = vpow2.f32 %v1859_v47  ;;  %v1846_v0 = vsub.f32 %v5183_v37, %v1781_v63  ;;  %v1845_v16 = vsub.f32 %v5185_v40, %v1776_v14 }
 0x567   : >> { %v1865_v25 = vmul.f32 1.442695, %v1846_v0  ;;  %v1863_v57 = vmul.f32 1.442695, %v1845_v16 }
 0x568   : >> { %v1786_v51 = vpop.permute.xlu0 %1785  ;;  %v1791_v56 = vpop.permute.xlu1 %1790 }
 0x569   : >> { %3574 = vpow2.f32 %v1865_v25  ;;  %v1847_v12 = vsub.f32 %v5191_v18, %v1786_v51  ;;  %v1848_v35 = vsub.f32 %v5189_v10, %v1791_v56 }
 0x56a   : >> { %3576 = vpow2.f32 %v1863_v57 }
 0x56b   : >> { %v1867_v4 = vmul.f32 1.442695, %v1847_v12  ;;  %v1869_v42 = vmul.f32 1.442695, %v1848_v35 }
 0x56c   : >> { %v1801_v7 = vpop.permute.xlu0 %1800  ;;  %v1796_v1 = vpop.permute.xlu1 %1795 }
 0x56d   : >> { %3578 = vpow2.f32 %v1867_v4  ;;  %v1850_v24 = vsub.f32 %v5195_v39, %v1801_v7  ;;  %v1849_v37 = vsub.f32 %v5197_v38, %v1796_v1  ;;  %v816_v7 = vld [vmem:[#allocation3 + $0x8] sm:$0xff]  ;;  %v815_v1 = vld [vmem:[#allocation3] sm:$0xff] }
 0x56e   : >> { %v3571_v40 = vpop.eup %3570  ;;  %3580 = vpow2.f32 %v1869_v42 }
 0x56f   : >> { %v3573_v26 = vpop.eup %3572  ;;  %v1873_v19 = vmul.f32 1.442695, %v1850_v24  ;;  %v1871_v27 = vmul.f32 1.442695, %v1849_v37  ;;  %1909 = vadd.xlane.f32.xlu1 %v3571_v40  ;;  %v1056_v24 = vmul.f32 %v5070_v15, %v816_v7  ;;  %v5963_v7 = vld [vmem:[#allocation52_spill] sm:$0xff] }
 0x570   : >> { %3103 = vmatprep.mubr.f32.mxu0 %v3573_v26  ;;  %v1806_v18 = vpop.permute.xlu0 %1805  ;;  %1907 = vadd.xlane.f32.xlu0 %v3573_v26  ;;  %v1811_v10 = vpop.permute.xlu1 %1810  ;;  %v817_v26 = vld [vmem:[#allocation3 + $0x10] sm:$0xff] }
 0x571   : >> { %3582 = vpow2.f32 %v1873_v19  ;;  %v1851_v34 = vsub.f32 %v5203_v23, %v1806_v18  ;;  %v1852_v31 = vsub.f32 %v5201_v50, %v1811_v10  ;;  %v818_v18 = vld [vmem:[#allocation3 + $0x18] sm:$0xff] }
 0x572   : >> { %3584 = vpow2.f32 %v1871_v27 }
 0x573   : >> { %v3575_v5 = vpop.eup %3574  ;;  %v1875_v39 = vmul.f32 1.442695, %v1851_v34  ;;  %v1877_v20 = vmul.f32 1.442695, %v1852_v31  ;;  %v1057_v34 = vmul.f32 %v5098_v9, %v817_v26  ;;  %v822_v9 = vld [vmem:[#allocation3 + $0x38] sm:$0xff] }
 0x574   : >> { %v3577_v38 = vpop.eup %3576  ;;  %v3503_v48 = vpop.permute.xlu0 %3502  ;;  %1913 = vadd.xlane.f32.xlu1 %v3575_v5  ;;  %v5965_v26 = vld [vmem:[#allocation60_spill] sm:$0xff] }
 0x575   : >> { %v1816_v33 = vpop.permute.xlu1 %1815  ;;  %3586 = vpow2.f32 %v1875_v39  ;;  %v3505_v13 = vunpack.i.h.bf16 %v3503_v48  ;;  %v3504_v22 = vunpack.i.l.bf16 %v3503_v48  ;;  %1911 = vadd.xlane.f32.xlu0 %v3577_v38  ;;  %v819_v39 = vld [vmem:[#allocation3 + $0x20] sm:$0xff]  ;;  %v820_v48 = vld [vmem:[#allocation3 + $0x28] sm:$0xff] }
 0x576   : >> { %v1853_v62 = vsub.f32 %v5209_v2, %v1816_v33  ;;  %3588 = vpow2.f32 %v1877_v20 }
 0x577   : >> { %v3579_v32 = vpop.eup %3578  ;;  %v3283_v21 = vpack.c.bf16 %v3505_v13, %v3504_v22  ;;  %v1060_v13 = vmul.f32 %v5115_v46, %v820_v48  ;;  %v821_v22 = vld [vmem:[#allocation3 + $0x30] sm:$0xff] }
 0x578   : >> { %v1879_v23 = vmul.f32 1.442695, %v1853_v62  ;;  %v3581_v30 = vpop.eup %3580  ;;  %v1821_v50 = vpop.permute.xlu0 %1820  ;;  %v5973_v48 = vld [vmem:[#allocation64_spill] sm:$0xff] }
 0x579   : >> { %v1826_v8 = vpop.permute.xlu1 %1825  ;;  %v1854_v3 = vsub.f32 %v5207_v41, %v1821_v50  ;;  %1915 = vadd.xlane.f32.xlu0 %v3579_v32  ;;  %1917 = vadd.xlane.f32.xlu1 %v3581_v30  ;;  %v823_v50 = vld [vmem:[#allocation3 + $0x40] sm:$0xff] }
 0x57a   : >> { %3590 = vpow2.f32 %v1879_v23  ;;  %v1855_v11 = vsub.f32 %v5215_v54, %v1826_v8  ;;  %3284 = vmatprep.subr.bf16.mxu0 %v3283_v21  ;;  %v1063_v46 = vmul.f32 %v5138_v44, %v823_v50  ;;  %v828_v44 = vld [vmem:[#allocation3 + $0x68] sm:$0xff]  ;;  %v5983_v50 = vld [vmem:[#allocation48_spill] sm:$0xff] }
 0x57b   : >> { %v3583_v17 = vpop.eup %3582  ;;  %v1881_v55 = vmul.f32 1.442695, %v1854_v3  ;;  %3286 = vmatpush3.bf16.msra.mxu0 %v3283_v21 }
 0x57c   : >> { %v1883_v47 = vmul.f32 1.442695, %v1855_v11  ;;  %v3585_v2 = vpop.eup %3584  ;;  %v1831_v63 = vpop.permute.xlu0 %1830 }
 0x57d   : >> { %v1836_v14 = vpop.permute.xlu1 %1835  ;;  %3592 = vpow2.f32 %v1881_v55  ;;  %v1856_v0 = vsub.f32 %v5213_v53, %v1831_v63  ;;  %1921 = vadd.xlane.f32.xlu1 %v3583_v17  ;;  %1919 = vadd.xlane.f32.xlu0 %v3585_v2 }
 0x57e   : >> { %v1857_v16 = vsub.f32 %v5221_v43, %v1836_v14  ;;  %3594 = vpow2.f32 %v1883_v47  ;;  %3104 = vmatmul.mubr.f32.vlgmr.msra.gmra.mrb[16].mxu0 %v3571_v40  ;;  %v1055_v40 = vmul.f32 %v5072_v49, %v815_v1  ;;  %v1059_v49 = vmul.f32 %v5118_v52, %v819_v39  ;;  %v824_v52 = vld [vmem:[#allocation3 + $0x48] sm:$0xff]  ;;  %v825_v47 = vld [vmem:[#allocation3 + $0x50] sm:$0xff] }
 0x57f   : >> { %v3587_v41 = vpop.eup %3586  ;;  %v1885_v25 = vmul.f32 1.442695, %v1856_v0  ;;  %3106 = vmatprep.mubr.f32.mxu0 %v3577_v38  ;;  %v1064_v55 = vmul.f32 %v5134_v58, %v824_v52  ;;  %v5971_v39 = vld [vmem:[#allocation66_spill] sm:$0xff] }
 0x580   : >> { %v1887_v54 = vmul.f32 1.442695, %v1857_v16  ;;  %v3589_v57 = vpop.eup %3588  ;;  %v1841_v51 = vpop.permute.xlu0 %1840 }
 0x581   : >> { %3596 = vpow2.f32 %v1885_v25  ;;  %v1858_v56 = vsub.f32 %v5219_v61, %v1841_v51  ;;  %1923 = vadd.xlane.f32.xlu0 %v3587_v41  ;;  %1925 = vadd.xlane.f32.xlu1 %v3589_v57 }
 0x582   : >> { %3598 = vpow2.f32 %v1887_v54  ;;  %3107 = vmatmul.mubr.f32.gmra.mrb[18].mxu0 %v3575_v5  ;;  %v1058_v5 = vmul.f32 %v5096_v59, %v818_v18  ;;  %v1061_v59 = vmul.f32 %v5124_v45, %v821_v22  ;;  %v826_v45 = vld [vmem:[#allocation3 + $0x58] sm:$0xff]  ;;  %v5967_v18 = vld [vmem:[#allocation59_spill] sm:$0xff] }
 0x583   : >> { %v1889_v12 = vmul.f32 1.442695, %v1858_v56  ;;  %3109 = vmatprep.mubr.f32.mxu0 %v3579_v32  ;;  %v1066_v16 = vmul.f32 %v5148_v36, %v826_v45  ;;  %v5961_v56 = vld [vmem:[#allocation51_spill] sm:$0xff]  ;;  %v5977_v22 = vld [vmem:[#allocation49_spill] sm:$0xff]  ;;  %v5988_v45 = vld [vmem:[#allocation58_spill] sm:$0xff] }
 0x584   : >> { %v3591_v53 = vpop.eup %3590 }
 0x585   : >> { %3600 = vpow2.f32 %v1889_v12  ;;  %1927 = vadd.xlane.f32.xlu0 %v3591_v53  ;;  %v829_v12 = vld [vmem:[#allocation3 + $0x70] sm:$0xff] }
 0x586   : >> { %3110 = vmatmul.mubr.f32.gmra.mrb[20].mxu0 %v3581_v30  ;;  %v1062_v30 = vmul.f32 %v5121_v29, %v822_v9  ;;  %v1065_v29 = vmul.f32 %v5152_v60, %v825_v47  ;;  %v830_v60 = vld [vmem:[#allocation3 + $0x78] sm:$0xff]  ;;  %v5979_v9 = vld [vmem:[#allocation67_spill] sm:$0xff] }
 0x587   : >> { %v3593_v43 = vpop.eup %3592  ;;  %3112 = vmatprep.mubr.f32.mxu0 %v3585_v2  ;;  %v1070_v1 = vmul.f32 %v5963_v7, %v830_v60  ;;  %v1652_v47 = vld [vmem:[#allocation3 + $0x88] sm:$0xff]  ;;  %v1653_v60 = vld [vmem:[#allocation3 + $0x90] sm:$0xff] }
 0x588   : >> { %v3595_v35 = vpop.eup %3594  ;;  %1929 = vadd.xlane.f32.xlu1 %v3593_v43 }
 0x589   : >> { %1931 = vadd.xlane.f32.xlu0 %v3595_v35 }
 0x58a   : >> { %3113 = vmatmul.mubr.f32.gmra.mrb[22].mxu0 %v3583_v17 }
 0x58b   : >> { %v3597_v4 = vpop.eup %3596  ;;  %3115 = vmatprep.mubr.f32.mxu0 %v3587_v41  ;;  %v827_v41 = vld [vmem:[#allocation3 + $0x60] sm:$0xff] }
 0x58c   : >> { %v3599_v42 = vpop.eup %3598  ;;  %1933 = vadd.xlane.f32.xlu1 %v3597_v4  ;;  %v1067_v58 = vmul.f32 %v5161_v6, %v827_v41  ;;  %v5964_v6 = vld [vmem:[#allocation56_spill] sm:$0xff]  ;;  %v5991_v41 = vld [vmem:[#allocation54_spill] sm:$0xff] }
 0x58d   : >> { %1935 = vadd.xlane.f32.xlu0 %v3599_v42 }
 0x58e   : >> { %3116 = vmatmul.mubr.f32.gmra.mrb[24].mxu0 %v3589_v57 }
 0x58f   : >> { %v3601_v61 = vpop.eup %3600  ;;  %3118 = vmatprep.mubr.f32.mxu0 %v3591_v53  ;;  %v1068_v53 = vmul.f32 %v5961_v56, %v828_v44 }
 0x590   : >> { %1937 = vadd.xlane.f32.xlu1 %v3601_v61 }
 0x592   : >> { %3119 = vmatmul.mubr.f32.gmra.mrb[26].mxu0 %v3593_v43 }
 0x593   : >> { %3121 = vmatprep.mubr.f32.mxu0 %v3595_v35 }
 0x596   : >> { %3122 = vmatmul.mubr.f32.gmra.mrb[28].mxu0 %v3597_v4 }
 0x597   : >> { %3124 = vmatprep.mubr.f32.mxu0 %v3599_v42  ;;  %v5962_v42 = vld [vmem:[#allocation53_spill] sm:$0xff] }
 0x598   : >> { %v1069_v36 = vmul.f32 %v5962_v42, %v829_v12  ;;  %v1654_v12 = vld [vmem:[#allocation3 + $0x98] sm:$0xff]  ;;  %v5995_v42 = vld [vmem:[#allocation71_spill] sm:$0xff] }
 0x59a   : >> { %3125 = vmatmul.mubr.f32.gmra.mrb[30].mxu0 %v3601_v61 }
 0x5ad   : >> { %v1074_v37 = vpop.xlane.xlu0 %1073 }
 0x5ae   : >> { %v1104_v19 = vadd.f32 %v1074_v37, %v1056_v24  ;;  %v1072_v27 = vpop.xlane.xlu1 %1071 }
 0x5af   : >> { %v1103_v10 = vadd.f32 %v1072_v27, %v1055_v40 }
 0x5b0   : >> { %1120 = vst [vmem:[#allocation3 + $0x8] sm:$0xff] %v1104_v19  ;;  %v5966_v19 = vsub.f32 %v5964_v6, %v5965_v26 }
 0x5b1   : >> { %1119 = vst [vmem:[#allocation3] sm:$0xff] %v1103_v10  ;;  %v1076_v31 = vpop.xlane.xlu0 %1075  ;;  %v5968_v10 = vld [vmem:[#allocation62_spill] sm:$0xff] }
 0x5b2   : >> { %v1105_v20 = vadd.f32 %v1076_v31, %v1057_v34  ;;  %v1078_v38 = vpop.xlane.xlu1 %1077  ;;  %v1733_v27 = vmul.f32 1.442695, %v5966_v19  ;;  %v5969_v34 = vsub.f32 %v5967_v18, %v5968_v10  ;;  %v1655_v19 = vld [vmem:[#allocation3 + $0xa0] sm:$0xff]  ;;  %v5998_v10 = vld [vmem:[#allocation72_spill] sm:$0xff] }
 0x5b3   : >> { %v1106_v15 = vadd.f32 %v1078_v38, %v1058_v5  ;;  %v5970_v5 = vld [vmem:[#allocation61_spill] sm:$0xff]  ;;  %v5997_v18 = vld [vmem:[#allocation70_spill] sm:$0xff] }
 0x5b4   : >> { %1121 = vst [vmem:[#allocation3 + $0x10] sm:$0xff] %v1105_v20  ;;  %v1731_v31 = vmul.f32 1.442695, %v5969_v34  ;;  %3602 = vpow2.f32 %v1733_v27  ;;  %v5972_v20 = vsub.f32 %v5970_v5, %v5971_v39  ;;  %v1656_v27 = vld [vmem:[#allocation3 + $0xa8] sm:$0xff]  ;;  %v5999_v34 = vsub.f32 %v5997_v18, %v5998_v10  ;;  %v6000_v39 = vld [vmem:[#allocation73_spill] sm:$0xff] }
 0x5b5   : >> { %1122 = vst [vmem:[#allocation3 + $0x18] sm:$0xff] %v1106_v15  ;;  %v1080_v33 = vpop.xlane.xlu0 %1079  ;;  %v5974_v15 = vld [vmem:[#allocation65_spill] sm:$0xff]  ;;  %v1664_v10 = vld [vmem:[#allocation3 + $0xe8] sm:$0xff] }
 0x5b6   : >> { %v1107_v62 = vadd.f32 %v1080_v33, %v1059_v49  ;;  %v1082_v32 = vpop.xlane.xlu1 %1081  ;;  %3604 = vpow2.f32 %v1731_v31  ;;  %v1737_v38 = vmul.f32 1.442695, %v5972_v20  ;;  %v5975_v49 = vsub.f32 %v5973_v48, %v5974_v15  ;;  %v6001_v20 = vld [vmem:[#allocation75_spill] sm:$0xff] }
 0x5b7   : >> { %v1108_v21 = vadd.f32 %v1082_v32, %v1060_v13  ;;  %v5976_v13 = vld [vmem:[#allocation63_spill] sm:$0xff]  ;;  %v1753_v31 = vmul.f32 1.442695, %v5999_v34 }
 0x5b8   : >> { %1123 = vst [vmem:[#allocation3 + $0x20] sm:$0xff] %v1107_v62  ;;  %v1735_v33 = vmul.f32 1.442695, %v5975_v49  ;;  %3606 = vpow2.f32 %v1737_v38  ;;  %v5978_v62 = vsub.f32 %v5976_v13, %v5977_v22  ;;  %v6002_v38 = vsub.f32 %v6000_v39, %v6001_v20  ;;  %v1665_v39 = vld [vmem:[#allocation3 + $0xf0] sm:$0xff] }
 0x5b9   : >> { %1124 = vst [vmem:[#allocation3 + $0x28] sm:$0xff] %v1108_v21  ;;  %v1084_v23 = vpop.xlane.xlu0 %1083  ;;  %v5980_v21 = vld [vmem:[#allocation50_spill] sm:$0xff] }
 0x5ba   : >> { %v1109_v8 = vadd.f32 %v1084_v23, %v1061_v59  ;;  %v1086_v3 = vpop.xlane.xlu1 %1085  ;;  %v1739_v32 = vmul.f32 1.442695, %v5978_v62  ;;  %3608 = vpow2.f32 %v1735_v33  ;;  %v5981_v59 = vsub.f32 %v5979_v9, %v5980_v21  ;;  %v1658_v9 = vld [vmem:[#allocation3 + $0xb8] sm:$0xff]  ;;  %v6003_v21 = vld [vmem:[#allocation74_spill] sm:$0xff] }
 0x5bb   : >> { %v1110_v11 = vadd.f32 %v1086_v3, %v1062_v30  ;;  %v5982_v30 = vld [vmem:[#allocation47_spill] sm:$0xff]  ;;  %v1755_v48 = vmul.f32 1.442695, %v6002_v38 }
 0x5bc   : >> { %1125 = vst [vmem:[#allocation3 + $0x30] sm:$0xff] %v1109_v8  ;;  %v1741_v23 = vmul.f32 1.442695, %v5981_v59  ;;  %3610 = vpow2.f32 %v1739_v32  ;;  %v5984_v8 = vsub.f32 %v5982_v30, %v5983_v50  ;;  %v1657_v32 = vld [vmem:[#allocation3 + $0xb0] sm:$0xff] }
 0x5bd   : >> { %1126 = vst [vmem:[#allocation3 + $0x38] sm:$0xff] %v1110_v11  ;;  %v1088_v17 = vpop.xlane.xlu0 %1087  ;;  %v5985_v11 = vld [vmem:[#allocation46_spill] sm:$0xff]  ;;  %v6004_v59 = vld [vmem:[#allocation76_spill] sm:$0xff] }
 0x5be   : >> { %v1111_v2 = vadd.f32 %v1088_v17, %v1063_v46  ;;  %v1090_v63 = vpop.xlane.xlu1 %1089  ;;  %v1743_v3 = vmul.f32 1.442695, %v5984_v8  ;;  %v5463_v52 = vpop.eup %3602  ;;  %3612 = vpow2.f32 %v1741_v23  ;;  %v5986_v46 = vld [vmem:[#allocation57_spill] sm:$0xff]  ;;  %v6005_v23 = vsub.f32 %v6003_v21, %v6004_v59 }
 0x5bf   : >> { %v1112_v14 = vadd.f32 %v1090_v63, %v1064_v55  ;;  %v5987_v17 = vsub.f32 %v5985_v11, %v5986_v46  ;;  %v1651_v63 = vld [vmem:[#allocation3 + $0x80] sm:$0xff]  ;;  %v6007_v11 = vld [vmem:[#allocation79_spill] sm:$0xff] }
 0x5c0   : >> { %1127 = vst [vmem:[#allocation3 + $0x40] sm:$0xff] %v1111_v2  ;;  %v5468_v2 = vpop.eup %3604  ;;  %3614 = vpow2.f32 %v1743_v3  ;;  %v1757_v30 = vmul.f32 1.442695, %v6005_v23  ;;  %v6006_v3 = vld [vmem:[#allocation77_spill] sm:$0xff] }
 0x5c1   : >> { %1128 = vst [vmem:[#allocation3 + $0x48] sm:$0xff] %v1112_v14  ;;  %v1092_v0 = vpop.xlane.xlu0 %1091  ;;  %v1745_v55 = vmul.f32 1.442695, %v5987_v17  ;;  %v5989_v14 = vld [vmem:[#allocation55_spill] sm:$0xff]  ;;  %v6008_v46 = vsub.f32 %v6006_v3, %v6007_v11 }
 0x5c2   : >> { %v1113_v25 = vadd.f32 %v1092_v0, %v1065_v29  ;;  %v1094_v54 = vpop.xlane.xlu1 %1093  ;;  %v5990_v29 = vsub.f32 %v5988_v45, %v5989_v14 }
 0x5c3   : >> { %v1114_v57 = vadd.f32 %v1094_v54, %v1066_v16  ;;  %v1892_v16 = vmul.f32 %v5463_v52, %v1652_v47  ;;  %3616 = vpow2.f32 %v1745_v55  ;;  %v1759_v17 = vmul.f32 1.442695, %v6008_v46  ;;  %v2200_v46 = vld [vmem:[#allocation4 + $0x98] sm:$0xff] }
 0x5c4   : >> { %1129 = vst [vmem:[#allocation3 + $0x50] sm:$0xff] %v1113_v25  ;;  %v1747_v0 = vmul.f32 1.442695, %v5990_v29  ;;  %v5992_v25 = vld [vmem:[#allocation68_spill] sm:$0xff] }
 0x5c5   : >> { %1130 = vst [vmem:[#allocation3 + $0x58] sm:$0xff] %v1114_v57  ;;  %v1096_v51 = vpop.xlane.xlu0 %1095  ;;  %v5993_v54 = vsub.f32 %v5991_v41, %v5992_v25  ;;  %v6009_v41 = vld [vmem:[#allocation78_spill] sm:$0xff] }
 0x5c6   : >> { %v1115_v43 = vadd.f32 %v1096_v51, %v1067_v58  ;;  %v1098_v35 = vpop.xlane.xlu1 %1097  ;;  %v1891_v58 = vmul.f32 %v5468_v2, %v1651_v63  ;;  %v5478_v51 = vpop.eup %3606  ;;  %3618 = vpow2.f32 %v1747_v0  ;;  %v1659_v0 = vld [vmem:[#allocation3 + $0xc0] sm:$0xff]  ;;  %v6010_v25 = vsub.f32 %v6009_v41, %v5383_v28  ;;  %v2202_v41 = vld [vmem:[#allocation4 + $0xa8] sm:$0xff] }
 0x5c7   : >> { %v1116_v4 = vadd.f32 %v1098_v35, %v1068_v53  ;;  %v1749_v44 = vmul.f32 1.442695, %v5993_v54  ;;  %v1894_v7 = vmul.f32 %v5478_v51, %v1654_v12 }
 0x5c8   : >> { %1131 = vst [vmem:[#allocation3 + $0x60] sm:$0xff] %v1115_v43  ;;  %v5480_v43 = vpop.eup %3608  ;;  %v1761_v54 = vmul.f32 1.442695, %v6010_v25 }
 0x5c9   : >> { %1132 = vst [vmem:[#allocation3 + $0x68] sm:$0xff] %v1116_v4  ;;  %v1100_v61 = vpop.xlane.xlu0 %1099  ;;  %3620 = vpow2.f32 %v1749_v44  ;;  %v5994_v4 = vld [vmem:[#allocation69_spill] sm:$0xff] }
 0x5ca   : >> { %v1117_v24 = vadd.f32 %v1100_v61, %v1069_v36  ;;  %v1102_v37 = vpop.xlane.xlu1 %1101  ;;  %v5996_v36 = vsub.f32 %v5994_v4, %v5995_v42 }
 0x5cb   : >> { %v1118_v40 = vadd.f32 %v1102_v37, %v1070_v1  ;;  %v5486_v1 = vpop.eup %3610 }
 0x5cc   : >> { %1133 = vst [vmem:[#allocation3 + $0x70] sm:$0xff] %v1117_v24  ;;  %v1751_v61 = vmul.f32 1.442695, %v5996_v36  ;;  %v1893_v24 = vmul.f32 %v5480_v43, %v1653_v60  ;;  %v1895_v49 = vmul.f32 %v5486_v1, %v1655_v19  ;;  %v1661_v60 = vld [vmem:[#allocation3 + $0xd0] sm:$0xff] }
 0x5cd   : >> { %1134 = vst [vmem:[#allocation3 + $0x78] sm:$0xff] %v1118_v40  ;;  %v5489_v40 = vpop.eup %3612 }
 0x5ce   : >> { %3622 = vpow2.f32 %v1751_v61  ;;  %v5497_v15 = vpop.eup %3614  ;;  %v1896_v33 = vmul.f32 %v5489_v40, %v1656_v27  ;;  %v1662_v61 = vld [vmem:[#allocation3 + $0xd8] sm:$0xff] }
 0x5cf   : >> { %v5501_v13 = vpop.eup %3616  ;;  %3624 = vpow2.f32 %v1753_v31  ;;  %v1897_v47 = vmul.f32 %v5497_v15, %v1657_v32 }
 0x5d0   : >> { %3626 = vpow2.f32 %v1755_v48  ;;  %v5509_v55 = vpop.eup %3618  ;;  %v1898_v63 = vmul.f32 %v5501_v13, %v1658_v9 }
 0x5d1   : >> { %3628 = vpow2.f32 %v1757_v30  ;;  %v2198_v30 = vld [vmem:[#allocation4 + $0x88] sm:$0xff] }
 0x5d2   : >> { %3630 = vpow2.f32 %v1759_v17 }
 0x5d3   : >> { %v5513_v45 = vpop.eup %3620  ;;  %3632 = vpow2.f32 %v1761_v54  ;;  %v2201_v54 = vld [vmem:[#allocation4 + $0xa0] sm:$0xff] }
 0x5fc   : >> { %v1910_v57 = vpop.xlane.xlu1 %1909 }
 0x5fd   : >> { %v1940_v56 = vadd.f32 %v1910_v57, %v1892_v16  ;;  %v1908_v53 = vpop.xlane.xlu0 %1907  ;;  %v1660_v16 = vld [vmem:[#allocation3 + $0xc8] sm:$0xff] }
 0x5fe   : >> { %v1939_v35 = vadd.f32 %v1908_v53, %v1891_v58  ;;  %v1899_v58 = vmul.f32 %v5509_v55, %v1659_v0  ;;  %v5520_v53 = vpop.eup %3622 }
 0x5ff   : >> { %1956 = vst [vmem:[#allocation3 + $0x88] sm:$0xff] %v1940_v56  ;;  %v1900_v56 = vmul.f32 %v5513_v45, %v1660_v16  ;;  %v5522_v36 = vpop.eup %3624  ;;  %v1901_v28 = vmul.f32 %v5520_v53, %v1661_v60 }
 0x600   : >> { %1955 = vst [vmem:[#allocation3 + $0x80] sm:$0xff] %v1939_v35 }
 0x601   : >> { %v1914_v37 = vpop.xlane.xlu1 %1913 }
 0x602   : >> { %v1912_v6 = vpop.xlane.xlu0 %1911  ;;  %v1942_v26 = vadd.f32 %v1914_v37, %v1894_v7  ;;  %v5525_v7 = vpop.eup %3626  ;;  %v1663_v37 = vld [vmem:[#allocation3 + $0xe0] sm:$0xff] }
 0x603   : >> { %v1941_v5 = vadd.f32 %v1912_v6, %v1893_v24  ;;  %v5528_v19 = vpop.eup %3628  ;;  %v1903_v27 = vmul.f32 %v5525_v7, %v1663_v37 }
 0x604   : >> { %1958 = vst [vmem:[#allocation3 + $0x98] sm:$0xff] %v1942_v26  ;;  %v1902_v26 = vmul.f32 %v5522_v36, %v1662_v61  ;;  %v5531_v34 = vpop.eup %3630  ;;  %v1904_v38 = vmul.f32 %v5528_v19, %v1664_v10  ;;  %v2207_v10 = vld [vmem:[#allocation4 + $0xd0] sm:$0xff] }
 0x605   : >> { %1957 = vst [vmem:[#allocation3 + $0x90] sm:$0xff] %v1941_v5  ;;  %v5534_v48 = vpop.eup %3632 }
 0x606   : >> { %v1916_v22 = vpop.xlane.xlu0 %1915  ;;  %v1918_v62 = vpop.xlane.xlu1 %1917 }
 0x607   : >> { %v1943_v50 = vadd.f32 %v1916_v22, %v1895_v49  ;;  %v1944_v8 = vadd.f32 %v1918_v62, %v1896_v33  ;;  %v1905_v49 = vmul.f32 %v5531_v34, %v1665_v39  ;;  %v1666_v22 = vld [vmem:[#allocation3 + $0xf8] sm:$0xff]  ;;  %v2223_v39 = vmul.f32 %v5520_v53, %v2207_v10 }
 0x608   : >> { %v1906_v21 = vmul.f32 %v5534_v48, %v1666_v22 }
 0x609   : >> { %1959 = vst [vmem:[#allocation3 + $0xa0] sm:$0xff] %v1943_v50  ;;  %1960 = vst [vmem:[#allocation3 + $0xa8] sm:$0xff] %v1944_v8  ;;  %v2197_v50 = vld [vmem:[#allocation4 + $0x80] sm:$0xff]  ;;  %v2214_v8 = vmul.f32 %v5463_v52, %v2198_v30 }
 0x60a   : >> { %v1920_v14 = vpop.xlane.xlu0 %1919  ;;  %v1922_v29 = vpop.xlane.xlu1 %1921  ;;  %v2213_v11 = vmul.f32 %v5468_v2, %v2197_v50  ;;  %v2218_v2 = vmul.f32 %v5489_v40, %v2202_v41  ;;  %v2206_v40 = vld [vmem:[#allocation4 + $0xc8] sm:$0xff] }
 0x60b   : >> { %v1945_v44 = vadd.f32 %v1920_v14, %v1897_v47  ;;  %v1946_v57 = vadd.f32 %v1922_v29, %v1898_v63  ;;  %v2199_v63 = vld [vmem:[#allocation4 + $0x90] sm:$0xff]  ;;  %v2216_v29 = vmul.f32 %v5478_v51, %v2200_v46  ;;  %v2204_v51 = vld [vmem:[#allocation4 + $0xb8] sm:$0xff] }
 0x60c   : >> { %v2215_v16 = vmul.f32 %v5480_v43, %v2199_v63  ;;  %v2220_v43 = vmul.f32 %v5501_v13, %v2204_v51  ;;  %v2208_v13 = vld [vmem:[#allocation4 + $0xd8] sm:$0xff] }
 0x60d   : >> { %1961 = vst [vmem:[#allocation3 + $0xb0] sm:$0xff] %v1945_v44  ;;  %1962 = vst [vmem:[#allocation3 + $0xb8] sm:$0xff] %v1946_v57 }
 0x60e   : >> { %v1924_v12 = vpop.xlane.xlu0 %1923  ;;  %v1926_v35 = vpop.xlane.xlu1 %1925 }
 0x60f   : >> { %v1947_v4 = vadd.f32 %v1924_v12, %v1899_v58  ;;  %v1948_v42 = vadd.f32 %v1926_v35, %v1900_v56  ;;  %v2217_v58 = vmul.f32 %v5486_v1, %v2201_v54  ;;  %v2203_v35 = vld [vmem:[#allocation4 + $0xb0] sm:$0xff]  ;;  %v2222_v1 = vmul.f32 %v5513_v45, %v2206_v40  ;;  %v2210_v45 = vld [vmem:[#allocation4 + $0xe8] sm:$0xff] }
 0x610   : > { %v2330_v46 = vld [vmem:[#allocation3 + $0xa0] sm:$0xff] (%p509_p6) }
 0x611   : >> { %1963 = vst [vmem:[#allocation3 + $0xc0] sm:$0xff] %v1947_v4  ;;  %1964 = vst [vmem:[#allocation3 + $0xc8] sm:$0xff] %v1948_v42  ;;  %v2219_v42 = vmul.f32 %v5497_v15, %v2203_v35  ;;  %v2224_v15 = vmul.f32 %v5522_v36, %v2208_v13  ;;  %v2212_v36 = vld [vmem:[#allocation4 + $0xf8] sm:$0xff] }
 0x612   : >> { %v1928_v24 = vpop.xlane.xlu0 %1927  ;;  %v2228_v53 = vmul.f32 %v5534_v48, %v2212_v36  ;;  %v2326_v48 = vld [vmem:[#allocation3 + $0x80] sm:$0xff] (%p509_p6) }
 0x613   : >> { %v1949_v6 = vadd.f32 %v1928_v24, %v1901_v28  ;;  %v2205_v24 = vld [vmem:[#allocation4 + $0xc0] sm:$0xff] }
 0x615   : >> { %1965 = vst [vmem:[#allocation3 + $0xd0] sm:$0xff] %v1949_v6  ;;  %v1930_v18 = vpop.xlane.xlu1 %1929 }
 0x616   : >> { %v1932_v31 = vpop.xlane.xlu0 %1931  ;;  %v1950_v5 = vadd.f32 %v1930_v18, %v1902_v26  ;;  %v2221_v26 = vmul.f32 %v5509_v55, %v2205_v24  ;;  %v2226_v55 = vmul.f32 %v5528_v19, %v2210_v45 }
 0x617   : >> { %v1951_v20 = vadd.f32 %v1932_v31, %v1903_v27 }
 0x618   : >> { %1966 = vst [vmem:[#allocation3 + $0xd8] sm:$0xff] %v1950_v5  ;;  %v2334_v41 = vld [vmem:[#allocation3 + $0xc0] sm:$0xff] (%p509_p6) }
 0x619   : >> { %1967 = vst [vmem:[#allocation3 + $0xe0] sm:$0xff] %v1951_v20  ;;  %v1934_v33 = vpop.xlane.xlu1 %1933 }
 0x61a   : >> { %v1936_v62 = vpop.xlane.xlu0 %1935  ;;  %v1952_v32 = vadd.f32 %v1934_v33, %v1904_v38 }
 0x61b   : >> { %v1953_v9 = vadd.f32 %v1936_v62, %v1905_v49  ;;  %v2209_v49 = vld [vmem:[#allocation4 + $0xe0] sm:$0xff] }
 0x61c   : >> { %1968 = vst [vmem:[#allocation3 + $0xe8] sm:$0xff] %v1952_v32  ;;  %v2225_v62 = vmul.f32 %v5525_v7, %v2209_v49  ;;  %v2328_v7 = vld [vmem:[#allocation3 + $0x90] sm:$0xff] (%p509_p6) }
 0x61d   : >> { %1969 = vst [vmem:[#allocation3 + $0xf0] sm:$0xff] %v1953_v9  ;;  %v1938_v59 = vpop.xlane.xlu1 %1937  ;;  %3642 = vrcp.f32 (%p509_p6), %v2328_v7  ;;  %v2263_v7 = vld [vmem:[#allocation3 + $0x10] sm:$0xff] (%p509_p6) }
 0x61e   : >> { %v1954_v23 = vadd.f32 %v1938_v59, %v1906_v21  ;;  %v2211_v21 = vld [vmem:[#allocation4 + $0xf0] sm:$0xff]  ;;  %3644 = vrcp.f32 (%p509_p6), %v2326_v48  ;;  %v2261_v48 = vld [vmem:[#allocation3] sm:$0xff] (%p509_p6) }
 0x61f   : >> { %v2227_v30 = vmul.f32 %v5531_v34, %v2211_v21  ;;  %v2331_v34 = vld [vmem:[#allocation3 + $0xa8] sm:$0xff] (%p509_p6)  ;;  %v2337_v51 = vld [vmem:[#allocation3 + $0xd8] sm:$0xff] (%p509_p6) }
 0x620   : >> { %1970 = vst [vmem:[#allocation3 + $0xf8] sm:$0xff] %v1954_v23 }
 0x623   : > { %v2339_v40 = vld [vmem:[#allocation3 + $0xe8] sm:$0xff] (%p509_p6) }
 0x627   : > { %v2341_v13 = vld [vmem:[#allocation3 + $0xf8] sm:$0xff] (%p509_p6) }
 0x651   : >> { %v3105_v3 = vpop.f32.mrb[16].mxu0 }
 0x652   : >> { %v2230_v17 = vadd.f32 %v3105_v3, %v2214_v8  ;;  %v2117_v47 = vpop.f32.mrb[17].mxu0  ;;  %v2329_v3 = vld [vmem:[#allocation3 + $0x98] sm:$0xff] (%p509_p6) }
 0x653   : >> { %v2229_v14 = vadd.f32 %v2213_v11, %v2117_v47  ;;  %v2327_v11 = vld [vmem:[#allocation3 + $0x88] sm:$0xff] (%p509_p6)  ;;  %3646 = vrcp.f32 (%p509_p6), %v2329_v3  ;;  %v2332_v47 = vld [vmem:[#allocation3 + $0xb0] sm:$0xff] (%p509_p6)  ;;  %v2264_v3 = vld [vmem:[#allocation3 + $0x18] sm:$0xff] (%p509_p6) }
 0x654   : >> { %2246 = vst.msk [vmem:[#allocation4 + $0x88] sm:$0xff] %vm442_vm0, %v2230_v17  ;;  %3648 = vrcp.f32 (%p509_p6), %v2327_v11  ;;  %v2333_v17 = vld [vmem:[#allocation3 + $0xb8] sm:$0xff] (%p509_p6)  ;;  %v2262_v11 = vld [vmem:[#allocation3 + $0x8] sm:$0xff] (%p509_p6) }
 0x655   : >> { %2245 = vst.msk [vmem:[#allocation4 + $0x80] sm:$0xff] %vm442_vm0, %v2229_v14  ;;  %v3108_v0 = vpop.f32.mrb[18].mxu0  ;;  %3650 = vrcp.f32 (%p509_p6), %v2331_v34  ;;  %v2266_v34 = vld [vmem:[#allocation3 + $0x28] sm:$0xff] (%p509_p6) }
 0x656   : >> { %v2232_v25 = vadd.f32 %v3108_v0, %v2216_v29  ;;  %v2127_v52 = vpop.f32.mrb[19].mxu0  ;;  %3652 = vrcp.f32 (%p509_p6), %v2330_v46  ;;  %v2335_v29 = vld [vmem:[#allocation3 + $0xc8] sm:$0xff] (%p509_p6)  ;;  %v3643_v0 = vpop.eup (%p509_p6), %3642  ;;  %v2265_v46 = vld [vmem:[#allocation3 + $0x20] sm:$0xff] (%p509_p6) }
 0x657   : >> { %v2231_v44 = vadd.f32 %v2215_v16, %v2127_v52  ;;  %3654 = vrcp.f32 (%p509_p6), %v2333_v17  ;;  %v2268_v17 = vld [vmem:[#allocation3 + $0x38] sm:$0xff] (%p509_p6) }
 0x658   : >> { %2248 = vst.msk [vmem:[#allocation4 + $0x98] sm:$0xff] %vm442_vm0, %v2232_v25  ;;  %3656 = vrcp.f32 (%p509_p6), %v2332_v47  ;;  %v3645_v25 = vpop.eup (%p509_p6), %3644 }
 0x659   : >> { %2247 = vst.msk [vmem:[#allocation4 + $0x90] sm:$0xff] %vm442_vm0, %v2231_v44  ;;  %v3111_v57 = vpop.f32.mrb[20].mxu0  ;;  %3658 = vrcp.f32 (%p509_p6), %v2335_v29 }
 0x65a   : >> { %v2234_v56 = vadd.f32 %v3111_v57, %v2218_v2  ;;  %v2137_v12 = vpop.f32.mrb[21].mxu0  ;;  %3660 = vrcp.f32 (%p509_p6), %v2334_v41  ;;  %v2270_v41 = vld [vmem:[#allocation3 + $0x48] sm:$0xff] (%p509_p6) }
 0x65b   : >> { %v2233_v60 = vadd.f32 %v2217_v58, %v2137_v12  ;;  %v2360_v54 = vld [vmem:[#allocation4 + $0x88] sm:$0xff] (%p509_p6)  ;;  %3662 = vrcp.f32 (%p509_p6), %v2337_v51 }
 0x65c   : >> { %2250 = vst.msk [vmem:[#allocation4 + $0xa8] sm:$0xff] %vm442_vm0, %v2234_v56  ;;  %v2359_v14 = vld [vmem:[#allocation4 + $0x80] sm:$0xff] (%p509_p6) }
 0x65d   : >> { %2249 = vst.msk [vmem:[#allocation4 + $0xa0] sm:$0xff] %vm442_vm0, %v2233_v60  ;;  %v3114_v4 = vpop.f32.mrb[22].mxu0  ;;  %v3647_v44 = vpop.eup (%p509_p6), %3646  ;;  %v2375_v2 = vmul.f32 (%p509_p6), %v3645_v25, %v2359_v14  ;;  %v2336_v60 = vld [vmem:[#allocation3 + $0xd0] sm:$0xff] (%p509_p6) }
 0x65e   : >> { %v2236_v28 = vadd.f32 %v3114_v4, %v2220_v43  ;;  %v2147_v61 = vpop.f32.mrb[23].mxu0  ;;  %v3649_v57 = vpop.eup (%p509_p6), %3648  ;;  %3664 = vrcp.f32 (%p509_p6), %v2336_v60  ;;  %v2267_v14 = vld [vmem:[#allocation3 + $0x30] sm:$0xff] (%p509_p6) }
 0x65f   : >> { %v2235_v37 = vadd.f32 %v2219_v42, %v2147_v61  ;;  %v2362_v16 = vld [vmem:[#allocation4 + $0x98] sm:$0xff] (%p509_p6)  ;;  %v3651_v56 = vpop.eup (%p509_p6), %3650  ;;  %2407 = vrot.lane.b32.xlu0 (%p509_p6), %v2375_v2, %s3983_s17  ;;  %v2376_v12 = vmul.f32 (%p509_p6), %v3649_v57, %v2360_v54  ;;  %3666 = vrcp.f32 (%p509_p6), %v2339_v40  ;;  %v2294_v57 = vld [vmem:[#allocation4 + $0x8] sm:$0xff] (%p509_p6)  ;;  %v2271_v40 = vld [vmem:[#allocation3 + $0x50] sm:$0xff] (%p509_p6) }
 0x660   : >> { %2252 = vst.msk [vmem:[#allocation4 + $0xb8] sm:$0xff] %vm442_vm0, %v2236_v28  ;;  %v2361_v63 = vld [vmem:[#allocation4 + $0x90] sm:$0xff] (%p509_p6)  ;;  %v2378_v58 = vmul.f32 (%p509_p6), %v3647_v44, %v2362_v16  ;;  %v3653_v43 = vpop.eup (%p509_p6), %3652  ;;  %v2296_v54 = vld [vmem:[#allocation4 + $0x18] sm:$0xff] (%p509_p6)  ;;  %v2269_v44 = vld [vmem:[#allocation3 + $0x40] sm:$0xff] (%p509_p6) }
 0x661   : >> { %2251 = vst.msk [vmem:[#allocation4 + $0xb0] sm:$0xff] %vm442_vm0, %v2235_v37  ;;  %v3117_v6 = vpop.f32.mrb[24].mxu0  ;;  %v2377_v52 = vmul.f32 (%p509_p6), %v3643_v0, %v2361_v63  ;;  %v3655_v28 = vpop.eup (%p509_p6), %3654  ;;  %v2338_v37 = vld [vmem:[#allocation3 + $0xe0] sm:$0xff] (%p509_p6)  ;;  %v2295_v63 = vld [vmem:[#allocation4 + $0x10] sm:$0xff] (%p509_p6) }
 0x662   : >> { %v2238_v27 = vadd.f32 %v3117_v6, %v2222_v1  ;;  %v2157_v18 = vpop.f32.mrb[25].mxu0  ;;  %v3657_v1 = vpop.eup (%p509_p6), %3656  ;;  %3668 = vrcp.f32 (%p509_p6), %v2338_v37  ;;  %v2293_v0 = vld [vmem:[#allocation4] sm:$0xff] (%p509_p6) }
 0x663   : >> { %v2237_v31 = vadd.f32 %v2221_v26, %v2157_v18  ;;  %2411 = vrot.lane.b32.xlu1 (%p509_p6), %v2377_v52, %s3983_s17  ;;  %v2364_v35 = vld [vmem:[#allocation4 + $0xa8] sm:$0xff] (%p509_p6)  ;;  %2409 = vrot.lane.b32.xlu0 (%p509_p6), %v2376_v12, %s3983_s17  ;;  %3670 = vrcp.f32 (%p509_p6), %v2341_v13 }
 0x664   : >> { %2254 = vst.msk [vmem:[#allocation4 + $0xc8] sm:$0xff] %vm442_vm0, %v2238_v27  ;;  %v2363_v4 = vld [vmem:[#allocation4 + $0xa0] sm:$0xff] (%p509_p6)  ;;  %v2380_v42 = vmul.f32 (%p509_p6), %v3651_v56, %v2364_v35  ;;  %v3659_v27 = vpop.eup (%p509_p6), %3658  ;;  %v2272_v35 = vld [vmem:[#allocation3 + $0x58] sm:$0xff] (%p509_p6) }
 0x665   : >> { %2253 = vst.msk [vmem:[#allocation4 + $0xc0] sm:$0xff] %vm442_vm0, %v2237_v31  ;;  %v3120_v5 = vpop.f32.mrb[26].mxu0  ;;  %v2379_v61 = vmul.f32 (%p509_p6), %v3653_v43, %v2363_v4  ;;  %v2340_v31 = vld [vmem:[#allocation3 + $0xf0] sm:$0xff] (%p509_p6) }
 0x666   : >> { %v2240_v20 = vadd.f32 %v3120_v5, %v2224_v15  ;;  %v2167_v38 = vpop.f32.mrb[27].mxu0  ;;  %v3661_v15 = vpop.eup (%p509_p6), %3660  ;;  %3672 = vrcp.f32 (%p509_p6), %v2340_v31  ;;  %v2273_v31 = vld [vmem:[#allocation3 + $0x60] sm:$0xff] (%p509_p6) }
 0x667   : >> { %v2239_v33 = vadd.f32 %v2223_v39, %v2167_v38  ;;  %2413 = vrot.lane.b32.xlu1 (%p509_p6), %v2378_v58, %s3983_s17  ;;  %v2366_v24 = vld [vmem:[#allocation4 + $0xb8] sm:$0xff] (%p509_p6)  ;;  %2415 = vrot.lane.b32.xlu0 (%p509_p6), %v2379_v61, %s3983_s17  ;;  %v3663_v45 = vpop.eup (%p509_p6), %3662  ;;  %3674 = vrcp.f32 (%p509_p6), %v2263_v7  ;;  %v2297_v61 = vld [vmem:[#allocation4 + $0x20] sm:$0xff] (%p509_p6) }
 0x668   : >> { %2256 = vst.msk [vmem:[#allocation4 + $0xd8] sm:$0xff] %vm442_vm0, %v2240_v20  ;;  %v2365_v6 = vld [vmem:[#allocation4 + $0xb0] sm:$0xff] (%p509_p6)  ;;  %v2382_v26 = vmul.f32 (%p509_p6), %v3655_v28, %v2366_v24  ;;  %v3665_v49 = vpop.eup (%p509_p6), %3664  ;;  %3676 = vrcp.f32 (%p509_p6), %v2261_v48 }
 0x669   : >> { %2255 = vst.msk [vmem:[#allocation4 + $0xd0] sm:$0xff] %vm442_vm0, %v2239_v33  ;;  %v3123_v22 = vpop.f32.mrb[28].mxu0  ;;  %v2381_v18 = vmul.f32 (%p509_p6), %v3657_v1, %v2365_v6  ;;  %3678 = vrcp.f32 (%p509_p6), %v2264_v3  ;;  %v2303_v48 = vld [vmem:[#allocation4 + $0x50] sm:$0xff] (%p509_p6) }
 0x66a   : >> { %v2242_v32 = vadd.f32 %v3123_v22, %v2226_v55  ;;  %v2177_v9 = vpop.f32.mrb[29].mxu0  ;;  %v3667_v22 = vpop.eup (%p509_p6), %3666  ;;  %3680 = vrcp.f32 (%p509_p6), %v2262_v11 }
 0x66b   : >> { %v2241_v59 = vadd.f32 %v2225_v62, %v2177_v9  ;;  %511 = sbr.rel (!%p509_p6) target bundleno = 245 (0xf5), region = 133  ;;  %2417 = vrot.lane.b32.xlu1 (%p509_p6), %v2380_v42, %s3983_s17  ;;  %v2368_v10 = vld [vmem:[#allocation4 + $0xc8] sm:$0xff] (%p509_p6)  ;;  %2419 = vrot.lane.b32.xlu0 (%p509_p6), %v2381_v18, %s3983_s17  ;;  %3682 = vrcp.f32 (%p509_p6), %v2266_v34 }
 0x66c   : >> { %2258 = vst.msk [vmem:[#allocation4 + $0xe8] sm:$0xff] %vm442_vm0, %v2242_v32  ;;  %v2367_v5 = vld [vmem:[#allocation4 + $0xc0] sm:$0xff] (%p509_p6)  ;;  %v2384_v39 = vmul.f32 (%p509_p6), %v3659_v27, %v2368_v10  ;;  %v3669_v32 = vpop.eup (%p509_p6), %3668  ;;  %3684 = vrcp.f32 (%p509_p6), %v2265_v46  ;;  %v2298_v42 = vld [vmem:[#allocation4 + $0x28] sm:$0xff] (%p509_p6)  ;;  %v2300_v10 = vld [vmem:[#allocation4 + $0x38] sm:$0xff] (%p509_p6) }
 0x66d   : >> { %2257 = vst.msk [vmem:[#allocation4 + $0xe0] sm:$0xff] %vm442_vm0, %v2241_v59  ;;  %v3126_v23 = vpop.f32.mrb[30].mxu0  ;;  %v2383_v20 = vmul.f32 (%p509_p6), %v3661_v15, %v2367_v5  ;;  %v3671_v59 = vpop.eup (%p509_p6), %3670  ;;  %3686 = vrcp.f32 (%p509_p6), %v2268_v17  ;;  %v2299_v5 = vld [vmem:[#allocation4 + $0x30] sm:$0xff] (%p509_p6) }
 0x66e   : >> { %v2244_v19 = vadd.f32 %v3126_v23, %v2228_v53  ;;  %v2187_v50 = vpop.f32.mrb[31].mxu0  ;;  %3688 = vrcp.f32 (%p509_p6), %v2267_v14  ;;  %v2306_v14 = vld [vmem:[#allocation4 + $0x68] sm:$0xff] (%p509_p6) }
 0x66f   : >> { %v2243_v8 = vadd.f32 %v2227_v30, %v2187_v50  ;;  %2421 = vrot.lane.b32.xlu1 (%p509_p6), %v2382_v26, %s3983_s17  ;;  %v2370_v38 = vld [vmem:[#allocation4 + $0xd8] sm:$0xff] (%p509_p6)  ;;  %2423 = vrot.lane.b32.xlu0 (%p509_p6), %v2383_v20, %s3983_s17  ;;  %3690 = vrcp.f32 (%p509_p6), %v2270_v41  ;;  %v2274_v26 = vld [vmem:[#allocation3 + $0x68] sm:$0xff] (%p509_p6) }
 0x670   : >> { %2260 = vst.msk [vmem:[#allocation4 + $0xf8] sm:$0xff] %vm442_vm0, %v2244_v19  ;;  %v2369_v33 = vld [vmem:[#allocation4 + $0xd0] sm:$0xff] (%p509_p6)  ;;  %v2386_v55 = vmul.f32 (%p509_p6), %v3663_v45, %v2370_v38  ;;  %v3673_v30 = vpop.eup (%p509_p6), %3672  ;;  %3692 = vrcp.f32 (%p509_p6), %v2269_v44 }
 0x671   : >> { %2259 = vst.msk [vmem:[#allocation4 + $0xf0] sm:$0xff] %vm442_vm0, %v2243_v8  ;;  %v2385_v62 = vmul.f32 (%p509_p6), %v3665_v49, %v2369_v33  ;;  %v3675_v47 = vpop.eup (%p509_p6), %3674  ;;  %3694 = vrcp.f32 (%p509_p6), %v2272_v35  ;;  %v2276_v49 = vld [vmem:[#allocation3 + $0x78] sm:$0xff] (%p509_p6) }
 0x672   : > { %v3677_v29 = vpop.eup %3676  ;;  %v2311_v16 = vmul.f32 %v3675_v47, %v2295_v63  ;;  %3696 = vrcp.f32 %v2271_v40 }
 0x673   : > { %2425 = vrot.lane.b32.xlu1 %v2384_v39, %s3983_s17  ;;  %v2372_v36 = vld [vmem:[#allocation4 + $0xe8] sm:$0xff]  ;;  %2427 = vrot.lane.b32.xlu0 %v2385_v62, %s3983_s17  ;;  %v3679_v25 = vpop.eup %3678  ;;  %v2309_v52 = vmul.f32 %v3677_v29, %v2293_v0  ;;  %3698 = vrcp.f32 %v2274_v26  ;;  %v2305_v0 = vld [vmem:[#allocation4 + $0x60] sm:$0xff] }
 0x674   : > { %v2371_v9 = vld [vmem:[#allocation4 + $0xe0] sm:$0xff]  ;;  %v2388_v21 = vmul.f32 %v3667_v22, %v2372_v36  ;;  %v3681_v2 = vpop.eup %3680  ;;  %v2312_v12 = vmul.f32 %v3679_v25, %v2296_v54  ;;  %3700 = vrcp.f32 %v2273_v31  ;;  %v2302_v62 = vld [vmem:[#allocation4 + $0x48] sm:$0xff]  ;;  %v2275_v36 = vld [vmem:[#allocation3 + $0x70] sm:$0xff] }
 0x675   : > { %v2387_v53 = vmul.f32 %v3669_v32, %v2371_v9  ;;  %v3683_v60 = vpop.eup %3682  ;;  %v2310_v4 = vmul.f32 %v3681_v2, %v2294_v57  ;;  %v2301_v9 = vld [vmem:[#allocation4 + $0x40] sm:$0xff]  ;;  %3702 = vrcp.f32 %v2276_v49  ;;  %v2308_v57 = vld [vmem:[#allocation4 + $0x78] sm:$0xff] }
 0x676   : > { %v3685_v28 = vpop.eup %3684  ;;  %v2314_v6 = vmul.f32 %v3683_v60, %v2298_v42  ;;  %3704 = vrcp.f32 %v2275_v36 }
 0x677   : > { %2429 = vrot.lane.b32.xlu1 %v2386_v55, %s3983_s17  ;;  %v2374_v23 = vld [vmem:[#allocation4 + $0xf8] sm:$0xff]  ;;  %2431 = vrot.lane.b32.xlu0 %v2387_v53, %s3983_s17  ;;  %v3687_v13 = vpop.eup %3686  ;;  %v2313_v18 = vmul.f32 %v3685_v28, %v2297_v61 }
 0x678   : > { %v2373_v19 = vld [vmem:[#allocation4 + $0xf0] sm:$0xff]  ;;  %v2390_v50 = vmul.f32 %v3671_v59, %v2374_v23  ;;  %v3689_v15 = vpop.eup %3688  ;;  %v2316_v38 = vmul.f32 %v3687_v13, %v2300_v10 }
 0x679   : > { %v2389_v8 = vmul.f32 %v3673_v30, %v2373_v19  ;;  %v3691_v33 = vpop.eup %3690  ;;  %v2315_v22 = vmul.f32 %v3689_v15, %v2299_v5 }
 0x67a   : > { %v3693_v32 = vpop.eup %3692  ;;  %v2318_v23 = vmul.f32 %v3691_v33, %v2302_v62 }
 0x67b   : > { %2433 = vrot.lane.b32.xlu1 %v2388_v21, %s3983_s17  ;;  %2435 = vrot.lane.b32.xlu0 %v2389_v8, %s3983_s17  ;;  %v3695_v30 = vpop.eup %3694  ;;  %v2304_v8 = vld [vmem:[#allocation4 + $0x58] sm:$0xff] }
 0x67c   : > { %v3697_v7 = vpop.eup %3696  ;;  %v2320_v46 = vmul.f32 %v3695_v30, %v2304_v8 }
 0x67d   : > { %v3699_v17 = vpop.eup %3698  ;;  %v2319_v63 = vmul.f32 %v3697_v7, %v2303_v48 }
 0x67e   : > { %v3701_v29 = vpop.eup %3700 }
 0x67f   : > { %2437 = vrot.lane.b32.xlu1 %v2390_v50, %s3983_s17  ;;  %v2317_v50 = vmul.f32 %v3693_v32, %v2301_v9  ;;  %v3703_v54 = vpop.eup %3702  ;;  %v2321_v2 = vmul.f32 %v3701_v29, %v2305_v0 }
 0x680   : > { %v2324_v60 = vmul.f32 %v3703_v54, %v2308_v57 }
 0x6d1   : > { %v2408_v56 = vpop.permute.xlu0 %2407 }
 0x6d2   : > { %v2455_v43 = vsel %vm442_vm0, %v2309_v52, %v2408_v56  ;;  %v2322_v52 = vmul.f32 %v3699_v17, %v2306_v14 }
 0x6d3   : > { %2471 = vst [vmem:[%s4499_s9] sm:$0xff] %v2455_v43 }
 0x6d5   : > { %v2412_v58 = vpop.permute.xlu1 %2411  ;;  %v2410_v1 = vpop.permute.xlu0 %2409 }
 0x6d6   : > { %v2457_v51 = vsel %vm442_vm0, %v2311_v16, %v2412_v58  ;;  %v2456_v27 = vsel %vm442_vm0, %v2310_v4, %v2410_v1  ;;  %v3705_v58 = vpop.eup %3704 }
 0x6d7   : > { %2473 = vst [vmem:[%s4499_s9 + $0x10] sm:$0xff] %v2457_v51  ;;  %2472 = vst [vmem:[%s4499_s9 + $0x8] sm:$0xff] %v2456_v27  ;;  %v2307_v51 = vld [vmem:[#allocation4 + $0x70] sm:$0xff] }
 0x6d8   : > { %v2323_v4 = vmul.f32 %v3705_v58, %v2307_v51 }
 0x6d9   : > { %v2414_v24 = vpop.permute.xlu1 %2413  ;;  %v2416_v20 = vpop.permute.xlu0 %2415 }
 0x6da   : > { %v2458_v37 = vsel %vm442_vm0, %v2312_v12, %v2414_v24  ;;  %v2459_v55 = vsel %vm442_vm0, %v2313_v18, %v2416_v20 }
 0x6db   : > { %2474 = vst [vmem:[%s4499_s9 + $0x18] sm:$0xff] %v2458_v37  ;;  %2475 = vst [vmem:[%s4499_s9 + $0x20] sm:$0xff] %v2459_v55 }
 0x6dd   : > { %v2418_v39 = vpop.permute.xlu1 %2417  ;;  %v2420_v53 = vpop.permute.xlu0 %2419 }
 0x6de   : > { %v2460_v45 = vsel %vm442_vm0, %v2314_v6, %v2418_v39  ;;  %v2461_v19 = vsel %vm442_vm0, %v2315_v22, %v2420_v53 }
 0x6df   : > { %2476 = vst [vmem:[%s4499_s9 + $0x28] sm:$0xff] %v2460_v45  ;;  %2477 = vst [vmem:[%s4499_s9 + $0x30] sm:$0xff] %v2461_v19 }
 0x6e1   : > { %v2422_v21 = vpop.permute.xlu1 %2421  ;;  %v2424_v34 = vpop.permute.xlu0 %2423 }
 0x6e2   : > { %v2462_v59 = vsel %vm442_vm0, %v2316_v38, %v2422_v21  ;;  %v2463_v47 = vsel %vm442_vm0, %v2317_v50, %v2424_v34 }
 0x6e3   : > { %2478 = vst [vmem:[%s4499_s9 + $0x38] sm:$0xff] %v2462_v59  ;;  %2479 = vst [vmem:[%s4499_s9 + $0x40] sm:$0xff] %v2463_v47 }
 0x6e5   : > { %v2426_v3 = vpop.permute.xlu1 %2425  ;;  %v2428_v25 = vpop.permute.xlu0 %2427 }
 0x6e6   : > { %v2464_v11 = vsel %vm442_vm0, %v2318_v23, %v2426_v3  ;;  %v2465_v44 = vsel %vm442_vm0, %v2319_v63, %v2428_v25 }
 0x6e7   : > { %2480 = vst [vmem:[%s4499_s9 + $0x48] sm:$0xff] %v2464_v11  ;;  %2481 = vst [vmem:[%s4499_s9 + $0x50] sm:$0xff] %v2465_v44 }
 0x6e9   : > { %v2430_v16 = vpop.permute.xlu1 %2429  ;;  %v2432_v35 = vpop.permute.xlu0 %2431 }
 0x6ea   : > { %v2466_v41 = vsel %vm442_vm0, %v2320_v46, %v2430_v16  ;;  %v2467_v43 = vsel %vm442_vm0, %v2321_v2, %v2432_v35 }
 0x6eb   : > { %2482 = vst [vmem:[%s4499_s9 + $0x58] sm:$0xff] %v2466_v41  ;;  %2483 = vst [vmem:[%s4499_s9 + $0x60] sm:$0xff] %v2467_v43 }
 0x6ed   : > { %v2434_v56 = vpop.permute.xlu1 %2433  ;;  %v2436_v28 = vpop.permute.xlu0 %2435 }
 0x6ee   : > { %v2468_v12 = vsel %vm442_vm0, %v2322_v52, %v2434_v56  ;;  %v2469_v61 = vsel %vm442_vm0, %v2323_v4, %v2436_v28 }
 0x6ef   : > { %2484 = vst [vmem:[%s4499_s9 + $0x68] sm:$0xff] %v2468_v12  ;;  %2485 = vst [vmem:[%s4499_s9 + $0x70] sm:$0xff] %v2469_v61 }
 0x6f1   : > { %v2438_v42 = vpop.permute.xlu1 %2437 }
 0x6f2   : > { %v2470_v40 = vsel %vm442_vm0, %v2324_v60, %v2438_v42 }
 0x6f3   : > { %2486 = vst [vmem:[%s4499_s9 + $0x78] sm:$0xff] %v2470_v40 }
 0x6f4   : > { %3841 = shalt.err (!%p3838_p9)
}
 0x6f5   : > { %s3842_s10 = scalar_lea.hbm %s5623_s30, 2048  ;;  %s3846_s7 = scalar_lea.hbm %s6012_s1, 8192 }
 0x6f6   : > { %p3843_p10 = scmp.ne.s32.totalorder %s5623_s30, %s3842_s10  ;;  %p3847_p3 = scmp.lt.u32.totalorder %s5623_s30, %s6012_s1 }
 0x6f7   : > { %p3848_p12 = scmp.lt.u32.totalorder %s3846_s7, %s3842_s10  ;;  %p3850_p4 = scmp.lt.u32.totalorder %s3842_s10, %s5623_s30 }
 0x6f8   : > { %p3844_p7 = pnand %p3843_p10, %p6013_p13 }
 0x6f9   : > { %p3849_p6 = por %p3848_p12, %p3847_p3 }
 0x6fa   : > { %p3845_p8 = pneg %p3844_p7 }
 0x6fb   : > { %p3851_p2 = por %p3850_p4, %p3849_p6 }
 0x6fd   : > { %p3852_p11 = pnand %p3851_p2, %p3845_p8 }
 0x6ff   : > { %3855 = shalt.err (!%p3852_p11)
}
 0x700   : > { %s3985_s26 = smov 128   ;;  %s3986_s29 = smov 8  }
 0x701   : > { %3297 = dma.vmem_to_hbm [thread:$0]  (%p6013_p13), %s5625_s24, 2048, %s5623_s30, %s5633_s6, %s3985_s26, %s3985_s26, %s3986_s29  }
 0x702 PF: > { %s6014_s23 = sld [smem:[#allocation19_spill]]  ;;  %s6015_s20 = sld [smem:[#allocation29_spill]] }
 0x703   : > { %p3317_p1 = scmp.ge.s32.totalorder %s3966_s25, 2 }
 0x708   : > { %s2519_s17 = sand.u32 1, %s6014_s23   ;;  %p6016_p5 = scmp.ne.s32.totalorder %s6015_s20, 0 }
 0x709   : > { %s2520_s28 = scalar_lea.sflag [#allocation7], %s2519_s17 }
 0x70a   : > { %p3313_p0 = pnand %p3317_p1, %p6016_p5 }
 0x70c   : > { %3921 = dma.done.wait (!%p3313_p0), %s2520_s28, 2048  }
 0x70d   : > { %3923 = vsyncadd (!%p3313_p0), %s2520_s28, 4294965248  ;;  %s26_s25 = sadd.s32 1, %s3966_s25   ;;  %s6017_s5 = sld [smem:[#allocation20_spill]] }
 0x70e   : > { %p23_p9 = scmp.ge.s32.totalorder %s26_s25, 6   ;;  %s6018_s17 = sld [smem:[#allocation27_spill]] }
 0x70f   : > { %s6019_s2 = sld [smem:[#allocation21_spill]]  ;;  %s6020_s20 = sld [smem:[#allocation28_spill]] }
 0x710   : > { %s6021_s21 = sld [smem:[#allocation23_spill]]  ;;  %s6022_s22 = sld [smem:[#allocation24_spill]] }
 0x711   : > { %s6023_s23 = sld [smem:[#allocation25_spill]]  ;;  %s6024_s24 = sld [smem:[#allocation26_spill]] }
 0x712   : > { %s6025_s15 = smov %s3930_s16  ;;  %s6027_s18 = smov %s3942_s19 }
 0x713   : > { %s6026_s16 = smov %s6017_s5  ;;  %25 = sbr.rel (!%p23_p9) target bundleno = 18 (0x12), region = 144 }
 0x715   : > { %s6028_s19 = smov %s6019_s2 }
 0x71a   :  { %2525 = vsyncpa [#allocation6], 1 }
 0x71b   :  { %2527 = vsyncpa [#allocation6 + $0x1], 1 }
 0x71c   :  { %2528 = vsyncpa [#allocation9], 1 }
 0x71d   :  { %2530 = vsyncpa [#allocation9 + $0x1], 1 }
 0x71e   :  { %2531 = vsyncpa [#allocation12], 1 }
 0x71f   :  { %2533 = vsyncpa [#allocation12 + $0x1], 1 }
 0x720   :  { %2534 = vsyncpa [#allocation7], 1 }
 0x721   :  { %2536 = vsyncpa [#allocation7 + $0x1], 1 }

</bundles_post_ra>
